<compile_context>
chip_gen: v6e
topology: v6e:2x2x1
jax: 0.10.0
libtpu: 0.0.40
codegen_flags: <defaults>
</compile_context>

<pallas_src>
import functools

import jax
import jax.numpy as jnp
from jax import lax
from jax.experimental import pallas as pl
from jax.experimental.pallas import tpu as pltpu


# -----------------------------------------------------------------------------
# Helpers
# -----------------------------------------------------------------------------
def _round_up(x, m):
    return ((x + m - 1) // m) * m


def _pad2(a, rows, cols):
    out = jnp.zeros((rows, cols), a.dtype)
    return out.at[: a.shape[0], : a.shape[1]].set(a)


def _choose_tiles(batch, seq, dp, hp, vp):
    """Batch rows per step (TB) and sequence tile (TS; full S when it fits)."""
    if batch <= 8:
        tb = batch
    else:
        tb = next(t for t in (8, 4, 2, 1) if batch % t == 0)

    budget = 12 << 20  # per-step intermediate budget (conservative for v7x)

    def fits(ts):
        return tb * ts * (vp + 3 * dp + hp) * 4 <= budget

    if fits(seq):
        return tb, seq
    for ts in (2048, 1024, 512, 256, 128):   # BlockSpec needs 128-multiples
        if seq % ts == 0 and fits(ts):
            return tb, ts
    return tb, seq


def _vmem_limit_bytes(tb, ts, dp, hp, vp, cp):
    f32 = 4
    weights = (dp * vp + dp * dp + dp * cp + 3 * dp + hp + cp) * f32 + 2 * dp * hp
    stream = 2 * (2 * tb * ts * f32 + tb * f32 + tb * cp * f32)   # double-buffered IO
    interm = tb * ts * (vp + 3 * dp + hp) * f32                   # live per-row temps
    need = 2 * weights + stream + interm + tb * dp * f32
    try:
        info = pltpu.get_tpu_info()
        phys = getattr(info, "vmem_capacity_bytes", None) or (64 << 20)
    except Exception:
        phys = 64 << 20
    cap = min(int(phys * 3 // 4), 100 << 20)   # 96 MiB on v5e/v6e, 48 MiB on v7x
    return int(min(max(2 * need, 16 << 20), cap))


# -----------------------------------------------------------------------------
# Fused kernel: in-VMEM gather + gated MLP blend + masked mean pool + head
# -----------------------------------------------------------------------------
def _fused_sentiment_kernel(old_vocab_len, with_mlp,
                            newcnt_ref,                       # SMEM (B, n_s) i32
                            ids_ref, amask_ref, invd_ref,
                            table_t_ref, w1t_ref, b1t_ref, w2t_ref, b2t_ref,
                            wp_ref, bp_ref, wc_ref, bc_ref,
                            logits_ref, acc_ref):
    bi = pl.program_id(0)
    si = pl.program_id(1)
    n_s = pl.num_programs(1)
    tb = ids_ref.shape[0]
    vp = table_t_ref.shape[1]
    ts = ids_ref.shape[2]

    @pl.when(si == 0)
    def _init():
        acc_ref[...] = jnp.zeros_like(acc_ref)

    for r in range(tb):                                   # static unroll: no grid-step overhead
        ids_r = ids_ref[r]                                 # (1, TS) int32, lane-dense
        mask_r = amask_ref[r]                              # (1, TS) f32

        # Embedding gather fused in-VMEM: exact one-hot (0/1 weights) MXU matmul.
        onehot_t = (lax.broadcasted_iota(jnp.int32, (vp, ts), 0)
                    == ids_r).astype(jnp.float32)          # (Vp, TS)
        x_t = jnp.dot(table_t_ref[...], onehot_t,
                      preferred_element_type=jnp.float32)  # (Dp, TS) f32

        # Mask-weighted pooling contribution (lane reduce, XLU); lane-dense acc row.
        acc_ref[r:r + 1, :] += jnp.sum(x_t * mask_r, axis=1, keepdims=True).T

        if with_mlp:
            # Skip both MXU matmuls + gelu when this (row, seq-tile) has no
            # (unmasked) finance/stock added-vocab tokens (scalar-prefetch gate).
            @pl.when(newcnt_ref[bi * tb + r, si] > 0)
            def _mlp_correction():
                # TODO(synk): torch nn.GELU uses the exact erf form; the tanh
                # approximation (EUP-friendly) gives ~1e-3 level drift.
                hid = jnp.dot(w1t_ref[...], x_t.astype(jnp.bfloat16),
                              preferred_element_type=jnp.float32) + b1t_ref[...]
                hid = jax.nn.gelu(hid, approximate=True)
                y_t = jnp.dot(w2t_ref[...], hid.astype(jnp.bfloat16),
                              preferred_element_type=jnp.float32) + b2t_ref[...]
                # blended = x + is_new * (MLP(x) - x); only the correction term is
                # conditional, folded straight into the pooling accumulator.
                w_new = mask_r * (ids_r >= old_vocab_len).astype(jnp.float32)
                acc_ref[r:r + 1, :] += jnp.sum((y_t - x_t) * w_new,
                                               axis=1, keepdims=True).T

    @pl.when(si == n_s - 1)
    def _finalize():
        for r in range(tb):
            # Exact 1/denom precomputed in the wrapper (no approx reciprocal).
            pooled = acc_ref[r:r + 1, :] * invd_ref[r]                    # (1, Dp)
            hp = jnp.tanh(jnp.dot(pooled, wp_ref[...],
                                  preferred_element_type=jnp.float32) + bp_ref[...])
            logits_ref[r] = (jnp.dot(hp, wc_ref[...],
                                     preferred_element_type=jnp.float32)
                             + bc_ref[...])                               # (1, Cp)


def fused_sentiment_head(input_ids, attention_mask,
                         table_t, w1_t, b1_t, w2_t, b2_t, wp, bp, wc, bc,
                         *, old_vocab_len, num_classes, with_mlp):
    """ids/mask (B, S) -> logits (B, num_classes) f32."""
    B, S = input_ids.shape
    Dp, Vp = table_t.shape
    Hp = w1_t.shape[0]
    Cp = wc.shape[1]

    TB, TS = _choose_tiles(B, S, Dp, Hp, Vp)
    n_b, n_s = B // TB, S // TS
    assert n_b * TB == B and n_s * TS == S

    ids3 = input_ids.astype(jnp.int32).reshape(B, 1, S)      # lane-dense rows
    amask3 = attention_mask.astype(jnp.float32).reshape(B, 1, S)
    denom = jnp.maximum(jnp.sum(amask3, axis=-1), 1.0)       # (B, 1)
    invd3 = (1.0 / denom).reshape(B, 1, 1)                    # exact reciprocal
    # per (batch row, seq tile) count of unmasked added-vocab tokens (MLP gate)
    has_new = (input_ids >= old_vocab_len) & (attention_mask > 0)
    newcnt = jnp.sum(has_new.astype(jnp.int32).reshape(B, n_s, TS), axis=-1)

    idx_bs = lambda b, s, cnt: (b, 0, s)
    idx_b = lambda b, s, cnt: (b, 0, 0)
    const2 = lambda b, s, cnt: (0, 0)

    in_specs = [
        pl.BlockSpec((TB, 1, TS), idx_bs),       # token ids
        pl.BlockSpec((TB, 1, TS), idx_bs),       # attention mask
        pl.BlockSpec((TB, 1, 1), idx_b),         # exact inverse denominator
        pl.BlockSpec(table_t.shape, const2),     # VMEM-resident weights
        pl.BlockSpec(w1_t.shape, const2),
        pl.BlockSpec(b1_t.shape, const2),
        pl.BlockSpec(w2_t.shape, const2),
        pl.BlockSpec(b2_t.shape, const2),
        pl.BlockSpec(wp.shape, const2),
        pl.BlockSpec(bp.shape, const2),
        pl.BlockSpec(wc.shape, const2),
        pl.BlockSpec(bc.shape, const2),
    ]
    out_spec = pl.BlockSpec((TB, 1, Cp), idx_b)

    kernel = functools.partial(_fused_sentiment_kernel, old_vocab_len, with_mlp)
    logits_pad = pl.pallas_call(
        kernel,
        out_shape=jax.ShapeDtypeStruct((B, 1, Cp), jnp.float32),
        grid_spec=pltpu.PrefetchScalarGridSpec(
            num_scalar_prefetch=1,
            grid=(n_b, n_s),
            in_specs=in_specs,
            out_specs=out_spec,
            scratch_shapes=[pltpu.VMEM((TB, Dp), jnp.float32)],  # lane-dense acc
        ),
        compiler_params=pltpu.CompilerParams(
            dimension_semantics=("parallel", "arbitrary"),
            vmem_limit_bytes=_vmem_limit_bytes(TB, TS, Dp, Hp, Vp, Cp)),
    )(newcnt, ids3, amask3, invd3,
      table_t, w1_t, b1_t, w2_t, b2_t, wp, bp, wc, bc)

    return logits_pad[:, 0, :num_classes]


# -----------------------------------------------------------------------------
# Pure-JAX reference (for correctness check)
# -----------------------------------------------------------------------------
def _reference_probs(input_ids, attention_mask, emb_table, w1, b1, w2, b2,
                     wp, bp, wc, bc, old_vocab_len, with_mlp):
    emb = jnp.take(emb_table, input_ids, axis=0)
    if with_mlp:
        h = jax.nn.gelu(emb @ w1.astype(jnp.float32) + b1, approximate=True)
        y = h @ w2.astype(jnp.float32) + b2
        is_new = (input_ids >= old_vocab_len).astype(jnp.float32)[..., None]
        emb = is_new * y + (1.0 - is_new) * emb
    m = attention_mask.astype(jnp.float32)[..., None]
    pooled = (emb * m).sum(axis=1) / jnp.maximum(m.sum(axis=1), 1.0)
    hp = jnp.tanh(pooled @ wp + bp)
    logits = hp @ wc + bc
    return jax.nn.softmax(logits, axis=-1)


# -----------------------------------------------------------------------------
# FinGPTR1_Tokenizer forward (sentiment analysis task), synthetic parameters
# -----------------------------------------------------------------------------
class FinGPTR1TokenizerPallas:
    def __init__(self, key, old_vocab_len=24, added_vocab=8, hidden=32,
                 mlp_hidden=64, num_classes=3, with_mlp=True):
        self.old_vocab_len = old_vocab_len
        self.new_vocab_len = old_vocab_len + added_vocab
        self.hidden = hidden
        self.mlp_hidden = mlp_hidden
        self.num_classes = num_classes
        self.with_mlp = with_mlp

        ks = jax.random.split(key, 5)
        s = 0.02
        # unpadded parameters (also used by the pure-JAX reference)
        self.emb_table = s * jax.random.normal(
            ks[0], (self.new_vocab_len, hidden), jnp.float32)
        self.w1 = (s * jax.random.normal(ks[1], (hidden, mlp_hidden),
                                         jnp.float32)).astype(jnp.bfloat16)
        self.b1 = jnp.zeros((1, mlp_hidden), jnp.float32)
        self.w2 = (s * jax.random.normal(ks[2], (mlp_hidden, hidden),
                                         jnp.float32)).astype(jnp.bfloat16)
        self.b2 = jnp.zeros((1, hidden), jnp.float32)
        self.wp = s * jax.random.normal(ks[3], (hidden, hidden), jnp.float32)
        self.bp = jnp.zeros((1, hidden), jnp.float32)
        self.wc = s * jax.random.normal(ks[4], (hidden, num_classes), jnp.float32)
        self.bc = jnp.zeros((1, num_classes), jnp.float32)

        # kernel-side copies: padded to lane-dense 128-wide tiles, token-level
        # matrices pre-transposed (tokens live on lanes inside the kernel).
        dp = _round_up(hidden, 128)
        hp = _round_up(mlp_hidden, 128)
        vp = _round_up(self.new_vocab_len, 128)
        cp = _round_up(num_classes, 128)
        self.table_t = _pad2(self.emb_table.T, dp, vp)        # (Dp, Vp) f32
        self.w1_t = _pad2(self.w1.T, hp, dp)                  # (Hp, Dp) bf16
        self.b1_t = _pad2(self.b1.T, hp, 1)                   # (Hp, 1)  f32
        self.w2_t = _pad2(self.w2.T, dp, hp)                  # (Dp, Hp) bf16
        self.b2_t = _pad2(self.b2.T, dp, 1)                   # (Dp, 1)  f32
        self.wp_p = _pad2(self.wp, dp, dp)                    # (Dp, Dp) f32
        self.bp_p = _pad2(self.bp, 1, dp)                     # (1, Dp)  f32
        self.wc_p = _pad2(self.wc, dp, cp)                    # (Dp, Cp) f32
        self.bc_p = _pad2(self.bc, 1, cp)                     # (1, Cp)  f32

    @functools.partial(jax.jit, static_argnums=0)
    def forward(self, input_ids, attention_mask):
        logits = fused_sentiment_head(
            input_ids, attention_mask,
            self.table_t, self.w1_t, self.b1_t, self.w2_t, self.b2_t,
            self.wp_p, self.bp_p, self.wc_p, self.bc_p,
            old_vocab_len=self.old_vocab_len,
            num_classes=self.num_classes,
            with_mlp=self.with_mlp)
        probs = jax.nn.softmax(logits, axis=-1)
        # torch.argmax(probs, dim=-1).item() assumes batch 1; return per-row
        # argmax for general batch sizes.
        predicted_class = jnp.argmax(probs, axis=-1)
        return probs, predicted_class


if __name__ == "__main__":
    # TODO(synk): string preprocessing + HF tokenization and the BERT encoder
    # stack are not reproducible here; token ids / attention masks synthesized.
    key = jax.random.PRNGKey(0)
    k_model, k_ids = jax.random.split(key)

    model = FinGPTR1TokenizerPallas(k_model)

    B, S = 2, 8
    input_ids = jax.random.randint(
        k_ids, (B, S), minval=0, maxval=model.new_vocab_len, dtype=jnp.int32)
    # mimic padding: last two positions of batch element 1 are padding
    attention_mask = jnp.ones((B, S), jnp.int32).at[1, -2:].set(0)

    probs, predicted_class = model.forward(input_ids, attention_mask)
    probs = jax.block_until_ready(probs)
    predicted_class = jax.block_until_ready(predicted_class)

    assert probs.shape == (B, model.num_classes)
    assert predicted_class.shape == (B,)
    assert bool(jnp.all(jnp.isfinite(probs)))
    assert bool(jnp.allclose(jnp.sum(probs, axis=-1), 1.0, atol=1e-5))

    probs_ref = _reference_probs(
        input_ids, attention_mask, model.emb_table,
        model.w1, model.b1, model.w2, model.b2,
        model.wp, model.bp, model.wc, model.bc,
        model.old_vocab_len, model.with_mlp)
    assert bool(jnp.allclose(probs, probs_ref, atol=2e-3)), \
        "kernel probs diverge from pure-JAX reference"

    print("KERNEL_OK")
</pallas_src>

<mosaic_0001>
module attributes {stable_mosaic.version = 11 : i64} {
  func.func @_fused_sentiment_kernel(%arg0: i32, %arg1: i32, %arg2: memref<2x1xi32, #tpu.memory_space<smem>>, %arg3: memref<2x1x8xi32, #tpu.memory_space<vmem>>, %arg4: memref<2x1x8xf32, #tpu.memory_space<vmem>>, %arg5: memref<2x1x1xf32, #tpu.memory_space<vmem>>, %arg6: memref<128x128xf32, #tpu.memory_space<vmem>>, %arg7: memref<128x128xbf16, #tpu.memory_space<vmem>>, %arg8: memref<128x1xf32, #tpu.memory_space<vmem>>, %arg9: memref<128x128xbf16, #tpu.memory_space<vmem>>, %arg10: memref<128x1xf32, #tpu.memory_space<vmem>>, %arg11: memref<128x128xf32, #tpu.memory_space<vmem>>, %arg12: memref<1x128xf32, #tpu.memory_space<vmem>>, %arg13: memref<128x128xf32, #tpu.memory_space<vmem>>, %arg14: memref<1x128xf32, #tpu.memory_space<vmem>>, %arg15: memref<2x1x128xf32, #tpu.memory_space<vmem>>, %arg16: memref<2x128xf32, #tpu.memory_space<vmem>>) attributes {dimension_semantics = [#tpu.dimension_semantics<parallel>, #tpu.dimension_semantics<arbitrary>], iteration_bounds = array<i64: 1, 1>, scalar_prefetch = 1 : i64, scratch_operands = 1 : i64, tpu.core_type = #tpu.core_type<tc>, window_params = [{transform_indices = @transform_0, window_bounds = array<i64: 2, 1, 8>}, {transform_indices = @transform_1, window_bounds = array<i64: 2, 1, 8>}, {transform_indices = @transform_2, window_bounds = array<i64: 2, 1, 1>}, {pipeline_mode = #tpu.pipeline_mode<synchronous>, transform_indices = @transform_3, window_bounds = array<i64: 128, 128>}, {pipeline_mode = #tpu.pipeline_mode<synchronous>, transform_indices = @transform_4, window_bounds = array<i64: 128, 128>}, {pipeline_mode = #tpu.pipeline_mode<synchronous>, transform_indices = @transform_5, window_bounds = array<i64: 128, 1>}, {pipeline_mode = #tpu.pipeline_mode<synchronous>, transform_indices = @transform_6, window_bounds = array<i64: 128, 128>}, {pipeline_mode = #tpu.pipeline_mode<synchronous>, transform_indices = @transform_7, window_bounds = array<i64: 128, 1>}, {pipeline_mode = #tpu.pipeline_mode<synchronous>, transform_indices = @transform_8, window_bounds = array<i64: 128, 128>}, {pipeline_mode = #tpu.pipeline_mode<synchronous>, transform_indices = @transform_9, window_bounds = array<i64: 1, 128>}, {pipeline_mode = #tpu.pipeline_mode<synchronous>, transform_indices = @transform_10, window_bounds = array<i64: 128, 128>}, {pipeline_mode = #tpu.pipeline_mode<synchronous>, transform_indices = @transform_11, window_bounds = array<i64: 1, 128>}, {transform_indices = @transform_12, window_bounds = array<i64: 2, 1, 128>}]} {
    %c0_i32 = arith.constant 0 : i32
    %0 = arith.cmpi eq, %arg1, %c0_i32 : i32
    %1 = arith.extui %0 : i1 to i32
    %c0_i32_0 = arith.constant 0 : i32
    %2 = arith.cmpi ne, %1, %c0_i32_0 : i32
    scf.if %2 {
      %cst_34 = arith.constant 0.000000e+00 : f32
      %60 = vector.broadcast %cst_34 : f32 to vector<2x128xf32>
      %c0_35 = arith.constant 0 : index
      %c0_36 = arith.constant 0 : index
      %61 = vector.load %arg16[%c0_35, %c0_36] : memref<2x128xf32, #tpu.memory_space<vmem>>, vector<2x128xf32>
      tpu.vector_store %arg16[%c0_35, %c0_36], %60 {strides = array<i32>} : memref<2x128xf32, #tpu.memory_space<vmem>>, vector<2x128xf32>,
    } else {
    }
    %c0 = arith.constant 0 : index
    %c0_1 = arith.constant 0 : index
    %c0_2 = arith.constant 0 : index
    %3 = vector.load %arg3[%c0, %c0_1, %c0_2] : memref<2x1x8xi32, #tpu.memory_space<vmem>>, vector<1x1x8xi32>
    %4 = vector.shape_cast %3 : vector<1x1x8xi32> to vector<1x8xi32>
    %c0_3 = arith.constant 0 : index
    %c0_4 = arith.constant 0 : index
    %c0_5 = arith.constant 0 : index
    %5 = vector.load %arg4[%c0_3, %c0_4, %c0_5] : memref<2x1x8xf32, #tpu.memory_space<vmem>>, vector<1x1x8xf32>
    %6 = vector.shape_cast %5 : vector<1x1x8xf32> to vector<1x8xf32>
    %7 = tpu.iota {dimensions = array<i32: 0>} : vector<128x8xi32>
    %8 = vector.broadcast %4 : vector<1x8xi32> to vector<128x8xi32>
    %9 = arith.cmpi eq, %7, %8 : vector<128x8xi32>
    %10 = arith.extui %9 : vector<128x8xi1> to vector<128x8xi32>
    %11 = arith.sitofp %10 : vector<128x8xi32> to vector<128x8xf32>
    %c0_6 = arith.constant 0 : index
    %c0_7 = arith.constant 0 : index
    %12 = vector.load %arg6[%c0_6, %c0_7] : memref<128x128xf32, #tpu.memory_space<vmem>>, vector<128x128xf32>
    %cst = arith.constant dense<0.000000e+00> : vector<128x8xf32>
    %13 = tpu.matmul %12, %11, %cst {dimension_numbers = #tpu.dot_dimension_numbers<[1], [0], [0], [1], [0, 0, 1, 1], [], []>} : vector<128x128xf32>, vector<128x8xf32>, vector<128x8xf32> -> vector<128x8xf32>
    %c0_8 = arith.constant 0 : index
    %c0_9 = arith.constant 0 : index
    %14 = vector.load %arg16[%c0_8, %c0_9] : memref<2x128xf32, #tpu.memory_space<vmem>>, vector<1x128xf32>
    %15 = vector.broadcast %6 : vector<1x8xf32> to vector<128x8xf32>
    %16 = arith.mulf %13, %15 : vector<128x8xf32>
    %cst_10 = arith.constant dense<0.000000e+00> : vector<128xf32>
    %17 = vector.multi_reduction <add>, %16, %cst_10 [1] : vector<128x8xf32> to vector<128xf32>
    %18 = vector.shape_cast %17 : vector<128xf32> to vector<128x1xf32>
    %19 = tpu.transpose %18, [1, 0] : vector<128x1xf32> -> vector<1x128xf32>
    %20 = arith.addf %14, %19 : vector<1x128xf32>
    %c0_11 = arith.constant 0 : index
    %c0_12 = arith.constant 0 : index
    %21 = vector.load %arg16[%c0_11, %c0_12] : memref<2x128xf32, #tpu.memory_space<vmem>>, vector<1x128xf32>
    tpu.vector_store %arg16[%c0_11, %c0_12], %20 {strides = array<i32>} : memref<2x128xf32, #tpu.memory_space<vmem>>, vector<1x128xf32>,
    %c2_i32 = arith.constant 2 : i32
    %22 = arith.muli %arg0, %c2_i32 : i32
    %c0_i32_13 = arith.constant 0 : i32
    %23 = arith.addi %22, %c0_i32_13 : i32
    %24 = arith.index_cast %23 : i32 to index
    %25 = arith.index_cast %arg1 : i32 to index
    %26 = memref.load %arg2[%24, %25] : memref<2x1xi32, #tpu.memory_space<smem>>
    %c0_i32_14 = arith.constant 0 : i32
    %27 = arith.cmpi sgt, %26, %c0_i32_14 : i32
    %28 = arith.extui %27 : i1 to i32
    %c0_i32_15 = arith.constant 0 : i32
    %29 = arith.cmpi ne, %28, %c0_i32_15 : i32
    scf.if %29 {
      %c0_34 = arith.constant 0 : index
      %c0_35 = arith.constant 0 : index
      %60 = vector.load %arg7[%c0_34, %c0_35] : memref<128x128xbf16, #tpu.memory_space<vmem>>, vector<128x128xbf16>
      %61 = arith.truncf %13 : vector<128x8xf32> to vector<128x8xbf16>
      %cst_36 = arith.constant dense<0.000000e+00> : vector<128x8xf32>
      %62 = tpu.matmul %60, %61, %cst_36 {dimension_numbers = #tpu.dot_dimension_numbers<[1], [0], [0], [1], [0, 0, 1, 1], [], []>} : vector<128x128xbf16>, vector<128x8xbf16>, vector<128x8xf32> -> vector<128x8xf32>
      %c0_37 = arith.constant 0 : index
      %c0_38 = arith.constant 0 : index
      %63 = vector.load %arg8[%c0_37, %c0_38] : memref<128x1xf32, #tpu.memory_space<vmem>>, vector<128x1xf32>
      %64 = vector.broadcast %63 : vector<128x1xf32> to vector<128x8xf32>
      %65 = arith.addf %62, %64 : vector<128x8xf32>
      %66 = arith.mulf %65, %65 : vector<128x8xf32>
      %67 = arith.mulf %65, %66 : vector<128x8xf32>
      %cst_39 = arith.constant 4.471500e-02 : f32
      %68 = vector.broadcast %cst_39 : f32 to vector<128x8xf32>
      %69 = arith.mulf %68, %67 : vector<128x8xf32>
      %70 = arith.addf %65, %69 : vector<128x8xf32>
      %cst_40 = arith.constant 0.797884583 : f32
      %71 = vector.broadcast %cst_40 : f32 to vector<128x8xf32>
      %72 = arith.mulf %71, %70 : vector<128x8xf32>
      %73 = math.tanh %72 : vector<128x8xf32>
      %cst_41 = arith.constant 1.000000e+00 : f32
      %74 = vector.broadcast %cst_41 : f32 to vector<128x8xf32>
      %75 = arith.addf %74, %73 : vector<128x8xf32>
      %cst_42 = arith.constant 5.000000e-01 : f32
      %76 = vector.broadcast %cst_42 : f32 to vector<128x8xf32>
      %77 = arith.mulf %76, %75 : vector<128x8xf32>
      %78 = arith.mulf %65, %77 : vector<128x8xf32>
      %c0_43 = arith.constant 0 : index
      %c0_44 = arith.constant 0 : index
      %79 = vector.load %arg9[%c0_43, %c0_44] : memref<128x128xbf16, #tpu.memory_space<vmem>>, vector<128x128xbf16>
      %80 = arith.truncf %78 : vector<128x8xf32> to vector<128x8xbf16>
      %cst_45 = arith.constant dense<0.000000e+00> : vector<128x8xf32>
      %81 = tpu.matmul %79, %80, %cst_45 {dimension_numbers = #tpu.dot_dimension_numbers<[1], [0], [0], [1], [0, 0, 1, 1], [], []>} : vector<128x128xbf16>, vector<128x8xbf16>, vector<128x8xf32> -> vector<128x8xf32>
      %c0_46 = arith.constant 0 : index
      %c0_47 = arith.constant 0 : index
      %82 = vector.load %arg10[%c0_46, %c0_47] : memref<128x1xf32, #tpu.memory_space<vmem>>, vector<128x1xf32>
      %83 = vector.broadcast %82 : vector<128x1xf32> to vector<128x8xf32>
      %84 = arith.addf %81, %83 : vector<128x8xf32>
      %c24_i32 = arith.constant 24 : i32
      %85 = vector.broadcast %c24_i32 : i32 to vector<1x8xi32>
      %86 = arith.cmpi sge, %4, %85 : vector<1x8xi32>
      %87 = arith.extui %86 : vector<1x8xi1> to vector<1x8xi32>
      %88 = arith.sitofp %87 : vector<1x8xi32> to vector<1x8xf32>
      %89 = arith.mulf %6, %88 : vector<1x8xf32>
      %c0_48 = arith.constant 0 : index
      %c0_49 = arith.constant 0 : index
      %90 = vector.load %arg16[%c0_48, %c0_49] : memref<2x128xf32, #tpu.memory_space<vmem>>, vector<1x128xf32>
      %91 = arith.subf %84, %13 : vector<128x8xf32>
      %92 = vector.broadcast %89 : vector<1x8xf32> to vector<128x8xf32>
      %93 = arith.mulf %91, %92 : vector<128x8xf32>
      %cst_50 = arith.constant dense<0.000000e+00> : vector<128xf32>
      %94 = vector.multi_reduction <add>, %93, %cst_50 [1] : vector<128x8xf32> to vector<128xf32>
      %95 = vector.shape_cast %94 : vector<128xf32> to vector<128x1xf32>
      %96 = tpu.transpose %95, [1, 0] : vector<128x1xf32> -> vector<1x128xf32>
      %97 = arith.addf %90, %96 : vector<1x128xf32>
      %c0_51 = arith.constant 0 : index
      %c0_52 = arith.constant 0 : index
      %98 = vector.load %arg16[%c0_51, %c0_52] : memref<2x128xf32, #tpu.memory_space<vmem>>, vector<1x128xf32>
      tpu.vector_store %arg16[%c0_51, %c0_52], %97 {strides = array<i32>} : memref<2x128xf32, #tpu.memory_space<vmem>>, vector<1x128xf32>,
    } else {
    }
    %c1 = arith.constant 1 : index
    %c0_16 = arith.constant 0 : index
    %c0_17 = arith.constant 0 : index
    %30 = vector.load %arg3[%c1, %c0_16, %c0_17] : memref<2x1x8xi32, #tpu.memory_space<vmem>>, vector<1x1x8xi32>
    %31 = vector.shape_cast %30 : vector<1x1x8xi32> to vector<1x8xi32>
    %c1_18 = arith.constant 1 : index
    %c0_19 = arith.constant 0 : index
    %c0_20 = arith.constant 0 : index
    %32 = vector.load %arg4[%c1_18, %c0_19, %c0_20] : memref<2x1x8xf32, #tpu.memory_space<vmem>>, vector<1x1x8xf32>
    %33 = vector.shape_cast %32 : vector<1x1x8xf32> to vector<1x8xf32>
    %34 = tpu.iota {dimensions = array<i32: 0>} : vector<128x8xi32>
    %35 = vector.broadcast %31 : vector<1x8xi32> to vector<128x8xi32>
    %36 = arith.cmpi eq, %34, %35 : vector<128x8xi32>
    %37 = arith.extui %36 : vector<128x8xi1> to vector<128x8xi32>
    %38 = arith.sitofp %37 : vector<128x8xi32> to vector<128x8xf32>
    %c0_21 = arith.constant 0 : index
    %c0_22 = arith.constant 0 : index
    %39 = vector.load %arg6[%c0_21, %c0_22] : memref<128x128xf32, #tpu.memory_space<vmem>>, vector<128x128xf32>
    %cst_23 = arith.constant dense<0.000000e+00> : vector<128x8xf32>
    %40 = tpu.matmul %39, %38, %cst_23 {dimension_numbers = #tpu.dot_dimension_numbers<[1], [0], [0], [1], [0, 0, 1, 1], [], []>} : vector<128x128xf32>, vector<128x8xf32>, vector<128x8xf32> -> vector<128x8xf32>
    %c1_24 = arith.constant 1 : index
    %c0_25 = arith.constant 0 : index
    %41 = vector.load %arg16[%c1_24, %c0_25] : memref<2x128xf32, #tpu.memory_space<vmem>>, vector<1x128xf32>
    %42 = vector.broadcast %33 : vector<1x8xf32> to vector<128x8xf32>
    %43 = arith.mulf %40, %42 : vector<128x8xf32>
    %cst_26 = arith.constant dense<0.000000e+00> : vector<128xf32>
    %44 = vector.multi_reduction <add>, %43, %cst_26 [1] : vector<128x8xf32> to vector<128xf32>
    %45 = vector.shape_cast %44 : vector<128xf32> to vector<128x1xf32>
    %46 = tpu.transpose %45, [1, 0] : vector<128x1xf32> -> vector<1x128xf32>
    %47 = arith.addf %41, %46 : vector<1x128xf32>
    %c1_27 = arith.constant 1 : index
    %c0_28 = arith.constant 0 : index
    %48 = vector.load %arg16[%c1_27, %c0_28] : memref<2x128xf32, #tpu.memory_space<vmem>>, vector<1x128xf32>
    tpu.vector_store %arg16[%c1_27, %c0_28], %47 {strides = array<i32>} : memref<2x128xf32, #tpu.memory_space<vmem>>, vector<1x128xf32>,
    %c2_i32_29 = arith.constant 2 : i32
    %49 = arith.muli %arg0, %c2_i32_29 : i32
    %c1_i32 = arith.constant 1 : i32
    %50 = arith.addi %49, %c1_i32 : i32
    %51 = arith.index_cast %50 : i32 to index
    %52 = arith.index_cast %arg1 : i32 to index
    %53 = memref.load %arg2[%51, %52] : memref<2x1xi32, #tpu.memory_space<smem>>
    %c0_i32_30 = arith.constant 0 : i32
    %54 = arith.cmpi sgt, %53, %c0_i32_30 : i32
    %55 = arith.extui %54 : i1 to i32
    %c0_i32_31 = arith.constant 0 : i32
    %56 = arith.cmpi ne, %55, %c0_i32_31 : i32
    scf.if %56 {
      %c0_34 = arith.constant 0 : index
      %c0_35 = arith.constant 0 : index
      %60 = vector.load %arg7[%c0_34, %c0_35] : memref<128x128xbf16, #tpu.memory_space<vmem>>, vector<128x128xbf16>
      %61 = arith.truncf %40 : vector<128x8xf32> to vector<128x8xbf16>
      %cst_36 = arith.constant dense<0.000000e+00> : vector<128x8xf32>
      %62 = tpu.matmul %60, %61, %cst_36 {dimension_numbers = #tpu.dot_dimension_numbers<[1], [0], [0], [1], [0, 0, 1, 1], [], []>} : vector<128x128xbf16>, vector<128x8xbf16>, vector<128x8xf32> -> vector<128x8xf32>
      %c0_37 = arith.constant 0 : index
      %c0_38 = arith.constant 0 : index
      %63 = vector.load %arg8[%c0_37, %c0_38] : memref<128x1xf32, #tpu.memory_space<vmem>>, vector<128x1xf32>
      %64 = vector.broadcast %63 : vector<128x1xf32> to vector<128x8xf32>
      %65 = arith.addf %62, %64 : vector<128x8xf32>
      %66 = arith.mulf %65, %65 : vector<128x8xf32>
      %67 = arith.mulf %65, %66 : vector<128x8xf32>
      %cst_39 = arith.constant 4.471500e-02 : f32
      %68 = vector.broadcast %cst_39 : f32 to vector<128x8xf32>
      %69 = arith.mulf %68, %67 : vector<128x8xf32>
      %70 = arith.addf %65, %69 : vector<128x8xf32>
      %cst_40 = arith.constant 0.797884583 : f32
      %71 = vector.broadcast %cst_40 : f32 to vector<128x8xf32>
      %72 = arith.mulf %71, %70 : vector<128x8xf32>
      %73 = math.tanh %72 : vector<128x8xf32>
      %cst_41 = arith.constant 1.000000e+00 : f32
      %74 = vector.broadcast %cst_41 : f32 to vector<128x8xf32>
      %75 = arith.addf %74, %73 : vector<128x8xf32>
      %cst_42 = arith.constant 5.000000e-01 : f32
      %76 = vector.broadcast %cst_42 : f32 to vector<128x8xf32>
      %77 = arith.mulf %76, %75 : vector<128x8xf32>
      %78 = arith.mulf %65, %77 : vector<128x8xf32>
      %c0_43 = arith.constant 0 : index
      %c0_44 = arith.constant 0 : index
      %79 = vector.load %arg9[%c0_43, %c0_44] : memref<128x128xbf16, #tpu.memory_space<vmem>>, vector<128x128xbf16>
      %80 = arith.truncf %78 : vector<128x8xf32> to vector<128x8xbf16>
      %cst_45 = arith.constant dense<0.000000e+00> : vector<128x8xf32>
      %81 = tpu.matmul %79, %80, %cst_45 {dimension_numbers = #tpu.dot_dimension_numbers<[1], [0], [0], [1], [0, 0, 1, 1], [], []>} : vector<128x128xbf16>, vector<128x8xbf16>, vector<128x8xf32> -> vector<128x8xf32>
      %c0_46 = arith.constant 0 : index
      %c0_47 = arith.constant 0 : index
      %82 = vector.load %arg10[%c0_46, %c0_47] : memref<128x1xf32, #tpu.memory_space<vmem>>, vector<128x1xf32>
      %83 = vector.broadcast %82 : vector<128x1xf32> to vector<128x8xf32>
      %84 = arith.addf %81, %83 : vector<128x8xf32>
      %c24_i32 = arith.constant 24 : i32
      %85 = vector.broadcast %c24_i32 : i32 to vector<1x8xi32>
      %86 = arith.cmpi sge, %31, %85 : vector<1x8xi32>
      %87 = arith.extui %86 : vector<1x8xi1> to vector<1x8xi32>
      %88 = arith.sitofp %87 : vector<1x8xi32> to vector<1x8xf32>
      %89 = arith.mulf %33, %88 : vector<1x8xf32>
      %c1_48 = arith.constant 1 : index
      %c0_49 = arith.constant 0 : index
      %90 = vector.load %arg16[%c1_48, %c0_49] : memref<2x128xf32, #tpu.memory_space<vmem>>, vector<1x128xf32>
      %91 = arith.subf %84, %40 : vector<128x8xf32>
      %92 = vector.broadcast %89 : vector<1x8xf32> to vector<128x8xf32>
      %93 = arith.mulf %91, %92 : vector<128x8xf32>
      %cst_50 = arith.constant dense<0.000000e+00> : vector<128xf32>
      %94 = vector.multi_reduction <add>, %93, %cst_50 [1] : vector<128x8xf32> to vector<128xf32>
      %95 = vector.shape_cast %94 : vector<128xf32> to vector<128x1xf32>
      %96 = tpu.transpose %95, [1, 0] : vector<128x1xf32> -> vector<1x128xf32>
      %97 = arith.addf %90, %96 : vector<1x128xf32>
      %c1_51 = arith.constant 1 : index
      %c0_52 = arith.constant 0 : index
      %98 = vector.load %arg16[%c1_51, %c0_52] : memref<2x128xf32, #tpu.memory_space<vmem>>, vector<1x128xf32>
      tpu.vector_store %arg16[%c1_51, %c0_52], %97 {strides = array<i32>} : memref<2x128xf32, #tpu.memory_space<vmem>>, vector<1x128xf32>,
    } else {
    }
    %c0_i32_32 = arith.constant 0 : i32
    %57 = arith.cmpi eq, %arg1, %c0_i32_32 : i32
    %58 = arith.extui %57 : i1 to i32
    %c0_i32_33 = arith.constant 0 : i32
    %59 = arith.cmpi ne, %58, %c0_i32_33 : i32
    scf.if %59 {
      %c0_34 = arith.constant 0 : index
      %c0_35 = arith.constant 0 : index
      %60 = vector.load %arg16[%c0_34, %c0_35] : memref<2x128xf32, #tpu.memory_space<vmem>>, vector<1x128xf32>
      %c0_36 = arith.constant 0 : index
      %c0_37 = arith.constant 0 : index
      %c0_38 = arith.constant 0 : index
      %61 = vector.load %arg5[%c0_36, %c0_37, %c0_38] : memref<2x1x1xf32, #tpu.memory_space<vmem>>, vector<1x1x1xf32>
      %62 = vector.shape_cast %61 : vector<1x1x1xf32> to vector<1x1xf32>
      %63 = vector.broadcast %62 : vector<1x1xf32> to vector<1x128xf32>
      %64 = arith.mulf %60, %63 : vector<1x128xf32>
      %c0_39 = arith.constant 0 : index
      %c0_40 = arith.constant 0 : index
      %65 = vector.load %arg11[%c0_39, %c0_40] : memref<128x128xf32, #tpu.memory_space<vmem>>, vector<128x128xf32>
      %cst_41 = arith.constant dense<0.000000e+00> : vector<1x128xf32>
      %66 = tpu.matmul %64, %65, %cst_41 {dimension_numbers = #tpu.dot_dimension_numbers<[1], [0], [0], [1], [0, 0, 1, 1], [], []>} : vector<1x128xf32>, vector<128x128xf32>, vector<1x128xf32> -> vector<1x128xf32>
      %c0_42 = arith.constant 0 : index
      %c0_43 = arith.constant 0 : index
      %67 = vector.load %arg12[%c0_42, %c0_43] : memref<1x128xf32, #tpu.memory_space<vmem>>, vector<1x128xf32>
      %68 = arith.addf %66, %67 : vector<1x128xf32>
      %69 = math.tanh %68 : vector<1x128xf32>
      %c0_44 = arith.constant 0 : index
      %c0_45 = arith.constant 0 : index
      %70 = vector.load %arg13[%c0_44, %c0_45] : memref<128x128xf32, #tpu.memory_space<vmem>>, vector<128x128xf32>
      %cst_46 = arith.constant dense<0.000000e+00> : vector<1x128xf32>
      %71 = tpu.matmul %69, %70, %cst_46 {dimension_numbers = #tpu.dot_dimension_numbers<[1], [0], [0], [1], [0, 0, 1, 1], [], []>} : vector<1x128xf32>, vector<128x128xf32>, vector<1x128xf32> -> vector<1x128xf32>
      %c0_47 = arith.constant 0 : index
      %c0_48 = arith.constant 0 : index
      %72 = vector.load %arg14[%c0_47, %c0_48] : memref<1x128xf32, #tpu.memory_space<vmem>>, vector<1x128xf32>
      %73 = arith.addf %71, %72 : vector<1x128xf32>
      %c0_49 = arith.constant 0 : index
      %c0_50 = arith.constant 0 : index
      %c0_51 = arith.constant 0 : index
      %74 = vector.load %arg15[%c0_49, %c0_50, %c0_51] : memref<2x1x128xf32, #tpu.memory_space<vmem>>, vector<1x1x128xf32>
      %75 = vector.shape_cast %74 : vector<1x1x128xf32> to vector<1x128xf32>
      %76 = vector.shape_cast %73 : vector<1x128xf32> to vector<1x1x128xf32>
      tpu.vector_store %arg15[%c0_49, %c0_50, %c0_51], %76 {strides = array<i32>} : memref<2x1x128xf32, #tpu.memory_space<vmem>>, vector<1x1x128xf32>,
      %c1_52 = arith.constant 1 : index
      %c0_53 = arith.constant 0 : index
      %77 = vector.load %arg16[%c1_52, %c0_53] : memref<2x128xf32, #tpu.memory_space<vmem>>, vector<1x128xf32>
      %c1_54 = arith.constant 1 : index
      %c0_55 = arith.constant 0 : index
      %c0_56 = arith.constant 0 : index
      %78 = vector.load %arg5[%c1_54, %c0_55, %c0_56] : memref<2x1x1xf32, #tpu.memory_space<vmem>>, vector<1x1x1xf32>
      %79 = vector.shape_cast %78 : vector<1x1x1xf32> to vector<1x1xf32>
      %80 = vector.broadcast %79 : vector<1x1xf32> to vector<1x128xf32>
      %81 = arith.mulf %77, %80 : vector<1x128xf32>
      %c0_57 = arith.constant 0 : index
      %c0_58 = arith.constant 0 : index
      %82 = vector.load %arg11[%c0_57, %c0_58] : memref<128x128xf32, #tpu.memory_space<vmem>>, vector<128x128xf32>
      %cst_59 = arith.constant dense<0.000000e+00> : vector<1x128xf32>
      %83 = tpu.matmul %81, %82, %cst_59 {dimension_numbers = #tpu.dot_dimension_numbers<[1], [0], [0], [1], [0, 0, 1, 1], [], []>} : vector<1x128xf32>, vector<128x128xf32>, vector<1x128xf32> -> vector<1x128xf32>
      %c0_60 = arith.constant 0 : index
      %c0_61 = arith.constant 0 : index
      %84 = vector.load %arg12[%c0_60, %c0_61] : memref<1x128xf32, #tpu.memory_space<vmem>>, vector<1x128xf32>
      %85 = arith.addf %83, %84 : vector<1x128xf32>
      %86 = math.tanh %85 : vector<1x128xf32>
      %c0_62 = arith.constant 0 : index
      %c0_63 = arith.constant 0 : index
      %87 = vector.load %arg13[%c0_62, %c0_63] : memref<128x128xf32, #tpu.memory_space<vmem>>, vector<128x128xf32>
      %cst_64 = arith.constant dense<0.000000e+00> : vector<1x128xf32>
      %88 = tpu.matmul %86, %87, %cst_64 {dimension_numbers = #tpu.dot_dimension_numbers<[1], [0], [0], [1], [0, 0, 1, 1], [], []>} : vector<1x128xf32>, vector<128x128xf32>, vector<1x128xf32> -> vector<1x128xf32>
      %c0_65 = arith.constant 0 : index
      %c0_66 = arith.constant 0 : index
      %89 = vector.load %arg14[%c0_65, %c0_66] : memref<1x128xf32, #tpu.memory_space<vmem>>, vector<1x128xf32>
      %90 = arith.addf %88, %89 : vector<1x128xf32>
      %c1_67 = arith.constant 1 : index
      %c0_68 = arith.constant 0 : index
      %c0_69 = arith.constant 0 : index
      %91 = vector.load %arg15[%c1_67, %c0_68, %c0_69] : memref<2x1x128xf32, #tpu.memory_space<vmem>>, vector<1x1x128xf32>
      %92 = vector.shape_cast %91 : vector<1x1x128xf32> to vector<1x128xf32>
      %93 = vector.shape_cast %90 : vector<1x128xf32> to vector<1x1x128xf32>
      tpu.vector_store %arg15[%c1_67, %c0_68, %c0_69], %93 {strides = array<i32>} : memref<2x1x128xf32, #tpu.memory_space<vmem>>, vector<1x1x128xf32>,
    } else {
    }
    return
  }
  func.func @transform_0(%arg0: i32, %arg1: i32, %arg2: memref<2x1xi32, #tpu.memory_space<smem>>) -> (i32, i32, i32) {
    %c0_i32 = arith.constant 0 : i32
    %c0_i32_0 = arith.constant 0 : i32
    return %arg0, %c0_i32, %arg1 : i32, i32, i32
  }
  func.func @transform_1(%arg0: i32, %arg1: i32, %arg2: memref<2x1xi32, #tpu.memory_space<smem>>) -> (i32, i32, i32) {
    %c0_i32 = arith.constant 0 : i32
    %c0_i32_0 = arith.constant 0 : i32
    return %arg0, %c0_i32, %arg1 : i32, i32, i32
  }
  func.func @transform_2(%arg0: i32, %arg1: i32, %arg2: memref<2x1xi32, #tpu.memory_space<smem>>) -> (i32, i32, i32) {
    %c0_i32 = arith.constant 0 : i32
    %c0_i32_0 = arith.constant 0 : i32
    %c0_i32_1 = arith.constant 0 : i32
    return %arg0, %c0_i32, %c0_i32_0 : i32, i32, i32
  }
  func.func @transform_3(%arg0: i32, %arg1: i32, %arg2: memref<2x1xi32, #tpu.memory_space<smem>>) -> (i32, i32) {
    %c0_i32 = arith.constant 0 : i32
    %c0_i32_0 = arith.constant 0 : i32
    %c0_i32_1 = arith.constant 0 : i32
    return %c0_i32, %c0_i32_0 : i32, i32
  }
  func.func @transform_4(%arg0: i32, %arg1: i32, %arg2: memref<2x1xi32, #tpu.memory_space<smem>>) -> (i32, i32) {
    %c0_i32 = arith.constant 0 : i32
    %c0_i32_0 = arith.constant 0 : i32
    %c0_i32_1 = arith.constant 0 : i32
    return %c0_i32, %c0_i32_0 : i32, i32
  }
  func.func @transform_5(%arg0: i32, %arg1: i32, %arg2: memref<2x1xi32, #tpu.memory_space<smem>>) -> (i32, i32) {
    %c0_i32 = arith.constant 0 : i32
    %c0_i32_0 = arith.constant 0 : i32
    %c0_i32_1 = arith.constant 0 : i32
    return %c0_i32, %c0_i32_0 : i32, i32
  }
  func.func @transform_6(%arg0: i32, %arg1: i32, %arg2: memref<2x1xi32, #tpu.memory_space<smem>>) -> (i32, i32) {
    %c0_i32 = arith.constant 0 : i32
    %c0_i32_0 = arith.constant 0 : i32
    %c0_i32_1 = arith.constant 0 : i32
    return %c0_i32, %c0_i32_0 : i32, i32
  }
  func.func @transform_7(%arg0: i32, %arg1: i32, %arg2: memref<2x1xi32, #tpu.memory_space<smem>>) -> (i32, i32) {
    %c0_i32 = arith.constant 0 : i32
    %c0_i32_0 = arith.constant 0 : i32
    %c0_i32_1 = arith.constant 0 : i32
    return %c0_i32, %c0_i32_0 : i32, i32
  }
  func.func @transform_8(%arg0: i32, %arg1: i32, %arg2: memref<2x1xi32, #tpu.memory_space<smem>>) -> (i32, i32) {
    %c0_i32 = arith.constant 0 : i32
    %c0_i32_0 = arith.constant 0 : i32
    %c0_i32_1 = arith.constant 0 : i32
    return %c0_i32, %c0_i32_0 : i32, i32
  }
  func.func @transform_9(%arg0: i32, %arg1: i32, %arg2: memref<2x1xi32, #tpu.memory_space<smem>>) -> (i32, i32) {
    %c0_i32 = arith.constant 0 : i32
    %c0_i32_0 = arith.constant 0 : i32
    %c0_i32_1 = arith.constant 0 : i32
    return %c0_i32, %c0_i32_0 : i32, i32
  }
  func.func @transform_10(%arg0: i32, %arg1: i32, %arg2: memref<2x1xi32, #tpu.memory_space<smem>>) -> (i32, i32) {
    %c0_i32 = arith.constant 0 : i32
    %c0_i32_0 = arith.constant 0 : i32
    %c0_i32_1 = arith.constant 0 : i32
    return %c0_i32, %c0_i32_0 : i32, i32
  }
  func.func @transform_11(%arg0: i32, %arg1: i32, %arg2: memref<2x1xi32, #tpu.memory_space<smem>>) -> (i32, i32) {
    %c0_i32 = arith.constant 0 : i32
    %c0_i32_0 = arith.constant 0 : i32
    %c0_i32_1 = arith.constant 0 : i32
    return %c0_i32, %c0_i32_0 : i32, i32
  }
  func.func @transform_12(%arg0: i32, %arg1: i32, %arg2: memref<2x1xi32, #tpu.memory_space<smem>>) -> (i32, i32, i32) {
    %c0_i32 = arith.constant 0 : i32
    %c0_i32_0 = arith.constant 0 : i32
    %c0_i32_1 = arith.constant 0 : i32
    return %arg0, %c0_i32, %c0_i32_0 : i32, i32, i32
  }
}

</mosaic_0001>

<bundles_post_ra>
// kernel: forward.1
= control target key start
LH: loop header
LB: loop body
LE: loop exit
PB: predicated region body
PF: predicated region fallthrough
CT: control target
= control target key end

     0   :  { %s5071_s0 = inlined_call_operand.vmem [shape: s32[2,1], index: 0, kind: input, shape index: {}]   ;;  %s5072_s1 = inlined_call_operand.vmem [shape: s32[2,1,8], index: 1, kind: input, shape index: {}]   ;;  %s5073_s2 = inlined_call_operand.vmem [shape: f32[2,1,8], index: 2, kind: input, shape index: {}]   ;;  %s5074_s3 = inlined_call_operand.vmem [shape: f32[2,1,1], index: 3, kind: input, shape index: {}]   ;;  %s5075_s4 = inlined_call_operand.hbm [shape: f32[128,128], index: 4, kind: input, shape index: {}]   ;;  %s5076_s5 = inlined_call_operand.hbm [shape: bf16[128,128], index: 5, kind: input, shape index: {}]   ;;  %s5077_s6 = inlined_call_operand.vmem [shape: f32[128,1], index: 6, kind: input, shape index: {}, may-alias: {6,8}]   ;;  %s5078_s7 = inlined_call_operand.hbm [shape: bf16[128,128], index: 7, kind: input, shape index: {}]   ;;  %s5079_s8 = inlined_call_operand.vmem [shape: f32[128,1], index: 8, kind: input, shape index: {}, may-alias: {6,8}]   ;;  %s5080_s9 = inlined_call_operand.hbm [shape: f32[128,128], index: 9, kind: input, shape index: {}]   ;;  %s5081_s10 = inlined_call_operand.vmem [shape: f32[1,128], index: 10, kind: input, shape index: {}, may-alias: {10,12}]   ;;  %s5082_s11 = inlined_call_operand.vmem [shape: f32[128,128], index: 11, kind: input, shape index: {}]   ;;  %s5083_s12 = inlined_call_operand.vmem [shape: f32[1,128], index: 12, kind: input, shape index: {}, may-alias: {10,12}]   ;;  %s5084_s13 = inlined_call_operand.vmem [shape: f32[2,1,128], index: 13, kind: output, shape index: {}]  }
   0x1   :  { %s18_s27 = sshll.u32 %s5071_s0, 4  ;;  %s19_s27 = int_to_ptr.vmem [resolvable:$true] %s18_s27 }
   0x2   :  { %s3640_s28 = scalar_lea.vmem %s19_s27, 32  ;;  %p3645_p1 = scmp.lt.s32.totalorder %s19_s27, %s19_s27 }
   0x3   :  { %p3641_p0 = scmp.ne.s32.totalorder %s19_s27, %s3640_s28  ;;  %p3646_p2 = scmp.lt.s32.totalorder %s3640_s28, %s3640_s28 }
   0x5   :  { %p3647_p3 = por %p3646_p2, %p3645_p1 }
   0x7   :  { %p3648_p4 = pnand %p3647_p3, %p3641_p0 }
   0x9   :  { %3651 = shalt.err (!%p3648_p4)  }
   0xa   :  { %s3740_s29 = smov [#allocation4]  }
   0xb   :  { %21 = dma.vmem_to_smem %s19_s27, 32, %s3740_s29, [#allocation3] }
   0xc   :  { %3732 = dma.done.wait [#allocation3], 32 }
   0xd   :  { %3733 = vsyncadd [#allocation3], 4294967264 }
   0xe   :  { %23 = sfence }
   0xf   :  { %24 = vsyncpa [#allocation6], 0 }
  0x10   :  { %25 = vsyncpa [#allocation8], 0 }
  0x11   :  { %26 = vsyncpa [#allocation11], 0  ;;  %s3741_s30 = smov [#allocation7]  }
  0x12   :  { %s50_s14 = sshll.u32 %s3741_s30, 4  ;;  %s51_s14 = int_to_ptr.vmem [resolvable:$true] %s50_s14 }
  0x13   :  { %s3660_s0 = scalar_lea.vmem %s51_s14, 1024  ;;  %p3665_p6 = scmp.lt.s32.totalorder %s51_s14, %s51_s14 }
  0x14   :  { %p3661_p5 = scmp.ne.s32.totalorder %s51_s14, %s3660_s0  ;;  %p3666_p7 = scmp.lt.s32.totalorder %s3660_s0, %s3660_s0 }
  0x16   :  { %p3667_p8 = por %p3666_p7, %p3665_p6 }
  0x18   :  { %p3668_p9 = pnand %p3667_p8, %p3661_p5 }
  0x1a   :  { %3671 = shalt.err (!%p3668_p9)
}
  0x1b   :  { %s3742_s15 = smov 64   ;;  %s3743_s16 = smov 4  }
  0x1c   :  { %56 = dma.hbm_to_vmem [thread:$0]  %s5076_s5, 1024, %s51_s14, [#allocation8], %s3742_s15, %s3742_s15, %s3743_s16  }
  0x1d   :  { %s3744_s19 = smov [#allocation5]  }
  0x1e   :  { %s38_s20 = sshll.u32 %s3744_s19, 4  ;;  %s39_s20 = int_to_ptr.vmem [resolvable:$true] %s38_s20 }
  0x1f   :  { %s3680_s21 = scalar_lea.vmem %s39_s20, 2048  ;;  %p3685_p11 = scmp.lt.s32.totalorder %s39_s20, %s39_s20 }
  0x20   :  { %p3681_p10 = scmp.ne.s32.totalorder %s39_s20, %s3680_s21  ;;  %p3686_p12 = scmp.lt.s32.totalorder %s3680_s21, %s3680_s21 }
  0x22   :  { %p3687_p13 = por %p3686_p12, %p3685_p11 }
  0x24   :  { %p3688_p0 = pnand %p3687_p13, %p3681_p10 }
  0x26   :  { %3691 = shalt.err (!%p3688_p0)
}
  0x27   :  { %s3745_s22 = smov 128   ;;  %s3746_s23 = smov 8  }
  0x28   :  { %44 = dma.hbm_to_vmem [thread:$0]  %s5075_s4, 2048, %s39_s20, [#allocation6], %s3745_s22, %s3745_s22, %s3746_s23  }
  0x29   :  { %s3747_s26 = smov [#allocation9]   ;;  %s3748_s28 = smov [#allocation10]  }
  0x2a   :  { %s64_s27 = sshll.u32 %s3747_s26, 4  ;;  %s78_s5 = sshll.u32 %s3748_s28, 4  ;;  %s65_s27 = int_to_ptr.vmem [resolvable:$true] %s64_s27  ;;  %s79_s5 = int_to_ptr.vmem [resolvable:$true] %s78_s5 }
  0x2b   :  { %s3700_s29 = scalar_lea.vmem %s65_s27, 1024  ;;  %p3705_p2 = scmp.lt.s32.totalorder %s65_s27, %s65_s27 }
  0x2c   :  { %p3701_p1 = scmp.ne.s32.totalorder %s65_s27, %s3700_s29  ;;  %p3706_p3 = scmp.lt.s32.totalorder %s3700_s29, %s3700_s29 }
  0x2e   :  { %p3707_p4 = por %p3706_p3, %p3705_p2 }
  0x30   :  { %p3708_p5 = pnand %p3707_p4, %p3701_p1 }
  0x32   :  { %3711 = shalt.err (!%p3708_p5)
}
  0x33   :  { %70 = dma.hbm_to_vmem [thread:$0]  %s5078_s7, 1024, %s65_s27, [#allocation8], %s3742_s15, %s3742_s15, %s3743_s16  }
  0x34   :  { %s3720_s4 = scalar_lea.vmem %s79_s5, 2048  ;;  %p3725_p7 = scmp.lt.s32.totalorder %s79_s5, %s79_s5 }
  0x35   :  { %p3721_p6 = scmp.ne.s32.totalorder %s79_s5, %s3720_s4  ;;  %p3726_p8 = scmp.lt.s32.totalorder %s3720_s4, %s3720_s4 }
  0x37   :  { %p3727_p9 = por %p3726_p8, %p3725_p7 }
  0x39   :  { %p3728_p10 = pnand %p3727_p9, %p3721_p6 }
  0x3b   :  { %3731 = shalt.err (!%p3728_p10)
}
  0x3c   :  { %84 = dma.hbm_to_vmem [thread:$0]  %s5080_s9, 2048, %s79_s5, [#allocation11], %s3745_s22, %s3745_s22, %s3746_s23  }
  0x3d   :  { %3734 = dma.done.wait [#allocation6], 2048  }
  0x3e   :  { %3735 = vsyncadd [#allocation6], 4294965248 }
  0x3f   :  { %3736 = dma.done.wait [#allocation8], 2048  }
  0x40   :  { %3737 = vsyncadd [#allocation8], 4294965248 }
  0x41   :  { %3738 = dma.done.wait [#allocation11], 2048  }
  0x42   :  { %3739 = vsyncadd [#allocation11], 4294965248  ;;  %v111_v0 = vlaneseq  ;;  %s3848_s18 = sld [smem:[#allocation4]]  ;;  %v3864_v5 = vld [vmem:[%s5072_s1] sm:$0x1]  ;;  %v180_v8 = vld [vmem:[#allocation5] sm:$0xff] }
  0x43   :  { %3106 = vmatprep.mubr.f32.mxu0 %v180_v8  ;;  %v188_v9 = vld [vmem:[#allocation5 + $0x40] sm:$0xff]  ;;  %v5087_v11 = vmov 1.0   ;;  %v181_v23 = vld [vmem:[#allocation5 + $0x8] sm:$0xff]  ;;  %v182_v25 = vld [vmem:[#allocation5 + $0x10] sm:$0xff] }
  0x44   :  { %v3850_v1 = vshrl.u32 %v111_v0, 7  ;;  %3118 = vmatprep.mubr.f32.mxu1 %v188_v9  ;;  %v189_v24 = vld [vmem:[#allocation5 + $0x48] sm:$0xff]  ;;  %v190_v26 = vld [vmem:[#allocation5 + $0x50] sm:$0xff]  ;;  %v183_v27 = vld [vmem:[#allocation5 + $0x18] sm:$0xff] }
  0x45   :  { %v191_v28 = vld [vmem:[#allocation5 + $0x58] sm:$0xff]  ;;  %v184_v29 = vld [vmem:[#allocation5 + $0x20] sm:$0xff]  ;;  %v185_v31 = vld [vmem:[#allocation5 + $0x28] sm:$0xff] }
  0x46   :  { %5105 = vst [vmem:[#allocation16_spill] sm:$0xff] %v3850_v1  ;;  %v3853_v2 = vsub.s32 0, %v3850_v1  ;;  %v3856_v3 = vadd.s32 120, %v3850_v1  ;;  %v3859_v4 = vadd.s32 112, %v3850_v1  ;;  %v3871_v7 = vadd.s32 104, %v3850_v1  ;;  %v192_v30 = vld [vmem:[#allocation5 + $0x60] sm:$0xff] }
  0x47   :  { %v3878_v10 = vadd.s32 96, %v3850_v1  ;;  %v3886_v12 = vadd.s32 88, %v3850_v1  ;;  %v3895_v13 = vadd.s32 80, %v3850_v1  ;;  %v3904_v14 = vadd.s32 72, %v3850_v1  ;;  %v193_v32 = vld [vmem:[#allocation5 + $0x68] sm:$0xff]  ;;  %v186_v33 = vld [vmem:[#allocation5 + $0x30] sm:$0xff] }
  0x48   :  { %5106 = vst [vmem:[#allocation17_spill] sm:$0xff] %v3856_v3  ;;  %5107 = vst [vmem:[#allocation18_spill] sm:$0xff] %v3859_v4  ;;  %v3868_v6 = vrot.slane %v3864_v5, %v3853_v2  ;;  %v3913_v15 = vadd.s32 64, %v3850_v1  ;;  %v3922_v16 = vadd.s32 56, %v3850_v1  ;;  %v3931_v17 = vadd.s32 48, %v3850_v1  ;;  %v194_v34 = vld [vmem:[#allocation5 + $0x70] sm:$0xff] }
  0x49   :  { %5108 = vst [vmem:[#allocation19_spill] sm:$0xff] %v3871_v7  ;;  %5109 = vst [vmem:[#allocation20_spill] sm:$0xff] %v3878_v10  ;;  %v3940_v18 = vadd.s32 40, %v3850_v1  ;;  %v3949_v19 = vadd.s32 32, %v3850_v1  ;;  %v3958_v20 = vadd.s32 24, %v3850_v1  ;;  %v3967_v21 = vadd.s32 16, %v3850_v1 }
  0x4a   :  { %vm147_vm0 = vcmp.eq.s32.totalorder %v3856_v3, %v3868_v6  ;;  %vm146_vm1 = vcmp.eq.s32.totalorder %v3859_v4, %v3868_v6  ;;  %vm145_vm2 = vcmp.eq.s32.totalorder %v3871_v7, %v3868_v6  ;;  %5110 = vst [vmem:[#allocation21_spill] sm:$0xff] %v3886_v12  ;;  %vm144_vm3 = vcmp.eq.s32.totalorder %v3878_v10, %v3868_v6  ;;  %v187_v35 = vld [vmem:[#allocation5 + $0x38] sm:$0xff]  ;;  %p2805_p11 = scmp.le.s32.totalorder %s3848_s18, 0 }
  0x4b   :  { %3074 = vmatprep.subr.msk.mxu0 %vm147_vm0, %v5087_v11  ;;  %3454 = vmatprep.subr.msk.mxu1 %vm147_vm0, %v5087_v11  ;;  %5111 = vst [vmem:[#allocation22_spill] sm:$0xff] %v3895_v13  ;;  %vm143_vm4 = vcmp.eq.s32.totalorder %v3886_v12, %v3868_v6  ;;  %5112 = vst [vmem:[#allocation23_spill] sm:$0xff] %v3904_v14  ;;  %vm142_vm5 = vcmp.eq.s32.totalorder %v3895_v13, %v3868_v6  ;;  %v3976_v22 = vadd.s32 8, %v3850_v1  ;;  %v195_v36 = vld [vmem:[#allocation5 + $0x78] sm:$0xff] }
  0x4c   :  { %3075 = vmatpush3.msk.msra.mxu0 %vm147_vm0, %v5087_v11  ;;  %3470 = vmatpush3.msk.msra.mxu1 %vm147_vm0, %v5087_v11  ;;  %5113 = vst [vmem:[#allocation24_spill] sm:$0xff] %v3913_v15  ;;  %vm141_vm6 = vcmp.eq.s32.totalorder %v3904_v14, %v3868_v6  ;;  %5114 = vst [vmem:[#allocation25_spill] sm:$0xff] %v3922_v16  ;;  %vm140_vm7 = vcmp.eq.s32.totalorder %v3913_v15, %v3868_v6  ;;  %v4008_v37 = vld [vmem:[%s5073_s2] sm:$0x1]  ;;  %vm364_vm0 = vcmask 64512  }
  0x4d   :  { %3076 = vmatprep.subr.msk.mxu0 %vm146_vm1, %v5087_v11  ;;  %3455 = vmatprep.subr.msk.mxu1 %vm146_vm1, %v5087_v11  ;;  %5115 = vst [vmem:[#allocation26_spill] sm:$0xff] %v3931_v17  ;;  %vm139_vm8 = vcmp.eq.s32.totalorder %v3922_v16, %v3868_v6  ;;  %5116 = vst [vmem:[#allocation27_spill] sm:$0xff] %v3940_v18  ;;  %vm138_vm9 = vcmp.eq.s32.totalorder %v3931_v17, %v3868_v6 }
  0x4e   :  { %3077 = vmatpush3.msk.msra.mxu0 %vm146_vm1, %v5087_v11  ;;  %3471 = vmatpush3.msk.msra.mxu1 %vm146_vm1, %v5087_v11  ;;  %5117 = vst [vmem:[#allocation28_spill] sm:$0xff] %v3949_v19  ;;  %vm137_vm10 = vcmp.eq.s32.totalorder %v3940_v18, %v3868_v6  ;;  %5118 = vst [vmem:[#allocation29_spill] sm:$0xff] %v3958_v20  ;;  %vm136_vm11 = vcmp.eq.s32.totalorder %v3949_v19, %v3868_v6 }
  0x4f   :  { %3078 = vmatprep.subr.msk.mxu0 %vm145_vm2, %v5087_v11  ;;  %3456 = vmatprep.subr.msk.mxu1 %vm145_vm2, %v5087_v11  ;;  %5119 = vst [vmem:[#allocation30_spill] sm:$0xff] %v3967_v21  ;;  %vm135_vm12 = vcmp.eq.s32.totalorder %v3958_v20, %v3868_v6  ;;  %5120 = vst [vmem:[#allocation31_spill] sm:$0xff] %v3976_v22  ;;  %vm134_vm13 = vcmp.eq.s32.totalorder %v3967_v21, %v3868_v6 }
  0x50   :  { %3079 = vmatpush3.msk.msra.mxu0 %vm145_vm2, %v5087_v11  ;;  %3472 = vmatpush3.msk.msra.mxu1 %vm145_vm2, %v5087_v11  ;;  %vm133_vm14 = vcmp.eq.s32.totalorder %v3976_v22, %v3868_v6  ;;  %vm132_vm15 = vcmp.eq.s32.totalorder %v3850_v1, %v3868_v6  ;;  %v346_v38 = vrot.slane %v4008_v37, %v3853_v2 }
  0x51   :  { %3080 = vmatprep.subr.msk.mxu0 %vm144_vm3, %v5087_v11  ;;  %3457 = vmatprep.subr.msk.mxu1 %vm144_vm3, %v5087_v11 }
  0x52   :  { %3081 = vmatpush3.msk.msra.mxu0 %vm144_vm3, %v5087_v11  ;;  %3473 = vmatpush3.msk.msra.mxu1 %vm144_vm3, %v5087_v11 }
  0x53   :  { %3082 = vmatprep.subr.msk.mxu0 %vm143_vm4, %v5087_v11  ;;  %3458 = vmatprep.subr.msk.mxu1 %vm143_vm4, %v5087_v11 }
  0x54   :  { %3083 = vmatpush3.msk.msra.mxu0 %vm143_vm4, %v5087_v11  ;;  %3474 = vmatpush3.msk.msra.mxu1 %vm143_vm4, %v5087_v11 }
  0x55   :  { %3084 = vmatprep.subr.msk.mxu0 %vm142_vm5, %v5087_v11  ;;  %3459 = vmatprep.subr.msk.mxu1 %vm142_vm5, %v5087_v11 }
  0x56   :  { %3085 = vmatpush3.msk.msra.mxu0 %vm142_vm5, %v5087_v11  ;;  %3475 = vmatpush3.msk.msra.mxu1 %vm142_vm5, %v5087_v11 }
  0x57   :  { %3086 = vmatprep.subr.msk.mxu0 %vm141_vm6, %v5087_v11  ;;  %3460 = vmatprep.subr.msk.mxu1 %vm141_vm6, %v5087_v11 }
  0x58   :  { %3087 = vmatpush3.msk.msra.mxu0 %vm141_vm6, %v5087_v11  ;;  %3476 = vmatpush3.msk.msra.mxu1 %vm141_vm6, %v5087_v11 }
  0x59   :  { %3088 = vmatprep.subr.msk.mxu0 %vm140_vm7, %v5087_v11  ;;  %3461 = vmatprep.subr.msk.mxu1 %vm140_vm7, %v5087_v11 }
  0x5a   :  { %3089 = vmatpush3.msk.msra.mxu0 %vm140_vm7, %v5087_v11  ;;  %3477 = vmatpush3.msk.msra.mxu1 %vm140_vm7, %v5087_v11 }
  0x5b   :  { %3090 = vmatprep.subr.msk.mxu0 %vm139_vm8, %v5087_v11  ;;  %3462 = vmatprep.subr.msk.mxu1 %vm139_vm8, %v5087_v11 }
  0x5c   :  { %3091 = vmatpush3.msk.msra.mxu0 %vm139_vm8, %v5087_v11  ;;  %3478 = vmatpush3.msk.msra.mxu1 %vm139_vm8, %v5087_v11 }
  0x5d   :  { %3092 = vmatprep.subr.msk.mxu0 %vm138_vm9, %v5087_v11  ;;  %3463 = vmatprep.subr.msk.mxu1 %vm138_vm9, %v5087_v11 }
  0x5e   :  { %3093 = vmatpush3.msk.msra.mxu0 %vm138_vm9, %v5087_v11  ;;  %3479 = vmatpush3.msk.msra.mxu1 %vm138_vm9, %v5087_v11 }
  0x5f   :  { %3094 = vmatprep.subr.msk.mxu0 %vm137_vm10, %v5087_v11  ;;  %3464 = vmatprep.subr.msk.mxu1 %vm137_vm10, %v5087_v11 }
  0x60   :  { %3095 = vmatpush3.msk.msra.mxu0 %vm137_vm10, %v5087_v11  ;;  %3480 = vmatpush3.msk.msra.mxu1 %vm137_vm10, %v5087_v11 }
  0x61   :  { %3096 = vmatprep.subr.msk.mxu0 %vm136_vm11, %v5087_v11  ;;  %3465 = vmatprep.subr.msk.mxu1 %vm136_vm11, %v5087_v11 }
  0x62   :  { %3097 = vmatpush3.msk.msra.mxu0 %vm136_vm11, %v5087_v11  ;;  %3481 = vmatpush3.msk.msra.mxu1 %vm136_vm11, %v5087_v11 }
  0x63   :  { %3098 = vmatprep.subr.msk.mxu0 %vm135_vm12, %v5087_v11  ;;  %3466 = vmatprep.subr.msk.mxu1 %vm135_vm12, %v5087_v11 }
  0x64   :  { %3099 = vmatpush3.msk.msra.mxu0 %vm135_vm12, %v5087_v11  ;;  %3482 = vmatpush3.msk.msra.mxu1 %vm135_vm12, %v5087_v11 }
  0x65   :  { %3100 = vmatprep.subr.msk.mxu0 %vm134_vm13, %v5087_v11  ;;  %3467 = vmatprep.subr.msk.mxu1 %vm134_vm13, %v5087_v11 }
  0x66   :  { %3101 = vmatpush3.msk.msra.mxu0 %vm134_vm13, %v5087_v11  ;;  %3483 = vmatpush3.msk.msra.mxu1 %vm134_vm13, %v5087_v11 }
  0x67   :  { %3102 = vmatprep.subr.msk.mxu0 %vm133_vm14, %v5087_v11  ;;  %3468 = vmatprep.subr.msk.mxu1 %vm133_vm14, %v5087_v11 }
  0x68   :  { %3103 = vmatpush3.msk.msra.mxu0 %vm133_vm14, %v5087_v11  ;;  %3484 = vmatpush3.msk.msra.mxu1 %vm133_vm14, %v5087_v11 }
  0x69   :  { %3104 = vmatprep.subr.msk.mxu0 %vm132_vm15, %v5087_v11  ;;  %3469 = vmatprep.subr.msk.mxu1 %vm132_vm15, %v5087_v11 }
  0x6a   :  { %3105 = vmatpush3.msk.msra.mxu0 %vm132_vm15, %v5087_v11  ;;  %3485 = vmatpush3.msk.msra.mxu1 %vm132_vm15, %v5087_v11 }
  0x6b   :  { %3107 = vmatmul.mubr.f32.vlgmr.msra.gmra.mxu0 %v181_v23  ;;  %3119 = vmatmul.mubr.f32.vlgmr.msra.gmra.mxu1 %v189_v24 }
  0x6c   :  { %3109 = vmatprep.mubr.f32.mxu0 %v182_v25  ;;  %3121 = vmatprep.mubr.f32.mxu1 %v190_v26 }
  0x6f   :  { %3110 = vmatmul.mubr.f32.gmra.mxu0 %v183_v27  ;;  %3122 = vmatmul.mubr.f32.gmra.mxu1 %v191_v28 }
  0x70   :  { %3112 = vmatprep.mubr.f32.mxu0 %v184_v29  ;;  %3124 = vmatprep.mubr.f32.mxu1 %v192_v30 }
  0x73   :  { %3113 = vmatmul.mubr.f32.gmra.mxu0 %v185_v31  ;;  %3125 = vmatmul.mubr.f32.gmra.mxu1 %v193_v32 }
  0x74   :  { %3115 = vmatprep.mubr.f32.mxu0 %v186_v33  ;;  %3127 = vmatprep.mubr.f32.mxu1 %v194_v34 }
  0x77   :  { %3116 = vmatmul.mubr.f32.gmra.mxu0 %v187_v35  ;;  %3128 = vmatmul.mubr.f32.gmra.mxu1 %v195_v36 }
 0x12b   :  { %v4012_v39 = vpop.f32.mrf.mxu0  ;;  %v4014_v40 = vpop.f32.mrf.mxu1 }
 0x12c   :  { %v349_v41 = vmul.f32 %v4012_v39, %v346_v38  ;;  %v357_v28 = vmul.f32 %v4014_v40, %v346_v38 }
 0x12d   :  { %v4017_v42 = vpop.f32.mrf.mxu0  ;;  %v4019_v43 = vpop.f32.mrf.mxu1 }
 0x12e   :  { %v348_v44 = vmul.f32 %v346_v38, %v4017_v42  ;;  %v368_v45 = vsel %vm364_vm0, %v349_v41, 0.0  ;;  %v356_v48 = vmul.f32 %v346_v38, %v4019_v43  ;;  %v392_v33 = vsel %vm364_vm0, %v357_v28, 0.0 }
 0x12f   :  { %369 = vadd.xlane.f32.xlu0 %v368_v45  ;;  %v4023_v46 = vpop.f32.mrf.mxu0  ;;  %v4025_v47 = vpop.f32.mrf.mxu1 }
 0x130   :  { %v351_v51 = vmul.f32 %v4023_v46, %v346_v38  ;;  %v365_v53 = vsel %vm364_vm0, %v348_v44, 0.0  ;;  %v389_v56 = vsel %vm364_vm0, %v356_v48, 0.0  ;;  %v359_v32 = vmul.f32 %v4025_v47, %v346_v38 }
 0x131   :  { %v4028_v49 = vpop.f32.mrf.mxu0  ;;  %v4030_v50 = vpop.f32.mrf.mxu1 }
 0x132   :  { %v350_v52 = vmul.f32 %v346_v38, %v4028_v49  ;;  %v374_v60 = vsel %vm364_vm0, %v351_v51, 0.0  ;;  %v358_v63 = vmul.f32 %v346_v38, %v4030_v50  ;;  %v398_v41 = vsel %vm364_vm0, %v359_v32, 0.0 }
 0x133   :  { %366 = vadd.xlane.f32.xlu0 %v365_v53  ;;  %v4035_v54 = vpop.f32.mrf.mxu0  ;;  %v4041_v58 = vpop.f32.mrf.mxu1 }
 0x134   :  { %v371_v55 = vsel %vm364_vm0, %v350_v52, 0.0  ;;  %v353_v59 = vmul.f32 %v4035_v54, %v346_v38  ;;  %v395_v24 = vsel %vm364_vm0, %v358_v63, 0.0  ;;  %v361_v36 = vmul.f32 %v4041_v58, %v346_v38 }
 0x135   :  { %372 = vadd.xlane.f32.xlu1 %v371_v55  ;;  %v4039_v57 = vpop.f32.mrf.mxu0  ;;  %v4050_v6 = vpop.f32.mrf.mxu1  ;;  %v5085_v52 = vmov 0.0  }
 0x136   :  { %v352_v61 = vmul.f32 %v346_v38, %v4039_v57  ;;  %v380_v8 = vsel %vm364_vm0, %v353_v59, 0.0  ;;  %v360_v23 = vmul.f32 %v346_v38, %v4050_v6  ;;  %v404_v48 = vsel %vm364_vm0, %v361_v36, 0.0  ;;  %108 = vst [vmem:[#allocation2] sm:$0x3] %v5085_v52 }
 0x137   :  { %390 = vadd.xlane.f32.xlu0 %v389_v56  ;;  %v4046_v62 = vpop.f32.mrf.mxu0  ;;  %v4058_v26 = vpop.f32.mrf.mxu1 }
 0x138   :  { %v377_v0 = vsel %vm364_vm0, %v352_v61, 0.0  ;;  %v355_v9 = vmul.f32 %v4046_v62, %v346_v38  ;;  %v401_v29 = vsel %vm364_vm0, %v360_v23, 0.0  ;;  %v363_v45 = vmul.f32 %v4058_v26, %v346_v38 }
 0x139   :  { %375 = vadd.xlane.f32.xlu1 %v374_v60  ;;  %v4056_v25 = vpop.f32.mrf.mxu0  ;;  %v4064_v31 = vpop.f32.mrf.mxu1 }
 0x13a   :  { %v386_v27 = vsel %vm364_vm0, %v355_v9, 0.0  ;;  %v354_v30 = vmul.f32 %v346_v38, %v4056_v25  ;;  %v362_v35 = vmul.f32 %v346_v38, %v4064_v31  ;;  %v410_v51 = vsel %vm364_vm0, %v363_v45, 0.0 }
 0x13b   :  { %378 = vadd.xlane.f32.xlu0 %v377_v0 }
 0x13c   :  { %v383_v34 = vsel %vm364_vm0, %v354_v30, 0.0  ;;  %v407_v44 = vsel %vm364_vm0, %v362_v35, 0.0 }
 0x13d   :  { %381 = vadd.xlane.f32.xlu1 %v380_v8  ;;  %v341_v30 = vld [vmem:[#allocation2] sm:$0x1] }
 0x13f   :  { %396 = vadd.xlane.f32.xlu0 %v395_v24 }
 0x141   :  { %387 = vadd.xlane.f32.xlu1 %v386_v27 }
 0x143   :  { %402 = vadd.xlane.f32.xlu0 %v401_v29 }
 0x145   :  { %393 = vadd.xlane.f32.xlu1 %v392_v33 }
 0x147   :  { %384 = vadd.xlane.f32.xlu0 %v383_v34 }
 0x149   :  { %399 = vadd.xlane.f32.xlu1 %v398_v41 }
 0x14b   :  { %408 = vadd.xlane.f32.xlu0 %v407_v44 }
 0x14d   :  { %405 = vadd.xlane.f32.xlu1 %v404_v48 }
 0x151   :  { %411 = vadd.xlane.f32.xlu1 %v410_v51 }
 0x1b8   :  { %v370_v53 = vpop.xlane.xlu0 %369 }
 0x1bc   :  { %v367_v55 = vpop.xlane.xlu0 %366 }
 0x1bd   :  { %413 = vxpose.xlu0.b32.start [1/16] (narrow) %v367_v55, 8 }
 0x1be   :  { %v373_v59 = vpop.xlane.xlu1 %372 }
 0x1c0   :  { %v391_v56 = vpop.xlane.xlu0 %390 }
 0x1c1   :  { %414 = vxpose.xlu0.b32.cont [2/16] (narrow) %v370_v53, 8 }
 0x1c2   :  { %v376_v61 = vpop.xlane.xlu1 %375 }
 0x1c4   :  { %v379_v60 = vpop.xlane.xlu0 %378 }
 0x1c5   :  { %415 = vxpose.xlu0.b32.cont [3/16] (narrow) %v373_v59, 8 }
 0x1c6   :  { %v382_v0 = vpop.xlane.xlu1 %381 }
 0x1c8   :  { %v397_v38 = vpop.xlane.xlu0 %396 }
 0x1c9   :  { %416 = vxpose.xlu0.b32.cont [4/16] (narrow) %v376_v61, 8 }
 0x1ca   :  { %v388_v9 = vpop.xlane.xlu1 %387 }
 0x1cc   :  { %v403_v63 = vpop.xlane.xlu0 %402 }
 0x1cd   :  { %417 = vxpose.xlu0.b32.cont [5/16] (narrow) %v379_v60, 8 }
 0x1ce   :  { %v394_v23 = vpop.xlane.xlu1 %393 }
 0x1d0   :  { %v385_v8 = vpop.xlane.xlu0 %384 }
 0x1d1   :  { %418 = vxpose.xlu0.b32.cont [6/16] (narrow) %v382_v0, 8 }
 0x1d2   :  { %v400_v24 = vpop.xlane.xlu1 %399 }
 0x1d4   :  { %v409_v28 = vpop.xlane.xlu0 %408 }
 0x1d5   :  { %419 = vxpose.xlu0.b32.cont [7/16] (narrow) %v385_v8, 8 }
 0x1d6   :  { %v406_v27 = vpop.xlane.xlu1 %405 }
 0x1d9   :  { %420 = vxpose.xlu0.b32.cont [8/16] (narrow) %v388_v9, 8 }
 0x1da   :  { %v412_v29 = vpop.xlane.xlu1 %411 }
 0x1dd   :  { %421 = vxpose.xlu0.b32.cont [9/16] (narrow) %v391_v56, 8 }
 0x1e1   :  { %422 = vxpose.xlu0.b32.cont [10/16] (narrow) %v394_v23, 8 }
 0x1e5   :  { %423 = vxpose.xlu0.b32.cont [11/16] (narrow) %v397_v38, 8 }
 0x1e9   :  { %424 = vxpose.xlu0.b32.cont [12/16] (narrow) %v400_v24, 8 }
 0x1ed   :  { %425 = vxpose.xlu0.b32.cont [13/16] (narrow) %v403_v63, 8 }
 0x1f1   :  { %426 = vxpose.xlu0.b32.cont [14/16] (narrow) %v406_v27, 8 }
 0x1f5   :  { %427 = vxpose.xlu0.b32.cont [15/16] (narrow) %v409_v28, 8 }
 0x1f9   :  { %428 = vxpose.xlu0.b32.end [16/16] (narrow) %v412_v29, 8 }
 0x238   :  { %455 = sbr.rel (%p2805_p11) target bundleno = 1362 (0x552), region = 73 }
 0x239   :  { %v429_v32 = vpop.trf.xlu0 }
 0x23a   :  { %v445_v33 = vadd.f32 %v429_v32, %v341_v30 }
 0x23c   :  { %446 = vst [vmem:[#allocation2] sm:$0x1] %v445_v33 }
 0x23d   :  { %v479_v34 = vpack.c.bf16 %v4058_v26, %v4064_v31  ;;  %v478_v35 = vpack.c.bf16 %v4041_v58, %v4050_v6  ;;  %v3537_v36 = vld [vmem:[#allocation7] sm:$0xff]   ;;  %v3751_v41 = vmov 0   ;;  %v477_v44 = vpack.c.bf16 %v4025_v47, %v4030_v50  ;;  %v494_v48 = vld [vmem:[%s5077_s6 + $0x70] sm:$0xff]  ;;  %v495_v53 = vld [vmem:[%s5077_s6 + $0x78] sm:$0xff] }
 0x23e   :  { %3146 = vmatprep.mubr.bf16.mxu0 %v3537_v36  ;;  %3535 = vset.pattern.permute.xlu0 %v3751_v41  ;;  %v476_v45 = vpack.c.bf16 %v4014_v40, %v4019_v43  ;;  %v492_v51 = vld [vmem:[%s5077_s6 + $0x60] sm:$0xff]  ;;  %v493_v55 = vld [vmem:[%s5077_s6 + $0x68] sm:$0xff]  ;;  %v475_v56 = vpack.c.bf16 %v4046_v62, %v4056_v25  ;;  %v490_v59 = vld [vmem:[%s5077_s6 + $0x50] sm:$0xff]  ;;  %v474_v61 = vpack.c.bf16 %v4035_v54, %v4039_v57  ;;  %vm1130_vm1 = vcmp.ge.s32.totalorder %v3864_v5, 24 }
 0x23f   :  { %3130 = vmatprep.subr.bf16.mxu0 %v479_v34  ;;  %3536 = vset.pattern.permute.xlu1 %v3751_v41  ;;  %v491_v60 = vld [vmem:[%s5077_s6 + $0x58] sm:$0xff]  ;;  %v488_v38 = vld [vmem:[%s5077_s6 + $0x40] sm:$0xff]  ;;  %v489_v63 = vld [vmem:[%s5077_s6 + $0x48] sm:$0xff]  ;;  %v473_v0 = vpack.c.bf16 %v4023_v46, %v4028_v49  ;;  %v472_v23 = vpack.c.bf16 %v4012_v39, %v4017_v42 }
 0x240   :  { %3131 = vmatpush3.bf16.msra.mxu0 %v479_v34  ;;  %568 = vperm.xlu0 %3535, %v494_v48   ;;  %v486_v8 = vld [vmem:[%s5077_s6 + $0x30] sm:$0xff]  ;;  %v487_v9 = vld [vmem:[%s5077_s6 + $0x38] sm:$0xff]  ;;  %v484_v24 = vld [vmem:[%s5077_s6 + $0x20] sm:$0xff] }
 0x241   :  { %3132 = vmatprep.subr.bf16.mxu0 %v478_v35  ;;  %558 = vperm.xlu1 %3536, %v492_v51   ;;  %v485_v27 = vld [vmem:[%s5077_s6 + $0x28] sm:$0xff]  ;;  %v482_v29 = vld [vmem:[%s5077_s6 + $0x10] sm:$0xff]  ;;  %v483_v30 = vld [vmem:[%s5077_s6 + $0x18] sm:$0xff] }
 0x242   :  { %v3538_v28 = vld [vmem:[#allocation7 + $0x8] sm:$0xff]   ;;  %v3539_v32 = vld [vmem:[#allocation7 + $0x10] sm:$0xff]   ;;  %v480_v33 = vld [vmem:[%s5077_s6] sm:$0xff] }
 0x243   :  { %v481_v34 = vld [vmem:[%s5077_s6 + $0x8] sm:$0xff]  ;;  %v889_v36 = vld [vmem:[%s5079_s8] sm:$0xff]  ;;  %v892_v48 = vld [vmem:[%s5079_s8 + $0x18] sm:$0xff] }
 0x244   :  { %3133 = vmatpush3.bf16.msra.mxu0 %v478_v35  ;;  %573 = vperm.xlu0 %3535, %v495_v53   ;;  %v3540_v35 = vld [vmem:[#allocation7 + $0x18] sm:$0xff]   ;;  %v890_v41 = vld [vmem:[%s5079_s8 + $0x8] sm:$0xff] }
 0x245   :  { %3134 = vmatprep.subr.bf16.mxu0 %v477_v44  ;;  %563 = vperm.xlu1 %3536, %v493_v55   ;;  %v3542_v51 = vld [vmem:[#allocation7 + $0x28] sm:$0xff]   ;;  %v893_v53 = vld [vmem:[%s5079_s8 + $0x20] sm:$0xff] }
 0x246   :  { %v894_v55 = vld [vmem:[%s5079_s8 + $0x28] sm:$0xff] }
 0x248   :  { %3135 = vmatpush3.bf16.msra.mxu0 %v477_v44  ;;  %548 = vperm.xlu0 %3535, %v490_v59   ;;  %v3541_v44 = vld [vmem:[#allocation7 + $0x20] sm:$0xff]   ;;  %v895_v59 = vld [vmem:[%s5079_s8 + $0x30] sm:$0xff] }
 0x249   :  { %3136 = vmatprep.subr.bf16.mxu0 %v476_v45  ;;  %553 = vperm.xlu1 %3536, %v491_v60   ;;  %v896_v60 = vld [vmem:[%s5079_s8 + $0x38] sm:$0xff] }
 0x24c   :  { %3137 = vmatpush3.bf16.msra.mxu0 %v476_v45  ;;  %538 = vperm.xlu0 %3535, %v488_v38   ;;  %v891_v45 = vld [vmem:[%s5079_s8 + $0x10] sm:$0xff]  ;;  %v897_v38 = vld [vmem:[%s5079_s8 + $0x40] sm:$0xff] }
 0x24d   :  { %3138 = vmatprep.subr.bf16.mxu0 %v475_v56  ;;  %543 = vperm.xlu1 %3536, %v489_v63   ;;  %v898_v63 = vld [vmem:[%s5079_s8 + $0x48] sm:$0xff] }
 0x250   :  { %3139 = vmatpush3.bf16.msra.mxu0 %v475_v56  ;;  %528 = vperm.xlu0 %3535, %v486_v8   ;;  %v3543_v56 = vld [vmem:[#allocation7 + $0x30] sm:$0xff]  }
 0x251   :  { %3140 = vmatprep.subr.bf16.mxu0 %v474_v61  ;;  %533 = vperm.xlu1 %3536, %v487_v9   ;;  %v900_v8 = vld [vmem:[%s5079_s8 + $0x58] sm:$0xff]  ;;  %v901_v9 = vld [vmem:[%s5079_s8 + $0x60] sm:$0xff] }
 0x254   :  { %3141 = vmatpush3.bf16.msra.mxu0 %v474_v61  ;;  %518 = vperm.xlu0 %3535, %v484_v24   ;;  %v3544_v61 = vld [vmem:[#allocation7 + $0x38] sm:$0xff]   ;;  %v903_v24 = vld [vmem:[%s5079_s8 + $0x70] sm:$0xff] }
 0x255   :  { %3142 = vmatprep.subr.bf16.mxu0 %v473_v0  ;;  %523 = vperm.xlu1 %3536, %v485_v27   ;;  %v904_v27 = vld [vmem:[%s5079_s8 + $0x78] sm:$0xff] }
 0x258   :  { %3143 = vmatpush3.bf16.msra.mxu0 %v473_v0  ;;  %508 = vperm.xlu0 %3535, %v482_v29   ;;  %v899_v0 = vld [vmem:[%s5079_s8 + $0x50] sm:$0xff] }
 0x259   :  { %3144 = vmatprep.subr.bf16.mxu0 %v472_v23  ;;  %513 = vperm.xlu1 %3536, %v483_v30  }
 0x25c   :  { %3145 = vmatpush3.bf16.msra.mxu0 %v472_v23  ;;  %498 = vperm.xlu0 %3535, %v480_v33   ;;  %v902_v23 = vld [vmem:[%s5079_s8 + $0x68] sm:$0xff] }
 0x25d   :  { %503 = vperm.xlu1 %3536, %v481_v34  }
 0x25f   :  { %3147 = vmatmul.mubr.bf16.vlgmr.msra.gmra.mxu0 %v3538_v28  ;;  %v3545_v28 = vld [vmem:[#allocation9] sm:$0xff]  }
 0x260   :  { %3150 = vmatprep.mubr.bf16.mxu0 %v3539_v32  ;;  %907 = vperm.xlu0 %3535, %v889_v36  }
 0x261   :  { %912 = vperm.xlu1 %3536, %v890_v41   ;;  %3178 = vmatprep.mubr.bf16.mxu1 %v3545_v28 }
 0x264   :  { %917 = vperm.xlu0 %3535, %v891_v45  }
 0x265   :  { %922 = vperm.xlu1 %3536, %v892_v48  }
 0x267   :  { %3151 = vmatmul.mubr.bf16.gmra.mxu0 %v3540_v35 }
 0x268   :  { %3154 = vmatprep.mubr.bf16.mxu0 %v3541_v44  ;;  %927 = vperm.xlu0 %3535, %v893_v53  }
 0x269   :  { %932 = vperm.xlu1 %3536, %v894_v55  }
 0x26c   :  { %937 = vperm.xlu0 %3535, %v895_v59  }
 0x26d   :  { %942 = vperm.xlu1 %3536, %v896_v60  }
 0x26f   :  { %3155 = vmatmul.mubr.bf16.gmra.mxu0 %v3542_v51 }
 0x270   :  { %3158 = vmatprep.mubr.bf16.mxu0 %v3543_v56  ;;  %947 = vperm.xlu0 %3535, %v897_v38  }
 0x271   :  { %952 = vperm.xlu1 %3536, %v898_v63  }
 0x274   :  { %957 = vperm.xlu0 %3535, %v899_v0  }
 0x275   :  { %962 = vperm.xlu1 %3536, %v900_v8  }
 0x277   :  { %3159 = vmatmul.mubr.bf16.gmra.mxu0 %v3544_v61 }
 0x278   :  { %967 = vperm.xlu0 %3535, %v901_v9  }
 0x279   :  { %972 = vperm.xlu1 %3536, %v902_v23  }
 0x27c   :  { %977 = vperm.xlu0 %3535, %v903_v24  }
 0x27d   :  { %982 = vperm.xlu1 %3536, %v904_v27  }
 0x2bb   :  { %v569_v29 = vpop.permute.xlu0 %568 }
 0x2bc   :  { %v559_v30 = vpop.permute.xlu1 %558 }
 0x2bf   :  { %v574_v32 = vpop.permute.xlu0 %573 }
 0x2c0   :  { %v4190_v33 = vpop.permute.xlu1 %563 }
 0x2c3   :  { %v549_v34 = vpop.permute.xlu0 %548 }
 0x2c4   :  { %v554_v35 = vpop.permute.xlu1 %553 }
 0x2c7   :  { %v539_v36 = vpop.permute.xlu0 %538 }
 0x2c8   :  { %v544_v41 = vpop.permute.xlu1 %543 }
 0x2cb   :  { %v529_v51 = vpop.permute.xlu0 %528 }
 0x2cc   :  { %v534_v53 = vpop.permute.xlu1 %533 }
 0x2cf   :  { %v519_v60 = vpop.permute.xlu0 %518 }
 0x2d0   :  { %v524_v61 = vpop.permute.xlu1 %523 }
 0x2d3   :  { %v509_v8 = vpop.permute.xlu0 %508 }
 0x2d4   :  { %v514_v9 = vpop.permute.xlu1 %513 }
 0x2d7   :  { %v499_v19 = vpop.permute.xlu0 %498 }
 0x31f   :  { %v3148_v44 = vpop.f32.mrf.mxu0 }
 0x320   :  { %v4198_v52 = vadd.f32 %v3148_v44, %v509_v8  ;;  %v504_v8 = vpop.permute.xlu1 %503 }
 0x321   :  { %v658_v45 = vpop.f32.mrf.mxu0 }
 0x323   :  { %v3149_v48 = vpop.f32.mrf.mxu0 }
 0x324   :  { %v4194_v24 = vadd.f32 %v3149_v48, %v514_v9  ;;  %v4219_v9 = vadd.f32 %v658_v45, %v499_v19 }
 0x325   :  { %v661_v55 = vpop.f32.mrf.mxu0 }
 0x326   :  { %v724_v21 = vmul.f32 %v4194_v24, %v4194_v24 }
 0x327   :  { %v3152_v56 = vpop.f32.mrf.mxu0 }
 0x329   :  { %v674_v59 = vpop.f32.mrf.mxu0 }
 0x32b   :  { %v3153_v38 = vpop.f32.mrf.mxu0 }
 0x32c   :  { %v4208_v48 = vadd.f32 %v3153_v38, %v534_v53 }
 0x32d   :  { %v677_v63 = vpop.f32.mrf.mxu0 }
 0x32e   :  { %v4229_v38 = vadd.f32 %v677_v63, %v524_v61  ;;  %v728_v45 = vmul.f32 %v4208_v48, %v4208_v48 }
 0x32f   :  { %v3156_v0 = vpop.f32.mrf.mxu0 }
 0x330   :  { %v4192_v23 = vadd.f32 %v3156_v0, %v549_v34  ;;  %v4206_v34 = vadd.f32 %v3152_v56, %v529_v51  ;;  %v4227_v56 = vmul.f32 %v724_v21, %v4194_v24 }
 0x331   :  { %v690_v27 = vpop.f32.mrf.mxu0 }
 0x332   :  { %v731_v28 = vmul.f32 %v4192_v23, %v4192_v23  ;;  %v4200_v1 = vadd.f32 %v690_v27, %v539_v36  ;;  %v4215_v36 = vmul.f32 %v4198_v52, %v4198_v52  ;;  %v4221_v27 = vadd.f32 %v661_v55, %v504_v8 }
 0x333   :  { %v3157_v11 = vpop.f32.mrf.mxu0  ;;  %v727_v19 = vmul.f32 %v4206_v34, %v4206_v34 }
 0x334   :  { %v4202_v22 = vadd.f32 %v3157_v11, %v554_v35  ;;  %v747_v0 = vmul.f32 %v731_v28, %v4192_v23  ;;  %v729_v51 = vmul.f32 %v4200_v1, %v4200_v1 }
 0x335   :  { %v693_v20 = vpop.f32.mrf.mxu0 }
 0x336   :  { %v732_v44 = vmul.f32 %v4202_v22, %v4202_v22  ;;  %v4217_v11 = vadd.f32 %v693_v20, %v544_v41  ;;  %v763_v55 = vmul.f32 0.044715, %v747_v0  ;;  %v745_v18 = vmul.f32 %v729_v51, %v4200_v1 }
 0x337   :  { %v3160_v35 = vpop.f32.mrf.mxu0 }
 0x338   :  { %v748_v53 = vmul.f32 %v732_v44, %v4202_v22  ;;  %v730_v28 = vmul.f32 %v4217_v11, %v4217_v11  ;;  %v4233_v20 = vadd.f32 %v3160_v35, %v569_v29  ;;  %v4239_v44 = vadd.f32 %v674_v59, %v519_v60 }
 0x339   :  { %v706_v41 = vpop.f32.mrf.mxu0  ;;  %v722_v35 = vmul.f32 %v4221_v27, %v4221_v27  ;;  %v726_v59 = vmul.f32 %v4229_v38, %v4229_v38  ;;  %v761_v15 = vmul.f32 0.044715, %v745_v18 }
 0x33a   :  { %v764_v8 = vmul.f32 0.044715, %v748_v53  ;;  %v746_v21 = vmul.f32 %v730_v28, %v4217_v11  ;;  %v735_v61 = vmul.f32 %v4233_v20, %v4233_v20  ;;  %v4244_v63 = vadd.f32 %v706_v41, %v559_v30 }
 0x33b   :  { %v3161_v29 = vpop.f32.mrf.mxu0  ;;  %v744_v28 = vmul.f32 %v728_v45, %v4208_v48  ;;  %v779_v41 = vadd.f32 %v763_v55, %v4192_v23  ;;  %v742_v13 = vmul.f32 %v726_v59, %v4229_v38  ;;  %v777_v4 = vadd.f32 %v761_v15, %v4200_v1 }
 0x33c   :  { %v780_v17 = vadd.f32 %v764_v8, %v4202_v22  ;;  %v4250_v16 = vadd.f32 %v3161_v29, %v574_v32  ;;  %v762_v60 = vmul.f32 0.044715, %v746_v21  ;;  %v751_v0 = vmul.f32 %v735_v61, %v4233_v20 }
 0x33d   :  { %v733_v30 = vmul.f32 %v4244_v63, %v4244_v63  ;;  %v709_v53 = vpop.f32.mrf.mxu0  ;;  %v743_v8 = vmul.f32 %v727_v19, %v4206_v34  ;;  %v725_v21 = vmul.f32 %v4239_v44, %v4239_v44  ;;  %v760_v12 = vmul.f32 0.044715, %v744_v28 }
 0x33e   :  { %v736_v51 = vmul.f32 %v4250_v16, %v4250_v16  ;;  %v4262_v32 = vadd.f32 %v709_v53, %v4190_v33  ;;  %v767_v61 = vmul.f32 0.044715, %v751_v0  ;;  %v796_v14 = vmul.f32 0.7978846, %v780_v17 }
 0x33f   :  { %v749_v29 = vmul.f32 %v733_v30, %v4244_v63  ;;  %v778_v33 = vadd.f32 %v762_v60, %v4217_v11  ;;  %v795_v10 = vmul.f32 0.7978846, %v779_v41  ;;  %v759_v30 = vmul.f32 0.044715, %v743_v8 }
 0x340   :  { %v752_v45 = vmul.f32 %v736_v51, %v4250_v16  ;;  %v734_v55 = vmul.f32 %v4262_v32, %v4262_v32  ;;  %v783_v53 = vadd.f32 %v767_v61, %v4233_v20  ;;  %v741_v17 = vmul.f32 %v725_v21, %v4239_v44 }
 0x341   :  { %v765_v19 = vmul.f32 0.044715, %v749_v29  ;;  %3553 = vtanh.f32 %v796_v14  ;;  %v758_v3 = vmul.f32 0.044715, %v742_v13  ;;  %v794_v61 = vmul.f32 0.7978846, %v778_v33 }
 0x342   :  { %v768_v7 = vmul.f32 0.044715, %v752_v45  ;;  %v750_v0 = vmul.f32 %v734_v55, %v4262_v32  ;;  %v799_v18 = vmul.f32 0.7978846, %v783_v53  ;;  %v776_v28 = vadd.f32 %v760_v12, %v4208_v48 }
 0x343   :  { %v781_v51 = vadd.f32 %v765_v19, %v4244_v63  ;;  %v739_v21 = vmul.f32 %v4215_v36, %v4198_v52  ;;  %v721_v15 = vmul.f32 %v4219_v9, %v4219_v9  ;;  %v775_v14 = vadd.f32 %v759_v30, %v4206_v34 }
 0x344   :  { %v784_v59 = vadd.f32 %v768_v7, %v4250_v16  ;;  %v766_v60 = vmul.f32 0.044715, %v750_v0  ;;  %3555 = vtanh.f32 %v799_v18  ;;  %v757_v7 = vmul.f32 0.044715, %v741_v17 }
 0x345   :  { %v797_v29 = vmul.f32 0.7978846, %v781_v51  ;;  %3557 = vtanh.f32 %v795_v10  ;;  %v793_v13 = vmul.f32 0.7978846, %v777_v4  ;;  %v738_v55 = vmul.f32 %v722_v35, %v4221_v27 }
 0x346   :  { %v800_v41 = vmul.f32 0.7978846, %v784_v59  ;;  %v782_v8 = vadd.f32 %v766_v60, %v4262_v32  ;;  %v756_v10 = vmul.f32 0.044715, %v4227_v56  ;;  %v792_v12 = vmul.f32 0.7978846, %v776_v28 }
 0x347   :  { %3559 = vtanh.f32 %v797_v29  ;;  %v774_v33 = vadd.f32 %v758_v3, %v4229_v38  ;;  %v737_v36 = vmul.f32 %v721_v15, %v4219_v9  ;;  %v755_v53 = vmul.f32 0.044715, %v739_v21 }
 0x348   :  { %v798_v45 = vmul.f32 0.7978846, %v782_v8  ;;  %3561 = vtanh.f32 %v800_v41  ;;  %v791_v19 = vmul.f32 0.7978846, %v775_v14  ;;  %v773_v0 = vadd.f32 %v757_v7, %v4239_v44 }
 0x349   :  { %3563 = vtanh.f32 %v794_v61  ;;  %v754_v30 = vmul.f32 0.044715, %v738_v55  ;;  %v772_v4 = vadd.f32 %v756_v10, %v4194_v24  ;;  %v790_v17 = vmul.f32 0.7978846, %v774_v33 }
 0x34a   :  { %3565 = vtanh.f32 %v798_v45  ;;  %v753_v35 = vmul.f32 0.044715, %v737_v36  ;;  %v771_v18 = vadd.f32 %v755_v53, %v4198_v52  ;;  %v789_v56 = vmul.f32 0.7978846, %v773_v0 }
 0x34b   :  { %3567 = vtanh.f32 %v793_v13  ;;  %v770_v3 = vadd.f32 %v754_v30, %v4221_v27  ;;  %v788_v60 = vmul.f32 0.7978846, %v772_v4 }
 0x34c   :  { %3569 = vtanh.f32 %v792_v12  ;;  %v769_v29 = vadd.f32 %v753_v35, %v4219_v9  ;;  %v787_v8 = vmul.f32 0.7978846, %v771_v18 }
 0x34d   :  { %3571 = vtanh.f32 %v791_v19  ;;  %v786_v15 = vmul.f32 0.7978846, %v770_v3 }
 0x34e   :  { %v3554_v51 = vpop.eup %3553  ;;  %3573 = vtanh.f32 %v790_v17  ;;  %v785_v12 = vmul.f32 0.7978846, %v769_v29 }
 0x34f   :  { %3575 = vtanh.f32 %v789_v56  ;;  %v828_v7 = vadd.f32 1.0, %v3554_v51 }
 0x350   :  { %3577 = vtanh.f32 %v788_v60 }
 0x351   :  { %v3556_v59 = vpop.eup %3555  ;;  %3579 = vtanh.f32 %v787_v8  ;;  %v844_v30 = vmul.f32 0.5, %v828_v7 }
 0x352   :  { %v3558_v61 = vpop.eup %3557  ;;  %v831_v28 = vadd.f32 1.0, %v3556_v59  ;;  %3581 = vtanh.f32 %v786_v15 }
 0x353   :  { %v827_v33 = vadd.f32 1.0, %v3558_v61  ;;  %3583 = vtanh.f32 %v785_v12 }
 0x354   :  { %v3560_v41 = vpop.eup %3559  ;;  %v847_v55 = vmul.f32 0.5, %v831_v28 }
 0x355   :  { %v3562_v21 = vpop.eup %3561  ;;  %v829_v14 = vadd.f32 1.0, %v3560_v41  ;;  %v843_v51 = vmul.f32 0.5, %v827_v33  ;;  %v860_v41 = vmul.f32 %v844_v30, %v4202_v22 }
 0x356   :  { %v3564_v13 = vpop.eup %3563  ;;  %v832_v45 = vadd.f32 1.0, %v3562_v21  ;;  %v863_v4 = vmul.f32 %v847_v55, %v4233_v20 }
 0x357   :  { %v3566_v10 = vpop.eup %3565  ;;  %v845_v19 = vmul.f32 0.5, %v829_v14  ;;  %v826_v18 = vadd.f32 1.0, %v3564_v13 }
 0x358   :  { %v848_v36 = vmul.f32 0.5, %v832_v45  ;;  %v830_v53 = vadd.f32 1.0, %v3566_v10  ;;  %v3568_v0 = vpop.eup %3567 }
 0x359   :  { %v3570_v56 = vpop.eup %3569  ;;  %v861_v59 = vmul.f32 %v845_v19, %v4244_v63  ;;  %v825_v61 = vadd.f32 1.0, %v3568_v0  ;;  %v842_v8 = vmul.f32 0.5, %v826_v18 }
 0x35a   :  { %v864_v17 = vmul.f32 %v848_v36, %v4250_v16  ;;  %v846_v35 = vmul.f32 0.5, %v830_v53  ;;  %v3572_v29 = vpop.eup %3571  ;;  %v824_v20 = vadd.f32 1.0, %v3570_v56  ;;  %v859_v16 = vmul.f32 %v843_v51, %v4192_v23 }
 0x35b   :  { %v3574_v21 = vpop.eup %3573  ;;  %v841_v15 = vmul.f32 0.5, %v825_v61  ;;  %v823_v14 = vadd.f32 1.0, %v3572_v29  ;;  %v858_v63 = vmul.f32 %v842_v8, %v4217_v11 }
 0x35c   :  { %v888_v3 = vpack.c.bf16 %v864_v17, %v863_v4  ;;  %v862_v60 = vmul.f32 %v846_v35, %v4262_v32  ;;  %v3576_v7 = vpop.eup %3575  ;;  %v886_v13 = vpack.c.bf16 %v860_v41, %v859_v16  ;;  %v840_v32 = vmul.f32 0.5, %v824_v20  ;;  %v3547_v20 = vld [vmem:[#allocation9 + $0x10] sm:$0xff]  }
 0x35d   :  { %v822_v45 = vadd.f32 1.0, %v3574_v21  ;;  %v3578_v55 = vpop.eup %3577  ;;  %v857_v22 = vmul.f32 %v841_v15, %v4200_v1  ;;  %v839_v10 = vmul.f32 0.5, %v823_v14  ;;  %v821_v12 = vadd.f32 1.0, %v3576_v7  ;;  %v3549_v21 = vld [vmem:[#allocation9 + $0x20] sm:$0xff]   ;;  %v3551_v16 = vld [vmem:[#allocation9 + $0x30] sm:$0xff]   ;;  %v908_v15 = vpop.permute.xlu0 %907 }
 0x35e   :  { %3162 = vmatprep.subr.bf16.mxu1 %v888_v3  ;;  %v887_v28 = vpack.c.bf16 %v862_v60, %v861_v59  ;;  %v3580_v33 = vpop.eup %3579  ;;  %v856_v23 = vmul.f32 %v840_v32, %v4208_v48  ;;  %v820_v0 = vadd.f32 1.0, %v3578_v55 }
 0x35f   :  { %3163 = vmatpush3.bf16.msra.mxu1 %v888_v3  ;;  %v3582_v36 = vpop.eup %3581  ;;  %v885_v53 = vpack.c.bf16 %v858_v63, %v857_v22  ;;  %v838_v19 = vmul.f32 0.5, %v822_v45  ;;  %v855_v11 = vmul.f32 %v839_v10, %v4206_v34  ;;  %v837_v4 = vmul.f32 0.5, %v821_v12 }
 0x360   :  { %3164 = vmatprep.subr.bf16.mxu1 %v887_v28  ;;  %v3584_v30 = vpop.eup %3583  ;;  %v819_v17 = vadd.f32 1.0, %v3580_v33  ;;  %v836_v1 = vmul.f32 0.5, %v820_v0  ;;  %v818_v56 = vadd.f32 1.0, %v3582_v36  ;;  %v3752_v63 = vmov 0.0  }
 0x361   :  { %v884_v35 = vpack.c.bf16 %v856_v23, %v855_v11  ;;  %v854_v18 = vmul.f32 %v838_v19, %v4229_v38  ;;  %v853_v51 = vmul.f32 %v837_v4, %v4239_v44  ;;  %v817_v48 = vadd.f32 1.0, %v3584_v30  ;;  %v3546_v44 = vld [vmem:[#allocation9 + $0x8] sm:$0xff]   ;;  %v918_v14 = vpop.permute.xlu0 %917 }
 0x362   :  { %v835_v3 = vmul.f32 0.5, %v819_v17  ;;  %v852_v60 = vmul.f32 %v836_v1, %v4194_v24  ;;  %v834_v61 = vmul.f32 0.5, %v818_v56  ;;  %v3548_v24 = vld [vmem:[#allocation9 + $0x18] sm:$0xff]   ;;  %v2822_v32 = vsel %vm1130_vm1, 1.0, %v3752_v63 }
 0x363   :  { %3165 = vmatpush3.bf16.msra.mxu1 %v887_v28  ;;  %v883_v59 = vpack.c.bf16 %v854_v18, %v853_v51  ;;  %v833_v29 = vmul.f32 0.5, %v817_v48  ;;  %v1133_v10 = vmul.f32 %v2822_v32, %v4008_v37 }
 0x364   :  { %3166 = vmatprep.subr.bf16.mxu1 %v886_v13  ;;  %v851_v34 = vmul.f32 %v835_v3, %v4198_v52  ;;  %v850_v38 = vmul.f32 %v834_v61, %v4221_v27  ;;  %v3550_v52 = vld [vmem:[#allocation9 + $0x28] sm:$0xff]   ;;  %v3552_v27 = vld [vmem:[#allocation9 + $0x38] sm:$0xff]  }
 0x365   :  { %v849_v41 = vmul.f32 %v833_v29, %v4219_v9  ;;  %v913_v9 = vpop.permute.xlu1 %912  ;;  %v4315_v0 = vrot.slane %v1133_v10, %v3853_v2 }
 0x366   :  { %v882_v28 = vpack.c.bf16 %v852_v60, %v851_v34 }
 0x367   :  { %3167 = vmatpush3.bf16.msra.mxu1 %v886_v13  ;;  %v881_v8 = vpack.c.bf16 %v850_v38, %v849_v41  ;;  %v928_v13 = vpop.permute.xlu0 %927 }
 0x368   :  { %3168 = vmatprep.subr.bf16.mxu1 %v885_v53 }
 0x369   :  { %v923_v7 = vpop.permute.xlu1 %922 }
 0x36b   :  { %3169 = vmatpush3.bf16.msra.mxu1 %v885_v53  ;;  %v938_v55 = vpop.permute.xlu0 %937 }
 0x36c   :  { %3170 = vmatprep.subr.bf16.mxu1 %v884_v35 }
 0x36d   :  { %v933_v45 = vpop.permute.xlu1 %932 }
 0x36f   :  { %3171 = vmatpush3.bf16.msra.mxu1 %v884_v35  ;;  %v948_v11 = vpop.permute.xlu0 %947 }
 0x370   :  { %3172 = vmatprep.subr.bf16.mxu1 %v883_v59 }
 0x371   :  { %v943_v53 = vpop.permute.xlu1 %942 }
 0x373   :  { %3173 = vmatpush3.bf16.msra.mxu1 %v883_v59  ;;  %v958_v61 = vpop.permute.xlu0 %957 }
 0x374   :  { %3174 = vmatprep.subr.bf16.mxu1 %v882_v28 }
 0x375   :  { %v953_v3 = vpop.permute.xlu1 %952 }
 0x377   :  { %3175 = vmatpush3.bf16.msra.mxu1 %v882_v28 }
 0x378   :  { %3176 = vmatprep.subr.bf16.mxu1 %v881_v8 }
 0x37b   :  { %3177 = vmatpush3.bf16.msra.mxu1 %v881_v8 }
 0x37e   :  { %3179 = vmatmul.mubr.bf16.vlgmr.msra.gmra.mxu1 %v3546_v44  ;;  %v963_v44 = vpop.permute.xlu1 %962 }
 0x37f   :  { %3182 = vmatprep.mubr.bf16.mxu1 %v3547_v20 }
 0x382   :  { %v973_v10 = vpop.permute.xlu1 %972 }
 0x386   :  { %3183 = vmatmul.mubr.bf16.gmra.mxu1 %v3548_v24 }
 0x387   :  { %3186 = vmatprep.mubr.bf16.mxu1 %v3549_v21 }
 0x38e   :  { %3187 = vmatmul.mubr.bf16.gmra.mxu1 %v3550_v52 }
 0x38f   :  { %3190 = vmatprep.mubr.bf16.mxu1 %v3551_v16 }
 0x396   :  { %3191 = vmatmul.mubr.bf16.gmra.mxu1 %v3552_v27 }
 0x43e   :  { %v3180_v22 = vpop.f32.mrf.mxu1 }
 0x43f   :  { %v1076_v12 = vadd.f32 %v3180_v22, %v918_v14 }
 0x440   :  { %v1067_v33 = vpop.f32.mrf.mxu1 }
 0x441   :  { %v1068_v36 = vadd.f32 %v1067_v33, %v908_v15  ;;  %v1137_v23 = vsub.f32 %v1076_v12, %v4028_v49  ;;  %v968_v15 = vpop.permute.xlu0 %967 }
 0x442   :  { %v3181_v19 = vpop.f32.mrf.mxu1 }
 0x443   :  { %v1135_v30 = vsub.f32 %v1068_v36, %v4017_v42  ;;  %v1079_v5 = vadd.f32 %v3181_v19, %v923_v7  ;;  %v1159_v1 = vmul.f32 %v4315_v0, %v1137_v23 }
 0x444   :  { %v1070_v4 = vpop.f32.mrf.mxu1 }
 0x445   :  { %v1071_v17 = vadd.f32 %v1070_v4, %v913_v9  ;;  %v1157_v35 = vmul.f32 %v4315_v0, %v1135_v30  ;;  %v1138_v37 = vsub.f32 %v1079_v5, %v4023_v46  ;;  %v1179_v46 = vsel %vm364_vm0, %v1159_v1, 0.0  ;;  %v978_v33 = vpop.permute.xlu0 %977 }
 0x446   :  { %v3184_v18 = vpop.f32.mrf.mxu1 }
 0x447   :  { %v1136_v56 = vsub.f32 %v1071_v17, %v4012_v39  ;;  %v1092_v49 = vadd.f32 %v3184_v18, %v938_v55  ;;  %v1173_v51 = vsel %vm364_vm0, %v1157_v35, 0.0  ;;  %v1160_v29 = vmul.f32 %v4315_v0, %v1138_v37  ;;  %v983_v37 = vpop.permute.xlu1 %982 }
 0x448   :  { %v1083_v48 = vpop.f32.mrf.mxu1  ;;  %1174 = vadd.xlane.f32.xlu0 %v1173_v51 }
 0x449   :  { %v1141_v42 = vsub.f32 %v1092_v49, %v4056_v25  ;;  %v1084_v59 = vadd.f32 %v1083_v48, %v928_v13  ;;  %v1158_v60 = vmul.f32 %v4315_v0, %v1136_v56  ;;  %v1182_v27 = vsel %vm364_vm0, %v1160_v29, 0.0 }
 0x44a   :  { %v3185_v34 = vpop.f32.mrf.mxu1 }
 0x44b   :  { %v1139_v28 = vsub.f32 %v1084_v59, %v4039_v57  ;;  %v1095_v39 = vadd.f32 %v3185_v34, %v943_v53  ;;  %v1176_v38 = vsel %vm364_vm0, %v1158_v60, 0.0  ;;  %v1163_v41 = vmul.f32 %v4315_v0, %v1141_v42 }
 0x44c   :  { %v1086_v8 = vpop.f32.mrf.mxu1  ;;  %1177 = vadd.xlane.f32.xlu1 %v1176_v38  ;;  %1180 = vadd.xlane.f32.xlu0 %v1179_v46 }
 0x44d   :  { %v1087_v25 = vadd.f32 %v1086_v8, %v933_v45  ;;  %v1142_v20 = vsub.f32 %v1095_v39, %v4046_v62  ;;  %v1161_v21 = vmul.f32 %v4315_v0, %v1139_v28  ;;  %v1191_v57 = vsel %vm364_vm0, %v1163_v41, 0.0 }
 0x44e   :  { %v3188_v24 = vpop.f32.mrf.mxu1 }
 0x44f   :  { %v1140_v52 = vsub.f32 %v1087_v25, %v4035_v54  ;;  %v1108_v16 = vadd.f32 %v3188_v24, %v958_v61  ;;  %v1185_v63 = vsel %vm364_vm0, %v1161_v21, 0.0  ;;  %v1164_v32 = vmul.f32 %v4315_v0, %v1142_v20 }
 0x450   :  { %v1099_v9 = vpop.f32.mrf.mxu1  ;;  %1192 = vadd.xlane.f32.xlu1 %v1191_v57  ;;  %1183 = vadd.xlane.f32.xlu0 %v1182_v27 }
 0x451   :  { %v1145_v14 = vsub.f32 %v1108_v16, %v4030_v50  ;;  %v1100_v7 = vadd.f32 %v1099_v9, %v948_v11  ;;  %v1162_v13 = vmul.f32 %v4315_v0, %v1140_v52  ;;  %v1194_v5 = vsel %vm364_vm0, %v1164_v32, 0.0 }
 0x452   :  { %v3189_v62 = vpop.f32.mrf.mxu1 }
 0x453   :  { %v1143_v54 = vsub.f32 %v1100_v7, %v4019_v43  ;;  %v1111_v45 = vadd.f32 %v3189_v62, %v963_v44  ;;  %v1188_v55 = vsel %vm364_vm0, %v1162_v13, 0.0  ;;  %v1167_v22 = vmul.f32 %v4315_v0, %v1145_v14 }
 0x454   :  { %v1102_v12 = vpop.f32.mrf.mxu1  ;;  %1186 = vadd.xlane.f32.xlu1 %v1185_v63  ;;  %1189 = vadd.xlane.f32.xlu0 %v1188_v55 }
 0x455   :  { %v1103_v50 = vadd.f32 %v1102_v12, %v953_v3  ;;  %v1146_v36 = vsub.f32 %v1111_v45, %v4025_v47  ;;  %v1165_v23 = vmul.f32 %v4315_v0, %v1143_v54  ;;  %v1203_v43 = vsel %vm364_vm0, %v1167_v22, 0.0 }
 0x456   :  { %v3192_v53 = vpop.f32.mrf.mxu1 }
 0x457   :  { %v1144_v19 = vsub.f32 %v1103_v50, %v4014_v40  ;;  %v1124_v30 = vadd.f32 %v3192_v53, %v978_v33  ;;  %v1197_v18 = vsel %vm364_vm0, %v1165_v23, 0.0  ;;  %v1168_v1 = vmul.f32 %v4315_v0, %v1146_v36 }
 0x458   :  { %v1115_v11 = vpop.f32.mrf.mxu1  ;;  %1204 = vadd.xlane.f32.xlu1 %v1203_v43  ;;  %1195 = vadd.xlane.f32.xlu0 %v1194_v5 }
 0x459   :  { %v1149_v4 = vsub.f32 %v1124_v30, %v4064_v31  ;;  %v1116_v17 = vadd.f32 %v1115_v11, %v968_v15  ;;  %v1166_v35 = vmul.f32 %v4315_v0, %v1144_v19  ;;  %v1206_v48 = vsel %vm364_vm0, %v1168_v1, 0.0  ;;  %v1134_v15 = vld [vmem:[#allocation2] sm:$0x1] }
 0x45a   :  { %v3193_v47 = vpop.f32.mrf.mxu1 }
 0x45b   :  { %v1147_v40 = vsub.f32 %v1116_v17, %v4050_v6  ;;  %v1127_v56 = vadd.f32 %v3193_v47, %v983_v37  ;;  %v1200_v49 = vsel %vm364_vm0, %v1166_v35, 0.0  ;;  %v1171_v51 = vmul.f32 %v4315_v0, %v1149_v4 }
 0x45c   :  { %v1118_v3 = vpop.f32.mrf.mxu1  ;;  %1198 = vadd.xlane.f32.xlu1 %v1197_v18  ;;  %1201 = vadd.xlane.f32.xlu0 %v1200_v49 }
 0x45d   :  { %v1119_v31 = vadd.f32 %v1118_v3, %v973_v10  ;;  %v1150_v42 = vsub.f32 %v1127_v56, %v4058_v26  ;;  %v1215_v60 = vsel %vm364_vm0, %v1171_v51, 0.0  ;;  %v1169_v61 = vmul.f32 %v4315_v0, %v1147_v40 }
 0x45f   :  { %v1148_v59 = vsub.f32 %v1119_v31, %v4041_v58  ;;  %v1209_v34 = vsel %vm364_vm0, %v1169_v61, 0.0  ;;  %v1172_v29 = vmul.f32 %v4315_v0, %v1150_v42 }
 0x460   :  { %1216 = vadd.xlane.f32.xlu1 %v1215_v60  ;;  %1207 = vadd.xlane.f32.xlu0 %v1206_v48 }
 0x461   :  { %v1170_v6 = vmul.f32 %v4315_v0, %v1148_v59  ;;  %v1218_v26 = vsel %vm364_vm0, %v1172_v29, 0.0 }
 0x463   :  { %v1212_v46 = vsel %vm364_vm0, %v1170_v6, 0.0 }
 0x464   :  { %1210 = vadd.xlane.f32.xlu1 %v1209_v34  ;;  %1213 = vadd.xlane.f32.xlu0 %v1212_v46 }
 0x468   :  { %1219 = vadd.xlane.f32.xlu0 %v1218_v26 }
 0x4d1   :  { %v1175_v58 = vpop.xlane.xlu0 %1174 }
 0x4d2   :  { %1221 = vxpose.xlu1.b32.start [1/16] (narrow) %v1175_v58, 8 }
 0x4d5   :  { %v1178_v28 = vpop.xlane.xlu1 %1177  ;;  %v1181_v39 = vpop.xlane.xlu0 %1180 }
 0x4d6   :  { %1222 = vxpose.xlu1.b32.cont [2/16] (narrow) %v1178_v28, 8 }
 0x4d9   :  { %v1193_v38 = vpop.xlane.xlu1 %1192  ;;  %v1184_v41 = vpop.xlane.xlu0 %1183 }
 0x4da   :  { %1223 = vxpose.xlu1.b32.cont [3/16] (narrow) %v1181_v39, 8 }
 0x4dd   :  { %v1187_v8 = vpop.xlane.xlu1 %1186  ;;  %v1190_v25 = vpop.xlane.xlu0 %1189 }
 0x4de   :  { %1224 = vxpose.xlu1.b32.cont [4/16] (narrow) %v1184_v41, 8 }
 0x4e1   :  { %v1205_v0 = vpop.xlane.xlu1 %1204  ;;  %v1196_v44 = vpop.xlane.xlu0 %1195 }
 0x4e2   :  { %1225 = vxpose.xlu1.b32.cont [5/16] (narrow) %v1187_v8, 8 }
 0x4e5   :  { %v1199_v20 = vpop.xlane.xlu1 %1198  ;;  %v1202_v24 = vpop.xlane.xlu0 %1201 }
 0x4e6   :  { %1226 = vxpose.xlu1.b32.cont [6/16] (narrow) %v1190_v25, 8 }
 0x4e9   :  { %v1217_v21 = vpop.xlane.xlu1 %1216  ;;  %v1208_v52 = vpop.xlane.xlu0 %1207 }
 0x4ea   :  { %1227 = vxpose.xlu1.b32.cont [7/16] (narrow) %v1193_v38, 8 }
 0x4ed   :  { %v1211_v16 = vpop.xlane.xlu1 %1210  ;;  %v1214_v57 = vpop.xlane.xlu0 %1213 }
 0x4ee   :  { %1228 = vxpose.xlu1.b32.cont [8/16] (narrow) %v1196_v44, 8 }
 0x4f1   :  { %v1220_v27 = vpop.xlane.xlu0 %1219 }
 0x4f2   :  { %1229 = vxpose.xlu1.b32.cont [9/16] (narrow) %v1199_v20, 8 }
 0x4f6   :  { %1230 = vxpose.xlu1.b32.cont [10/16] (narrow) %v1202_v24, 8 }
 0x4fa   :  { %1231 = vxpose.xlu1.b32.cont [11/16] (narrow) %v1205_v0, 8 }
 0x4fe   :  { %1232 = vxpose.xlu1.b32.cont [12/16] (narrow) %v1208_v52, 8 }
 0x502   :  { %1233 = vxpose.xlu1.b32.cont [13/16] (narrow) %v1211_v16, 8 }
 0x506   :  { %1234 = vxpose.xlu1.b32.cont [14/16] (narrow) %v1214_v57, 8 }
 0x50a   :  { %1235 = vxpose.xlu1.b32.cont [15/16] (narrow) %v1217_v21, 8 }
 0x50e   :  { %1236 = vxpose.xlu1.b32.end [16/16] (narrow) %v1220_v27, 8 }
 0x54e   :  { %v1237_v9 = vpop.trf.xlu1 }
 0x54f   :  { %v1253_v14 = vadd.f32 %v1237_v9, %v1134_v15 }
 0x551   :  { %1254 = vst [vmem:[#allocation2] sm:$0x1] %v1253_v14 }
 0x552 PF:  { %v4367_v7 = vld [vmem:[%s5072_s1 + $0x1] sm:$0x1]  ;;  %v1311_v13 = vld [vmem:[#allocation5] sm:$0xff]  ;;  %v5121_v32 = vld [vmem:[#allocation17_spill] sm:$0xff]  ;;  %v5123_v45 = vmov 1.0  }
 0x553   :  { %v4371_v62 = vrot.slane %v4367_v7, %v3853_v2  ;;  %3226 = vmatprep.mubr.f32.mxu0 %v1311_v13  ;;  %v1319_v63 = vld [vmem:[#allocation5 + $0x40] sm:$0xff]  ;;  %v5122_v54 = vld [vmem:[#allocation18_spill] sm:$0xff]  ;;  %v5124_v55 = vld [vmem:[#allocation19_spill] sm:$0xff] }
 0x554   :  { %3238 = vmatprep.mubr.f32.mxu1 %v1319_v63  ;;  %v5125_v22 = vld [vmem:[#allocation20_spill] sm:$0xff]  ;;  %v5126_v10 = vld [vmem:[#allocation21_spill] sm:$0xff]  ;;  %v5127_v12 = vld [vmem:[#allocation22_spill] sm:$0xff] }
 0x555   :  { %vm1278_vm2 = vcmp.eq.s32.totalorder %v5121_v32, %v4371_v62  ;;  %vm1277_vm3 = vcmp.eq.s32.totalorder %v5122_v54, %v4371_v62  ;;  %vm1276_vm4 = vcmp.eq.s32.totalorder %v5124_v55, %v4371_v62  ;;  %vm1275_vm5 = vcmp.eq.s32.totalorder %v5125_v22, %v4371_v62  ;;  %v5128_v50 = vld [vmem:[#allocation23_spill] sm:$0xff]  ;;  %v5129_v33 = vld [vmem:[#allocation24_spill] sm:$0xff]  ;;  %v5130_v36 = vld [vmem:[#allocation25_spill] sm:$0xff] }
 0x556   :  { %3194 = vmatprep.subr.msk.mxu0 %vm1278_vm2, %v5123_v45  ;;  %3486 = vmatprep.subr.msk.mxu1 %vm1278_vm2, %v5123_v45  ;;  %vm1274_vm6 = vcmp.eq.s32.totalorder %v5126_v10, %v4371_v62  ;;  %vm1273_vm7 = vcmp.eq.s32.totalorder %v5127_v12, %v4371_v62  ;;  %vm1272_vm8 = vcmp.eq.s32.totalorder %v5128_v50, %v4371_v62  ;;  %v5131_v53 = vld [vmem:[#allocation26_spill] sm:$0xff]  ;;  %v5132_v23 = vld [vmem:[#allocation27_spill] sm:$0xff]  ;;  %v5133_v19 = vld [vmem:[#allocation28_spill] sm:$0xff] }
 0x557   :  { %3195 = vmatpush3.msk.msra.mxu0 %vm1278_vm2, %v5123_v45  ;;  %3502 = vmatpush3.msk.msra.mxu1 %vm1278_vm2, %v5123_v45  ;;  %vm1271_vm9 = vcmp.eq.s32.totalorder %v5129_v33, %v4371_v62  ;;  %vm1270_vm10 = vcmp.eq.s32.totalorder %v5130_v36, %v4371_v62  ;;  %vm1269_vm11 = vcmp.eq.s32.totalorder %v5131_v53, %v4371_v62  ;;  %v5134_v30 = vld [vmem:[#allocation29_spill] sm:$0xff]  ;;  %v5135_v43 = vld [vmem:[#allocation30_spill] sm:$0xff]  ;;  %v5136_v5 = vld [vmem:[#allocation31_spill] sm:$0xff] }
 0x558   :  { %3196 = vmatprep.subr.msk.mxu0 %vm1277_vm3, %v5123_v45  ;;  %3487 = vmatprep.subr.msk.mxu1 %vm1277_vm3, %v5123_v45  ;;  %vm1268_vm12 = vcmp.eq.s32.totalorder %v5132_v23, %v4371_v62  ;;  %vm1267_vm13 = vcmp.eq.s32.totalorder %v5133_v19, %v4371_v62  ;;  %vm1266_vm14 = vcmp.eq.s32.totalorder %v5134_v30, %v4371_v62  ;;  %v5137_v11 = vld [vmem:[#allocation16_spill] sm:$0xff]  ;;  %v1312_v4 = vld [vmem:[#allocation5 + $0x8] sm:$0xff]  ;;  %v1313_v35 = vld [vmem:[#allocation5 + $0x10] sm:$0xff] }
 0x559   :  { %3197 = vmatpush3.msk.msra.mxu0 %vm1277_vm3, %v5123_v45  ;;  %3503 = vmatpush3.msk.msra.mxu1 %vm1277_vm3, %v5123_v45  ;;  %vm1265_vm15 = vcmp.eq.s32.totalorder %v5135_v43, %v4371_v62  ;;  %vm1264_vm1 = vcmp.eq.s32.totalorder %v5136_v5, %v4371_v62  ;;  %vm1263_vm2 = vcmp.eq.s32.totalorder %v5137_v11, %v4371_v62  ;;  %v1320_v17 = vld [vmem:[#allocation5 + $0x48] sm:$0xff]  ;;  %v1321_v37 = vld [vmem:[#allocation5 + $0x50] sm:$0xff]  ;;  %v1314_v47 = vld [vmem:[#allocation5 + $0x18] sm:$0xff] }
 0x55a   :  { %3198 = vmatprep.subr.msk.mxu0 %vm1276_vm4, %v5123_v45  ;;  %3488 = vmatprep.subr.msk.mxu1 %vm1276_vm4, %v5123_v45  ;;  %v1322_v18 = vld [vmem:[#allocation5 + $0x58] sm:$0xff]  ;;  %v1315_v1 = vld [vmem:[#allocation5 + $0x20] sm:$0xff]  ;;  %v1316_v56 = vld [vmem:[#allocation5 + $0x28] sm:$0xff] }
 0x55b   :  { %3199 = vmatpush3.msk.msra.mxu0 %vm1276_vm4, %v5123_v45  ;;  %3504 = vmatpush3.msk.msra.mxu1 %vm1276_vm4, %v5123_v45  ;;  %v1323_v40 = vld [vmem:[#allocation5 + $0x60] sm:$0xff]  ;;  %v1324_v49 = vld [vmem:[#allocation5 + $0x68] sm:$0xff]  ;;  %v1317_v51 = vld [vmem:[#allocation5 + $0x30] sm:$0xff] }
 0x55c   :  { %3200 = vmatprep.subr.msk.mxu0 %vm1275_vm5, %v5123_v45  ;;  %3489 = vmatprep.subr.msk.mxu1 %vm1275_vm5, %v5123_v45  ;;  %v1325_v3 = vld [vmem:[#allocation5 + $0x70] sm:$0xff]  ;;  %v1318_v31 = vld [vmem:[#allocation5 + $0x38] sm:$0xff] }
 0x55d   :  { %3201 = vmatpush3.msk.msra.mxu0 %vm1275_vm5, %v5123_v45  ;;  %3505 = vmatpush3.msk.msra.mxu1 %vm1275_vm5, %v5123_v45  ;;  %v1326_v48 = vld [vmem:[#allocation5 + $0x78] sm:$0xff] }
 0x55e   :  { %3202 = vmatprep.subr.msk.mxu0 %vm1274_vm6, %v5123_v45  ;;  %3490 = vmatprep.subr.msk.mxu1 %vm1274_vm6, %v5123_v45  ;;  %v4472_v42 = vld [vmem:[%s5073_s2 + $0x1] sm:$0x1]  ;;  %s4540_s2 = sld [smem:[#allocation4 + $0x80]] }
 0x55f   :  { %3203 = vmatpush3.msk.msra.mxu0 %vm1274_vm6, %v5123_v45  ;;  %3506 = vmatpush3.msk.msra.mxu1 %vm1274_vm6, %v5123_v45  ;;  %v1477_v59 = vrot.slane %v4472_v42, %v3853_v2 }
 0x560   :  { %3204 = vmatprep.subr.msk.mxu0 %vm1273_vm7, %v5123_v45  ;;  %3491 = vmatprep.subr.msk.mxu1 %vm1273_vm7, %v5123_v45 }
 0x561   :  { %3205 = vmatpush3.msk.msra.mxu0 %vm1273_vm7, %v5123_v45  ;;  %3507 = vmatpush3.msk.msra.mxu1 %vm1273_vm7, %v5123_v45 }
 0x562   :  { %3206 = vmatprep.subr.msk.mxu0 %vm1272_vm8, %v5123_v45  ;;  %3492 = vmatprep.subr.msk.mxu1 %vm1272_vm8, %v5123_v45 }
 0x563   :  { %3207 = vmatpush3.msk.msra.mxu0 %vm1272_vm8, %v5123_v45  ;;  %3508 = vmatpush3.msk.msra.mxu1 %vm1272_vm8, %v5123_v45 }
 0x564   :  { %3208 = vmatprep.subr.msk.mxu0 %vm1271_vm9, %v5123_v45  ;;  %3493 = vmatprep.subr.msk.mxu1 %vm1271_vm9, %v5123_v45  ;;  %p2858_p12 = scmp.le.s32.totalorder %s4540_s2, 0 }
 0x565   :  { %3209 = vmatpush3.msk.msra.mxu0 %vm1271_vm9, %v5123_v45  ;;  %3509 = vmatpush3.msk.msra.mxu1 %vm1271_vm9, %v5123_v45 }
 0x566   :  { %3210 = vmatprep.subr.msk.mxu0 %vm1270_vm10, %v5123_v45  ;;  %3494 = vmatprep.subr.msk.mxu1 %vm1270_vm10, %v5123_v45 }
 0x567   :  { %3211 = vmatpush3.msk.msra.mxu0 %vm1270_vm10, %v5123_v45  ;;  %3510 = vmatpush3.msk.msra.mxu1 %vm1270_vm10, %v5123_v45 }
 0x568   :  { %3212 = vmatprep.subr.msk.mxu0 %vm1269_vm11, %v5123_v45  ;;  %3495 = vmatprep.subr.msk.mxu1 %vm1269_vm11, %v5123_v45 }
 0x569   :  { %3213 = vmatpush3.msk.msra.mxu0 %vm1269_vm11, %v5123_v45  ;;  %3511 = vmatpush3.msk.msra.mxu1 %vm1269_vm11, %v5123_v45 }
 0x56a   :  { %3214 = vmatprep.subr.msk.mxu0 %vm1268_vm12, %v5123_v45  ;;  %3496 = vmatprep.subr.msk.mxu1 %vm1268_vm12, %v5123_v45 }
 0x56b   :  { %3215 = vmatpush3.msk.msra.mxu0 %vm1268_vm12, %v5123_v45  ;;  %3512 = vmatpush3.msk.msra.mxu1 %vm1268_vm12, %v5123_v45 }
 0x56c   :  { %3216 = vmatprep.subr.msk.mxu0 %vm1267_vm13, %v5123_v45  ;;  %3497 = vmatprep.subr.msk.mxu1 %vm1267_vm13, %v5123_v45 }
 0x56d   :  { %3217 = vmatpush3.msk.msra.mxu0 %vm1267_vm13, %v5123_v45  ;;  %3513 = vmatpush3.msk.msra.mxu1 %vm1267_vm13, %v5123_v45 }
 0x56e   :  { %3218 = vmatprep.subr.msk.mxu0 %vm1266_vm14, %v5123_v45  ;;  %3498 = vmatprep.subr.msk.mxu1 %vm1266_vm14, %v5123_v45 }
 0x56f   :  { %3219 = vmatpush3.msk.msra.mxu0 %vm1266_vm14, %v5123_v45  ;;  %3514 = vmatpush3.msk.msra.mxu1 %vm1266_vm14, %v5123_v45 }
 0x570   :  { %3220 = vmatprep.subr.msk.mxu0 %vm1265_vm15, %v5123_v45  ;;  %3499 = vmatprep.subr.msk.mxu1 %vm1265_vm15, %v5123_v45 }
 0x571   :  { %3221 = vmatpush3.msk.msra.mxu0 %vm1265_vm15, %v5123_v45  ;;  %3515 = vmatpush3.msk.msra.mxu1 %vm1265_vm15, %v5123_v45 }
 0x572   :  { %3222 = vmatprep.subr.msk.mxu0 %vm1264_vm1, %v5123_v45  ;;  %3500 = vmatprep.subr.msk.mxu1 %vm1264_vm1, %v5123_v45 }
 0x573   :  { %3223 = vmatpush3.msk.msra.mxu0 %vm1264_vm1, %v5123_v45  ;;  %3516 = vmatpush3.msk.msra.mxu1 %vm1264_vm1, %v5123_v45 }
 0x574   :  { %3224 = vmatprep.subr.msk.mxu0 %vm1263_vm2, %v5123_v45  ;;  %3501 = vmatprep.subr.msk.mxu1 %vm1263_vm2, %v5123_v45 }
 0x575   :  { %3225 = vmatpush3.msk.msra.mxu0 %vm1263_vm2, %v5123_v45  ;;  %3517 = vmatpush3.msk.msra.mxu1 %vm1263_vm2, %v5123_v45 }
 0x576   :  { %3227 = vmatmul.mubr.f32.vlgmr.msra.gmra.mxu0 %v1312_v4  ;;  %3239 = vmatmul.mubr.f32.vlgmr.msra.gmra.mxu1 %v1320_v17 }
 0x577   :  { %3229 = vmatprep.mubr.f32.mxu0 %v1313_v35  ;;  %3241 = vmatprep.mubr.f32.mxu1 %v1321_v37 }
 0x57a   :  { %3230 = vmatmul.mubr.f32.gmra.mxu0 %v1314_v47  ;;  %3242 = vmatmul.mubr.f32.gmra.mxu1 %v1322_v18 }
 0x57b   :  { %3232 = vmatprep.mubr.f32.mxu0 %v1315_v1  ;;  %3244 = vmatprep.mubr.f32.mxu1 %v1323_v40 }
 0x57e   :  { %3233 = vmatmul.mubr.f32.gmra.mxu0 %v1316_v56  ;;  %3245 = vmatmul.mubr.f32.gmra.mxu1 %v1324_v49 }
 0x57f   :  { %3235 = vmatprep.mubr.f32.mxu0 %v1317_v51  ;;  %3247 = vmatprep.mubr.f32.mxu1 %v1325_v3 }
 0x582   :  { %3236 = vmatmul.mubr.f32.gmra.mxu0 %v1318_v31  ;;  %3248 = vmatmul.mubr.f32.gmra.mxu1 %v1326_v48 }
 0x636   :  { %v4476_v60 = vpop.f32.mrf.mxu0  ;;  %v4478_v61 = vpop.f32.mrf.mxu1 }
 0x637   :  { %v1480_v6 = vmul.f32 %v4476_v60, %v1477_v59  ;;  %v1488_v10 = vmul.f32 %v4478_v61, %v1477_v59 }
 0x638   :  { %v4481_v34 = vpop.f32.mrf.mxu0  ;;  %v4483_v46 = vpop.f32.mrf.mxu1 }
 0x639   :  { %v1479_v29 = vmul.f32 %v1477_v59, %v4481_v34  ;;  %v1498_v26 = vsel %vm364_vm0, %v1480_v6, 0.0  ;;  %v1487_v39 = vmul.f32 %v1477_v59, %v4483_v46  ;;  %v1522_v53 = vsel %vm364_vm0, %v1488_v10, 0.0 }
 0x63a   :  { %1499 = vadd.xlane.f32.xlu0 %v1498_v26  ;;  %v4487_v58 = vpop.f32.mrf.mxu0  ;;  %v4489_v28 = vpop.f32.mrf.mxu1 }
 0x63b   :  { %v1482_v8 = vmul.f32 %v4487_v58, %v1477_v59  ;;  %v1495_v25 = vsel %vm364_vm0, %v1479_v29, 0.0  ;;  %v1519_v24 = vsel %vm364_vm0, %v1487_v39, 0.0  ;;  %v1490_v36 = vmul.f32 %v4489_v28, %v1477_v59  ;;  %v1472_v39 = vld [vmem:[#allocation2 + $0x1] sm:$0x1] }
 0x63c   :  { %v4492_v38 = vpop.f32.mrf.mxu0  ;;  %v4494_v41 = vpop.f32.mrf.mxu1 }
 0x63d   :  { %v1481_v0 = vmul.f32 %v1477_v59, %v4492_v38  ;;  %v1504_v57 = vsel %vm364_vm0, %v1482_v8, 0.0  ;;  %v1489_v9 = vmul.f32 %v1477_v59, %v4494_v41  ;;  %v1528_v43 = vsel %vm364_vm0, %v1490_v36, 0.0 }
 0x63e   :  { %1496 = vadd.xlane.f32.xlu0 %v1495_v25  ;;  %v4499_v44 = vpop.f32.mrf.mxu0  ;;  %v4505_v52 = vpop.f32.mrf.mxu1 }
 0x63f   :  { %v1501_v20 = vsel %vm364_vm0, %v1481_v0, 0.0  ;;  %v1484_v16 = vmul.f32 %v4499_v44, %v1477_v59  ;;  %v1525_v54 = vsel %vm364_vm0, %v1489_v9, 0.0  ;;  %v1492_v30 = vmul.f32 %v4505_v52, %v1477_v59 }
 0x640   :  { %1502 = vadd.xlane.f32.xlu1 %v1501_v20  ;;  %v4503_v21 = vpop.f32.mrf.mxu0  ;;  %v4514_v13 = vpop.f32.mrf.mxu1 }
 0x641   :  { %v1483_v27 = vmul.f32 %v1477_v59, %v4503_v21  ;;  %v1510_v62 = vsel %vm364_vm0, %v1484_v16, 0.0  ;;  %v1491_v32 = vmul.f32 %v1477_v59, %v4514_v13  ;;  %v1534_v4 = vsel %vm364_vm0, %v1492_v30, 0.0 }
 0x642   :  { %1520 = vadd.xlane.f32.xlu0 %v1519_v24  ;;  %v4510_v15 = vpop.f32.mrf.mxu0  ;;  %v4522_v55 = vpop.f32.mrf.mxu1 }
 0x643   :  { %v1507_v14 = vsel %vm364_vm0, %v1483_v27, 0.0  ;;  %v1486_v63 = vmul.f32 %v4510_v15, %v1477_v59  ;;  %v1531_v12 = vsel %vm364_vm0, %v1491_v32, 0.0  ;;  %v1494_v11 = vmul.f32 %v4522_v55, %v1477_v59 }
 0x644   :  { %1505 = vadd.xlane.f32.xlu1 %v1504_v57  ;;  %v4520_v45 = vpop.f32.mrf.mxu0  ;;  %v4528_v33 = vpop.f32.mrf.mxu1 }
 0x645   :  { %v1516_v22 = vsel %vm364_vm0, %v1486_v63, 0.0  ;;  %v1485_v50 = vmul.f32 %v1477_v59, %v4520_v45  ;;  %v1493_v19 = vmul.f32 %v1477_v59, %v4528_v33  ;;  %v1540_v17 = vsel %vm364_vm0, %v1494_v11, 0.0 }
 0x646   :  { %1508 = vadd.xlane.f32.xlu0 %v1507_v14 }
 0x647   :  { %v1513_v23 = vsel %vm364_vm0, %v1485_v50, 0.0  ;;  %v1537_v5 = vsel %vm364_vm0, %v1493_v19, 0.0 }
 0x648   :  { %1511 = vadd.xlane.f32.xlu1 %v1510_v62 }
 0x64a   :  { %1526 = vadd.xlane.f32.xlu0 %v1525_v54 }
 0x64c   :  { %1517 = vadd.xlane.f32.xlu1 %v1516_v22 }
 0x64e   :  { %1532 = vadd.xlane.f32.xlu0 %v1531_v12 }
 0x650   :  { %1523 = vadd.xlane.f32.xlu1 %v1522_v53 }
 0x652   :  { %1514 = vadd.xlane.f32.xlu0 %v1513_v23 }
 0x654   :  { %1529 = vadd.xlane.f32.xlu1 %v1528_v43 }
 0x656   :  { %1538 = vadd.xlane.f32.xlu0 %v1537_v5 }
 0x658   :  { %1535 = vadd.xlane.f32.xlu1 %v1534_v4 }
 0x65c   :  { %1541 = vadd.xlane.f32.xlu1 %v1540_v17 }
 0x6c3   :  { %v1500_v35 = vpop.xlane.xlu0 %1499 }
 0x6c7   :  { %v1497_v37 = vpop.xlane.xlu0 %1496 }
 0x6c8   :  { %1543 = vxpose.xlu0.b32.start [1/16] (narrow) %v1497_v37, 8 }
 0x6c9   :  { %v1503_v18 = vpop.xlane.xlu1 %1502 }
 0x6cb   :  { %v1521_v47 = vpop.xlane.xlu0 %1520 }
 0x6cc   :  { %1544 = vxpose.xlu0.b32.cont [2/16] (narrow) %v1500_v35, 8 }
 0x6cd   :  { %v1506_v40 = vpop.xlane.xlu1 %1505 }
 0x6cf   :  { %v1509_v1 = vpop.xlane.xlu0 %1508 }
 0x6d0   :  { %1545 = vxpose.xlu0.b32.cont [3/16] (narrow) %v1503_v18, 8 }
 0x6d1   :  { %v1512_v51 = vpop.xlane.xlu1 %1511 }
 0x6d3   :  { %v1527_v56 = vpop.xlane.xlu0 %1526 }
 0x6d4   :  { %1546 = vxpose.xlu0.b32.cont [4/16] (narrow) %v1506_v40, 8 }
 0x6d5   :  { %v1518_v31 = vpop.xlane.xlu1 %1517 }
 0x6d7   :  { %v1533_v49 = vpop.xlane.xlu0 %1532 }
 0x6d8   :  { %1547 = vxpose.xlu0.b32.cont [5/16] (narrow) %v1509_v1, 8 }
 0x6d9   :  { %v1524_v48 = vpop.xlane.xlu1 %1523 }
 0x6db   :  { %v1515_v3 = vpop.xlane.xlu0 %1514 }
 0x6dc   :  { %1548 = vxpose.xlu0.b32.cont [6/16] (narrow) %v1512_v51, 8 }
 0x6dd   :  { %v1530_v59 = vpop.xlane.xlu1 %1529 }
 0x6df   :  { %v1539_v29 = vpop.xlane.xlu0 %1538 }
 0x6e0   :  { %1549 = vxpose.xlu0.b32.cont [7/16] (narrow) %v1515_v3, 8 }
 0x6e1   :  { %v1536_v6 = vpop.xlane.xlu1 %1535 }
 0x6e4   :  { %1550 = vxpose.xlu0.b32.cont [8/16] (narrow) %v1518_v31, 8 }
 0x6e5   :  { %v1542_v26 = vpop.xlane.xlu1 %1541 }
 0x6e8   :  { %1551 = vxpose.xlu0.b32.cont [9/16] (narrow) %v1521_v47, 8 }
 0x6ec   :  { %1552 = vxpose.xlu0.b32.cont [10/16] (narrow) %v1524_v48, 8 }
 0x6f0   :  { %1553 = vxpose.xlu0.b32.cont [11/16] (narrow) %v1527_v56, 8 }
 0x6f4   :  { %1554 = vxpose.xlu0.b32.cont [12/16] (narrow) %v1530_v59, 8 }
 0x6f8   :  { %1555 = vxpose.xlu0.b32.cont [13/16] (narrow) %v1533_v49, 8 }
 0x6fc   :  { %1556 = vxpose.xlu0.b32.cont [14/16] (narrow) %v1536_v6, 8 }
 0x700   :  { %1557 = vxpose.xlu0.b32.cont [15/16] (narrow) %v1539_v29, 8 }
 0x704   :  { %1558 = vxpose.xlu0.b32.end [16/16] (narrow) %v1542_v26, 8 }
 0x743   :  { %1585 = sbr.rel (%p2858_p12) target bundleno = 2653 (0xa5d), region = 77 }
 0x744   :  { %v1559_v8 = vpop.trf.xlu0 }
 0x745   :  { %v1575_v25 = vadd.f32 %v1559_v8, %v1472_v39 }
 0x747   :  { %1576 = vst [vmem:[#allocation2 + $0x1] sm:$0x1] %v1575_v25 }
 0x748   :  { %v1609_v0 = vpack.c.bf16 %v4522_v55, %v4528_v33  ;;  %v1608_v20 = vpack.c.bf16 %v4505_v52, %v4514_v13  ;;  %v3587_v24 = vld [vmem:[#allocation7] sm:$0xff]   ;;  %v3753_v16 = vmov 0   ;;  %v1607_v57 = vpack.c.bf16 %v4489_v28, %v4494_v41  ;;  %v1624_v9 = vld [vmem:[%s5077_s6 + $0x70] sm:$0xff]  ;;  %v1625_v62 = vld [vmem:[%s5077_s6 + $0x78] sm:$0xff] }
 0x749   :  { %3266 = vmatprep.mubr.bf16.mxu0 %v3587_v24  ;;  %3585 = vset.pattern.permute.xlu0 %v3753_v16  ;;  %v1606_v27 = vpack.c.bf16 %v4478_v61, %v4483_v46  ;;  %v1622_v14 = vld [vmem:[%s5077_s6 + $0x60] sm:$0xff]  ;;  %v1623_v63 = vld [vmem:[%s5077_s6 + $0x68] sm:$0xff]  ;;  %v1605_v32 = vpack.c.bf16 %v4510_v15, %v4520_v45  ;;  %v1620_v54 = vld [vmem:[%s5077_s6 + $0x50] sm:$0xff]  ;;  %v1604_v10 = vpack.c.bf16 %v4499_v44, %v4503_v21  ;;  %vm2260_vm3 = vcmp.ge.s32.totalorder %v4367_v7, 24 }
 0x74a   :  { %3250 = vmatprep.subr.bf16.mxu0 %v1609_v0  ;;  %3586 = vset.pattern.permute.xlu1 %v3753_v16  ;;  %v1621_v22 = vld [vmem:[%s5077_s6 + $0x58] sm:$0xff]  ;;  %v1618_v12 = vld [vmem:[%s5077_s6 + $0x40] sm:$0xff]  ;;  %v1619_v50 = vld [vmem:[%s5077_s6 + $0x48] sm:$0xff]  ;;  %v1603_v36 = vpack.c.bf16 %v4487_v58, %v4492_v38  ;;  %v1602_v19 = vpack.c.bf16 %v4476_v60, %v4481_v34 }
 0x74b   :  { %3251 = vmatpush3.bf16.msra.mxu0 %v1609_v0  ;;  %1698 = vperm.xlu0 %3585, %v1624_v9   ;;  %v1616_v53 = vld [vmem:[%s5077_s6 + $0x30] sm:$0xff]  ;;  %v1617_v23 = vld [vmem:[%s5077_s6 + $0x38] sm:$0xff]  ;;  %v1614_v30 = vld [vmem:[%s5077_s6 + $0x20] sm:$0xff] }
 0x74c   :  { %3252 = vmatprep.subr.bf16.mxu0 %v1608_v20  ;;  %1688 = vperm.xlu1 %3586, %v1622_v14   ;;  %v1615_v43 = vld [vmem:[%s5077_s6 + $0x28] sm:$0xff]  ;;  %v1612_v11 = vld [vmem:[%s5077_s6 + $0x10] sm:$0xff]  ;;  %v1613_v4 = vld [vmem:[%s5077_s6 + $0x18] sm:$0xff] }
 0x74d   :  { %v3588_v5 = vld [vmem:[#allocation7 + $0x8] sm:$0xff]   ;;  %v3589_v17 = vld [vmem:[#allocation7 + $0x10] sm:$0xff]   ;;  %v1610_v35 = vld [vmem:[%s5077_s6] sm:$0xff] }
 0x74e   :  { %v1611_v37 = vld [vmem:[%s5077_s6 + $0x8] sm:$0xff]  ;;  %v3590_v47 = vld [vmem:[#allocation7 + $0x18] sm:$0xff]   ;;  %v2021_v56 = vld [vmem:[%s5079_s8 + $0x10] sm:$0xff] }
 0x74f   :  { %3253 = vmatpush3.bf16.msra.mxu0 %v1608_v20  ;;  %1703 = vperm.xlu0 %3585, %v1625_v62   ;;  %v2019_v18 = vld [vmem:[%s5079_s8] sm:$0xff]  ;;  %v2020_v1 = vld [vmem:[%s5079_s8 + $0x8] sm:$0xff]  ;;  %v2022_v49 = vld [vmem:[%s5079_s8 + $0x18] sm:$0xff] }
 0x750   :  { %3254 = vmatprep.subr.bf16.mxu0 %v1607_v57  ;;  %1693 = vperm.xlu1 %3586, %v1623_v63   ;;  %v3591_v40 = vld [vmem:[#allocation7 + $0x20] sm:$0xff]   ;;  %v3592_v51 = vld [vmem:[#allocation7 + $0x28] sm:$0xff]   ;;  %v3593_v48 = vld [vmem:[#allocation7 + $0x30] sm:$0xff]  }
 0x751   :  { %v2023_v3 = vld [vmem:[%s5079_s8 + $0x20] sm:$0xff]  ;;  %v2024_v31 = vld [vmem:[%s5079_s8 + $0x28] sm:$0xff]  ;;  %v2025_v59 = vld [vmem:[%s5079_s8 + $0x30] sm:$0xff] }
 0x752   :  { %v2026_v6 = vld [vmem:[%s5079_s8 + $0x38] sm:$0xff]  ;;  %v2027_v26 = vld [vmem:[%s5079_s8 + $0x40] sm:$0xff]  ;;  %v2028_v39 = vld [vmem:[%s5079_s8 + $0x48] sm:$0xff] }
 0x753   :  { %3255 = vmatpush3.bf16.msra.mxu0 %v1607_v57  ;;  %1678 = vperm.xlu0 %3585, %v1620_v54   ;;  %v3594_v29 = vld [vmem:[#allocation7 + $0x38] sm:$0xff]   ;;  %v2029_v8 = vld [vmem:[%s5079_s8 + $0x50] sm:$0xff]  ;;  %v2032_v20 = vld [vmem:[%s5079_s8 + $0x68] sm:$0xff] }
 0x754   :  { %3256 = vmatprep.subr.bf16.mxu0 %v1606_v27  ;;  %1683 = vperm.xlu1 %3586, %v1621_v22   ;;  %v2030_v25 = vld [vmem:[%s5079_s8 + $0x58] sm:$0xff]  ;;  %v2031_v0 = vld [vmem:[%s5079_s8 + $0x60] sm:$0xff]  ;;  %v2033_v24 = vld [vmem:[%s5079_s8 + $0x70] sm:$0xff] }
 0x755   :  { %v2034_v16 = vld [vmem:[%s5079_s8 + $0x78] sm:$0xff]  ;;  %v3595_v57 = vld [vmem:[#allocation9] sm:$0xff]  }
 0x756   :  { %3298 = vmatprep.mubr.bf16.mxu1 %v3595_v57 }
 0x757   :  { %3257 = vmatpush3.bf16.msra.mxu0 %v1606_v27  ;;  %1668 = vperm.xlu0 %3585, %v1618_v12  }
 0x758   :  { %3258 = vmatprep.subr.bf16.mxu0 %v1605_v32  ;;  %1673 = vperm.xlu1 %3586, %v1619_v50  }
 0x75b   :  { %3259 = vmatpush3.bf16.msra.mxu0 %v1605_v32  ;;  %1658 = vperm.xlu0 %3585, %v1616_v53  }
 0x75c   :  { %3260 = vmatprep.subr.bf16.mxu0 %v1604_v10  ;;  %1663 = vperm.xlu1 %3586, %v1617_v23  }
 0x75f   :  { %3261 = vmatpush3.bf16.msra.mxu0 %v1604_v10  ;;  %1648 = vperm.xlu0 %3585, %v1614_v30  }
 0x760   :  { %3262 = vmatprep.subr.bf16.mxu0 %v1603_v36  ;;  %1653 = vperm.xlu1 %3586, %v1615_v43  }
 0x763   :  { %3263 = vmatpush3.bf16.msra.mxu0 %v1603_v36  ;;  %1638 = vperm.xlu0 %3585, %v1612_v11  }
 0x764   :  { %3264 = vmatprep.subr.bf16.mxu0 %v1602_v19  ;;  %1643 = vperm.xlu1 %3586, %v1613_v4  }
 0x767   :  { %3265 = vmatpush3.bf16.msra.mxu0 %v1602_v19  ;;  %1628 = vperm.xlu0 %3585, %v1610_v35  }
 0x768   :  { %1633 = vperm.xlu1 %3586, %v1611_v37  }
 0x76a   :  { %3267 = vmatmul.mubr.bf16.vlgmr.msra.gmra.mxu0 %v3588_v5 }
 0x76b   :  { %3270 = vmatprep.mubr.bf16.mxu0 %v3589_v17  ;;  %2037 = vperm.xlu0 %3585, %v2019_v18  }
 0x76c   :  { %2042 = vperm.xlu1 %3586, %v2020_v1  }
 0x76f   :  { %2047 = vperm.xlu0 %3585, %v2021_v56  }
 0x770   :  { %2052 = vperm.xlu1 %3586, %v2022_v49  }
 0x772   :  { %3271 = vmatmul.mubr.bf16.gmra.mxu0 %v3590_v47 }
 0x773   :  { %3274 = vmatprep.mubr.bf16.mxu0 %v3591_v40  ;;  %2057 = vperm.xlu0 %3585, %v2023_v3  }
 0x774   :  { %2062 = vperm.xlu1 %3586, %v2024_v31  }
 0x777   :  { %2067 = vperm.xlu0 %3585, %v2025_v59  }
 0x778   :  { %2072 = vperm.xlu1 %3586, %v2026_v6  }
 0x77a   :  { %3275 = vmatmul.mubr.bf16.gmra.mxu0 %v3592_v51 }
 0x77b   :  { %3278 = vmatprep.mubr.bf16.mxu0 %v3593_v48  ;;  %2077 = vperm.xlu0 %3585, %v2027_v26  }
 0x77c   :  { %2082 = vperm.xlu1 %3586, %v2028_v39  }
 0x77f   :  { %2087 = vperm.xlu0 %3585, %v2029_v8  }
 0x780   :  { %2092 = vperm.xlu1 %3586, %v2030_v25  }
 0x782   :  { %3279 = vmatmul.mubr.bf16.gmra.mxu0 %v3594_v29 }
 0x783   :  { %2097 = vperm.xlu0 %3585, %v2031_v0  }
 0x784   :  { %2102 = vperm.xlu1 %3586, %v2032_v20  }
 0x787   :  { %2107 = vperm.xlu0 %3585, %v2033_v24  }
 0x788   :  { %2112 = vperm.xlu1 %3586, %v2034_v16  }
 0x7c6   :  { %v1699_v27 = vpop.permute.xlu0 %1698 }
 0x7c7   :  { %v1689_v9 = vpop.permute.xlu1 %1688 }
 0x7ca   :  { %v1704_v14 = vpop.permute.xlu0 %1703 }
 0x7cb   :  { %v4655_v62 = vpop.permute.xlu1 %1693 }
 0x7ce   :  { %v1679_v63 = vpop.permute.xlu0 %1678 }
 0x7cf   :  { %v1684_v32 = vpop.permute.xlu1 %1683 }
 0x7d2   :  { %v1669_v54 = vpop.permute.xlu0 %1668 }
 0x7d3   :  { %v1674_v22 = vpop.permute.xlu1 %1673 }
 0x7d6   :  { %v1659_v36 = vpop.permute.xlu0 %1658 }
 0x7d7   :  { %v1664_v53 = vpop.permute.xlu1 %1663 }
 0x7da   :  { %v1649_v43 = vpop.permute.xlu0 %1648 }
 0x7db   :  { %v1654_v5 = vpop.permute.xlu1 %1653 }
 0x7de   :  { %v1639_v35 = vpop.permute.xlu0 %1638 }
 0x7df   :  { %v1644_v37 = vpop.permute.xlu1 %1643 }
 0x7e2   :  { %v1629_v59 = vpop.permute.xlu0 %1628 }
 0x7e3   :  { %v1634_v8 = vpop.permute.xlu1 %1633 }
 0x82a   :  { %v3268_v10 = vpop.f32.mrf.mxu0 }
 0x82b   :  { %v4663_v56 = vadd.f32 %v3268_v10, %v1639_v35 }
 0x82c   :  { %v1788_v12 = vpop.f32.mrf.mxu0 }
 0x82d   :  { %v4680_v25 = vmul.f32 %v4663_v56, %v4663_v56  ;;  %v4684_v24 = vadd.f32 %v1788_v12, %v1629_v59 }
 0x82e   :  { %v3269_v50 = vpop.f32.mrf.mxu0 }
 0x82f   :  { %v4659_v18 = vadd.f32 %v3269_v50, %v1644_v37 }
 0x830   :  { %v1791_v23 = vpop.f32.mrf.mxu0 }
 0x831   :  { %v1854_v31 = vmul.f32 %v4659_v18, %v4659_v18  ;;  %v4686_v16 = vadd.f32 %v1791_v23, %v1634_v8 }
 0x832   :  { %v3272_v19 = vpop.f32.mrf.mxu0 }
 0x833   :  { %v4671_v6 = vadd.f32 %v3272_v19, %v1659_v36 }
 0x834   :  { %v1804_v30 = vpop.f32.mrf.mxu0 }
 0x835   :  { %v1857_v12 = vmul.f32 %v4671_v6, %v4671_v6  ;;  %v4704_v19 = vadd.f32 %v1804_v30, %v1649_v43 }
 0x836   :  { %v3273_v11 = vpop.f32.mrf.mxu0 }
 0x837   :  { %v4673_v29 = vadd.f32 %v3273_v11, %v1664_v53 }
 0x838   :  { %v1807_v4 = vpop.f32.mrf.mxu0 }
 0x839   :  { %v1858_v36 = vmul.f32 %v4673_v29, %v4673_v29 }
 0x83a   :  { %v3276_v17 = vpop.f32.mrf.mxu0 }
 0x83b   :  { %v4657_v47 = vadd.f32 %v3276_v17, %v1679_v63  ;;  %v1852_v17 = vmul.f32 %v4686_v16, %v4686_v16 }
 0x83c   :  { %v1820_v1 = vpop.f32.mrf.mxu0 }
 0x83d   :  { %v1861_v40 = vmul.f32 %v4657_v47, %v4657_v47  ;;  %v4665_v51 = vadd.f32 %v1820_v1, %v1669_v54  ;;  %v4694_v54 = vadd.f32 %v1807_v4, %v1654_v5 }
 0x83e   :  { %v3277_v49 = vpop.f32.mrf.mxu0 }
 0x83f   :  { %v4667_v3 = vadd.f32 %v3277_v49, %v1684_v32  ;;  %v1877_v26 = vmul.f32 %v1861_v40, %v4657_v47  ;;  %v1859_v57 = vmul.f32 %v4665_v51, %v4665_v51  ;;  %v4692_v32 = vmul.f32 %v1854_v31, %v4659_v18 }
 0x840   :  { %v1823_v48 = vpop.f32.mrf.mxu0  ;;  %v1856_v30 = vmul.f32 %v4694_v54, %v4694_v54  ;;  %v1874_v31 = vmul.f32 %v1858_v36, %v4673_v29 }
 0x841   :  { %v1862_v39 = vmul.f32 %v4667_v3, %v4667_v3  ;;  %v4682_v0 = vadd.f32 %v1823_v48, %v1674_v22  ;;  %v1893_v53 = vmul.f32 0.044715, %v1877_v26  ;;  %v1875_v35 = vmul.f32 %v1859_v57, %v4665_v51 }
 0x842   :  { %v3280_v20 = vpop.f32.mrf.mxu0  ;;  %v1873_v26 = vmul.f32 %v1857_v12, %v4671_v6  ;;  %v1872_v36 = vmul.f32 %v1856_v30, %v4694_v54 }
 0x843   :  { %v1878_v63 = vmul.f32 %v1862_v39, %v4667_v3  ;;  %v1860_v10 = vmul.f32 %v4682_v0, %v4682_v0  ;;  %v4698_v22 = vadd.f32 %v3280_v20, %v1699_v27  ;;  %v1909_v48 = vadd.f32 %v1893_v53, %v4657_v47 }
 0x844   :  { %v1836_v50 = vpop.f32.mrf.mxu0  ;;  %v1855_v39 = vmul.f32 %v4704_v19, %v4704_v19  ;;  %v1891_v57 = vmul.f32 0.044715, %v1875_v35 }
 0x845   :  { %v1894_v23 = vmul.f32 0.044715, %v1878_v63  ;;  %v1876_v11 = vmul.f32 %v1860_v10, %v4682_v0  ;;  %v1865_v5 = vmul.f32 %v4698_v22, %v4698_v22  ;;  %v4709_v4 = vadd.f32 %v1836_v50, %v1689_v9 }
 0x846   :  { %v3281_v27 = vpop.f32.mrf.mxu0  ;;  %v1871_v35 = vmul.f32 %v1855_v39, %v4704_v19  ;;  %v1869_v39 = vmul.f32 %v4680_v25, %v4663_v56 }
 0x847   :  { %v1910_v37 = vadd.f32 %v1894_v23, %v4667_v3  ;;  %v4715_v1 = vadd.f32 %v3281_v27, %v1704_v14  ;;  %v1892_v43 = vmul.f32 0.044715, %v1876_v11  ;;  %v1881_v40 = vmul.f32 %v1865_v5, %v4698_v22 }
 0x848   :  { %v1863_v9 = vmul.f32 %v4709_v4, %v4709_v4  ;;  %v1839_v49 = vpop.f32.mrf.mxu0  ;;  %v1890_v23 = vmul.f32 0.044715, %v1874_v31  ;;  %v1925_v11 = vmul.f32 0.7978846, %v1909_v48 }
 0x849   :  { %v1866_v59 = vmul.f32 %v4715_v1, %v4715_v1  ;;  %v4727_v14 = vadd.f32 %v1839_v49, %v4655_v62  ;;  %v1897_v8 = vmul.f32 0.044715, %v1881_v40  ;;  %v1926_v63 = vmul.f32 0.7978846, %v1910_v37 }
 0x84a   :  { %v1879_v20 = vmul.f32 %v1863_v9, %v4709_v4  ;;  %v1908_v62 = vadd.f32 %v1892_v43, %v4682_v0  ;;  %v1889_v40 = vmul.f32 0.044715, %v1873_v26  ;;  %v1907_v49 = vadd.f32 %v1891_v57, %v4665_v51 }
 0x84b   :  { %v1882_v10 = vmul.f32 %v1866_v59, %v4715_v1  ;;  %v1864_v50 = vmul.f32 %v4727_v14, %v4727_v14  ;;  %v1913_v53 = vadd.f32 %v1897_v8, %v4698_v22  ;;  %3603 = vtanh.f32 %v1926_v63 }
 0x84c   :  { %v1895_v12 = vmul.f32 0.044715, %v1879_v20  ;;  %v1888_v59 = vmul.f32 0.044715, %v1872_v36  ;;  %v1924_v8 = vmul.f32 0.7978846, %v1908_v62  ;;  %v1906_v31 = vadd.f32 %v1890_v23, %v4673_v29 }
 0x84d   :  { %v1898_v5 = vmul.f32 0.044715, %v1882_v10  ;;  %v1880_v27 = vmul.f32 %v1864_v50, %v4727_v14  ;;  %v1929_v37 = vmul.f32 0.7978846, %v1913_v53  ;;  %v1851_v57 = vmul.f32 %v4684_v24, %v4684_v24 }
 0x84e   :  { %v1911_v9 = vadd.f32 %v1895_v12, %v4709_v4  ;;  %v1905_v63 = vadd.f32 %v1889_v40, %v4671_v6  ;;  %v1887_v10 = vmul.f32 0.044715, %v1871_v35  ;;  %v1923_v50 = vmul.f32 0.7978846, %v1907_v49 }
 0x84f   :  { %v1914_v30 = vadd.f32 %v1898_v5, %v4715_v1  ;;  %v1896_v43 = vmul.f32 0.044715, %v1880_v27  ;;  %3605 = vtanh.f32 %v1929_v37  ;;  %v1868_v62 = vmul.f32 %v1852_v17, %v4686_v16 }
 0x850   :  { %v1927_v20 = vmul.f32 0.7978846, %v1911_v9  ;;  %3607 = vtanh.f32 %v1925_v11  ;;  %v1886_v53 = vmul.f32 0.044715, %v4692_v32  ;;  %v1922_v12 = vmul.f32 0.7978846, %v1906_v31 }
 0x851   :  { %v1930_v48 = vmul.f32 0.7978846, %v1914_v30  ;;  %v1912_v26 = vadd.f32 %v1896_v43, %v4727_v14  ;;  %v1904_v23 = vadd.f32 %v1888_v59, %v4694_v54  ;;  %v1867_v25 = vmul.f32 %v1851_v57, %v4684_v24 }
 0x852   :  { %3609 = vtanh.f32 %v1927_v20  ;;  %v1885_v11 = vmul.f32 0.044715, %v1869_v39  ;;  %v1921_v5 = vmul.f32 0.7978846, %v1905_v63  ;;  %v1903_v27 = vadd.f32 %v1887_v10, %v4704_v19 }
 0x853   :  { %v1928_v36 = vmul.f32 0.7978846, %v1912_v26  ;;  %3611 = vtanh.f32 %v1930_v48  ;;  %v1884_v40 = vmul.f32 0.044715, %v1868_v62  ;;  %v1902_v35 = vadd.f32 %v1886_v53, %v4659_v18 }
 0x854   :  { %3613 = vtanh.f32 %v1924_v8  ;;  %v1920_v37 = vmul.f32 0.7978846, %v1904_v23  ;;  %v1883_v17 = vmul.f32 0.044715, %v1867_v25  ;;  %v1901_v9 = vadd.f32 %v1885_v11, %v4663_v56 }
 0x855   :  { %3615 = vtanh.f32 %v1928_v36  ;;  %v1919_v32 = vmul.f32 0.7978846, %v1903_v27  ;;  %v1900_v30 = vadd.f32 %v1884_v40, %v4686_v16  ;;  %v1918_v59 = vmul.f32 0.7978846, %v1902_v35 }
 0x856   :  { %3617 = vtanh.f32 %v1923_v50  ;;  %v1899_v20 = vadd.f32 %v1883_v17, %v4684_v24  ;;  %v1917_v26 = vmul.f32 0.7978846, %v1901_v9 }
 0x857   :  { %3619 = vtanh.f32 %v1922_v12  ;;  %v1916_v57 = vmul.f32 0.7978846, %v1900_v30 }
 0x858   :  { %3621 = vtanh.f32 %v1921_v5  ;;  %v3604_v49 = vpop.eup %3603  ;;  %v1915_v12 = vmul.f32 0.7978846, %v1899_v20 }
 0x859   :  { %3623 = vtanh.f32 %v1920_v37  ;;  %v1958_v10 = vadd.f32 1.0, %v3604_v49 }
 0x85a   :  { %3625 = vtanh.f32 %v1919_v32 }
 0x85b   :  { %3627 = vtanh.f32 %v1918_v59  ;;  %v1974_v40 = vmul.f32 0.5, %v1958_v10 }
 0x85c   :  { %v3606_v43 = vpop.eup %3605  ;;  %3629 = vtanh.f32 %v1917_v26 }
 0x85d   :  { %v3608_v8 = vpop.eup %3607  ;;  %v1961_v31 = vadd.f32 1.0, %v3606_v43  ;;  %3631 = vtanh.f32 %v1916_v57 }
 0x85e   :  { %v1957_v23 = vadd.f32 1.0, %v3608_v8  ;;  %3633 = vtanh.f32 %v1915_v12 }
 0x85f   :  { %v3610_v48 = vpop.eup %3609  ;;  %v1977_v62 = vmul.f32 0.5, %v1961_v31 }
 0x860   :  { %v3612_v39 = vpop.eup %3611  ;;  %v1959_v63 = vadd.f32 1.0, %v3610_v48  ;;  %v1973_v49 = vmul.f32 0.5, %v1957_v23  ;;  %v1990_v48 = vmul.f32 %v1974_v40, %v4667_v3 }
 0x861   :  { %v3614_v50 = vpop.eup %3613  ;;  %v1962_v36 = vadd.f32 1.0, %v3612_v39  ;;  %v1993_v35 = vmul.f32 %v1977_v62, %v4698_v22 }
 0x862   :  { %v3616_v53 = vpop.eup %3615  ;;  %v1975_v5 = vmul.f32 0.5, %v1959_v63  ;;  %v1956_v9 = vadd.f32 1.0, %v3614_v50 }
 0x863   :  { %v1978_v25 = vmul.f32 0.5, %v1962_v36  ;;  %v1960_v11 = vadd.f32 1.0, %v3616_v53  ;;  %v3618_v27 = vpop.eup %3617 }
 0x864   :  { %v3620_v32 = vpop.eup %3619  ;;  %v1991_v43 = vmul.f32 %v1975_v5, %v4709_v4  ;;  %v1955_v8 = vadd.f32 1.0, %v3618_v27  ;;  %v1972_v26 = vmul.f32 0.5, %v1956_v9 }
 0x865   :  { %v1994_v37 = vmul.f32 %v1978_v25, %v4715_v1  ;;  %v1976_v17 = vmul.f32 0.5, %v1960_v11  ;;  %v3622_v20 = vpop.eup %3621  ;;  %v1954_v22 = vadd.f32 1.0, %v3620_v32  ;;  %v1989_v1 = vmul.f32 %v1973_v49, %v4657_v47 }
 0x866   :  { %v3624_v39 = vpop.eup %3623  ;;  %v1971_v57 = vmul.f32 0.5, %v1955_v8  ;;  %v1953_v63 = vadd.f32 1.0, %v3622_v20  ;;  %v1988_v4 = vmul.f32 %v1972_v26, %v4682_v0 }
 0x867   :  { %v2018_v30 = vpack.c.bf16 %v1994_v37, %v1993_v35  ;;  %v1992_v59 = vmul.f32 %v1976_v17, %v4727_v14  ;;  %v3626_v10 = vpop.eup %3625  ;;  %v2016_v50 = vpack.c.bf16 %v1990_v48, %v1989_v1  ;;  %v1970_v14 = vmul.f32 0.5, %v1954_v22  ;;  %v3597_v22 = vld [vmem:[#allocation9 + $0x10] sm:$0xff]  }
 0x868   :  { %v1952_v36 = vadd.f32 1.0, %v3624_v39  ;;  %v3628_v62 = vpop.eup %3627  ;;  %v1987_v3 = vmul.f32 %v1971_v57, %v4665_v51  ;;  %v1969_v53 = vmul.f32 0.5, %v1953_v63  ;;  %v1951_v12 = vadd.f32 1.0, %v3626_v10  ;;  %v3599_v39 = vld [vmem:[#allocation9 + $0x20] sm:$0xff]   ;;  %v3601_v1 = vld [vmem:[#allocation9 + $0x30] sm:$0xff]   ;;  %v2038_v57 = vpop.permute.xlu0 %2037 }
 0x869   :  { %3282 = vmatprep.subr.bf16.mxu1 %v2018_v30  ;;  %v2017_v31 = vpack.c.bf16 %v1992_v59, %v1991_v43  ;;  %v3630_v23 = vpop.eup %3629  ;;  %v1986_v47 = vmul.f32 %v1970_v14, %v4673_v29  ;;  %v1950_v27 = vadd.f32 1.0, %v3628_v62 }
 0x86a   :  { %3283 = vmatpush3.bf16.msra.mxu1 %v2018_v30  ;;  %v3632_v25 = vpop.eup %3631  ;;  %v2015_v11 = vpack.c.bf16 %v1988_v4, %v1987_v3  ;;  %v1968_v5 = vmul.f32 0.5, %v1952_v36  ;;  %v1985_v0 = vmul.f32 %v1969_v53, %v4671_v6  ;;  %v1967_v35 = vmul.f32 0.5, %v1951_v12 }
 0x86b   :  { %3284 = vmatprep.subr.bf16.mxu1 %v2017_v31  ;;  %v3634_v40 = vpop.eup %3633  ;;  %v1949_v37 = vadd.f32 1.0, %v3630_v23  ;;  %v1966_v51 = vmul.f32 0.5, %v1950_v27  ;;  %v1948_v32 = vadd.f32 1.0, %v3632_v25  ;;  %v3754_v4 = vmov 0.0  }
 0x86c   :  { %v2014_v17 = vpack.c.bf16 %v1986_v47, %v1985_v0  ;;  %v1984_v9 = vmul.f32 %v1968_v5, %v4694_v54  ;;  %v1983_v49 = vmul.f32 %v1967_v35, %v4704_v19  ;;  %v1947_v29 = vadd.f32 1.0, %v3634_v40  ;;  %v3596_v19 = vld [vmem:[#allocation9 + $0x8] sm:$0xff]   ;;  %v2048_v63 = vpop.permute.xlu0 %2047 }
 0x86d   :  { %v1965_v30 = vmul.f32 0.5, %v1949_v37  ;;  %v1982_v59 = vmul.f32 %v1966_v51, %v4659_v18  ;;  %v1964_v8 = vmul.f32 0.5, %v1948_v32  ;;  %v3598_v18 = vld [vmem:[#allocation9 + $0x18] sm:$0xff]   ;;  %v2875_v14 = vsel %vm2260_vm3, 1.0, %v3754_v4 }
 0x86e   :  { %3285 = vmatpush3.bf16.msra.mxu1 %v2017_v31  ;;  %v2013_v43 = vpack.c.bf16 %v1984_v9, %v1983_v49  ;;  %v1963_v20 = vmul.f32 0.5, %v1947_v29  ;;  %v2263_v53 = vmul.f32 %v2875_v14, %v4472_v42 }
 0x86f   :  { %3286 = vmatprep.subr.bf16.mxu1 %v2016_v50  ;;  %v1981_v6 = vmul.f32 %v1965_v30, %v4663_v56  ;;  %v1980_v54 = vmul.f32 %v1964_v8, %v4686_v16  ;;  %v3600_v56 = vld [vmem:[#allocation9 + $0x28] sm:$0xff]   ;;  %v3602_v16 = vld [vmem:[#allocation9 + $0x38] sm:$0xff]  }
 0x870   :  { %v1979_v48 = vmul.f32 %v1963_v20, %v4684_v24  ;;  %v2043_v24 = vpop.permute.xlu1 %2042  ;;  %v4780_v27 = vrot.slane %v2263_v53, %v3853_v2 }
 0x871   :  { %v2012_v31 = vpack.c.bf16 %v1982_v59, %v1981_v6 }
 0x872   :  { %3287 = vmatpush3.bf16.msra.mxu1 %v2016_v50  ;;  %v2011_v26 = vpack.c.bf16 %v1980_v54, %v1979_v48  ;;  %v2058_v50 = vpop.permute.xlu0 %2057 }
 0x873   :  { %3288 = vmatprep.subr.bf16.mxu1 %v2015_v11 }
 0x874   :  { %v2053_v10 = vpop.permute.xlu1 %2052 }
 0x876   :  { %3289 = vmatpush3.bf16.msra.mxu1 %v2015_v11  ;;  %v2068_v62 = vpop.permute.xlu0 %2067 }
 0x877   :  { %3290 = vmatprep.subr.bf16.mxu1 %v2014_v17 }
 0x878   :  { %v2063_v36 = vpop.permute.xlu1 %2062 }
 0x87a   :  { %3291 = vmatpush3.bf16.msra.mxu1 %v2014_v17  ;;  %v2078_v0 = vpop.permute.xlu0 %2077 }
 0x87b   :  { %3292 = vmatprep.subr.bf16.mxu1 %v2013_v43 }
 0x87c   :  { %v2073_v11 = vpop.permute.xlu1 %2072 }
 0x87e   :  { %3293 = vmatpush3.bf16.msra.mxu1 %v2013_v43  ;;  %v2088_v8 = vpop.permute.xlu0 %2087 }
 0x87f   :  { %3294 = vmatprep.subr.bf16.mxu1 %v2012_v31 }
 0x880   :  { %v2083_v30 = vpop.permute.xlu1 %2082 }
 0x882   :  { %3295 = vmatpush3.bf16.msra.mxu1 %v2012_v31 }
 0x883   :  { %3296 = vmatprep.subr.bf16.mxu1 %v2011_v26 }
 0x886   :  { %3297 = vmatpush3.bf16.msra.mxu1 %v2011_v26 }
 0x889   :  { %3299 = vmatmul.mubr.bf16.vlgmr.msra.gmra.mxu1 %v3596_v19  ;;  %v2093_v19 = vpop.permute.xlu1 %2092 }
 0x88a   :  { %3302 = vmatprep.mubr.bf16.mxu1 %v3597_v22 }
 0x88d   :  { %v2103_v53 = vpop.permute.xlu1 %2102 }
 0x891   :  { %3303 = vmatmul.mubr.bf16.gmra.mxu1 %v3598_v18 }
 0x892   :  { %3306 = vmatprep.mubr.bf16.mxu1 %v3599_v39 }
 0x899   :  { %3307 = vmatmul.mubr.bf16.gmra.mxu1 %v3600_v56 }
 0x89a   :  { %3310 = vmatprep.mubr.bf16.mxu1 %v3601_v1 }
 0x8a1   :  { %3311 = vmatmul.mubr.bf16.gmra.mxu1 %v3602_v16 }
 0x949   :  { %v3300_v3 = vpop.f32.mrf.mxu1 }
 0x94a   :  { %v2206_v12 = vadd.f32 %v3300_v3, %v2048_v63 }
 0x94b   :  { %v2197_v23 = vpop.f32.mrf.mxu1 }
 0x94c   :  { %v2198_v25 = vadd.f32 %v2197_v23, %v2038_v57  ;;  %v2267_v47 = vsub.f32 %v2206_v12, %v4492_v38  ;;  %v2098_v57 = vpop.permute.xlu0 %2097 }
 0x94d   :  { %v3301_v5 = vpop.f32.mrf.mxu1 }
 0x94e   :  { %v2265_v40 = vsub.f32 %v2198_v25, %v4481_v34  ;;  %v2209_v7 = vadd.f32 %v3301_v5, %v2053_v10  ;;  %v2289_v51 = vmul.f32 %v4780_v27, %v2267_v47 }
 0x94f   :  { %v2200_v35 = vpop.f32.mrf.mxu1 }
 0x950   :  { %v2201_v37 = vadd.f32 %v2200_v35, %v2043_v24  ;;  %v2287_v17 = vmul.f32 %v4780_v27, %v2265_v40  ;;  %v2268_v42 = vsub.f32 %v2209_v7, %v4487_v58  ;;  %v2309_v58 = vsel %vm364_vm0, %v2289_v51, 0.0  ;;  %v2108_v23 = vpop.permute.xlu0 %2107 }
 0x951   :  { %v3304_v9 = vpop.f32.mrf.mxu1 }
 0x952   :  { %v2266_v32 = vsub.f32 %v2201_v37, %v4476_v60  ;;  %v2222_v38 = vadd.f32 %v3304_v9, %v2068_v62  ;;  %v2303_v49 = vsel %vm364_vm0, %v2287_v17, 0.0  ;;  %v2290_v20 = vmul.f32 %v4780_v27, %v2268_v42  ;;  %v2113_v42 = vpop.permute.xlu1 %2112 }
 0x953   :  { %v2213_v29 = vpop.f32.mrf.mxu1  ;;  %2304 = vadd.xlane.f32.xlu0 %v2303_v49 }
 0x954   :  { %v2271_v34 = vsub.f32 %v2222_v38, %v4520_v45  ;;  %v2214_v43 = vadd.f32 %v2213_v29, %v2058_v50  ;;  %v2288_v59 = vmul.f32 %v4780_v27, %v2266_v32  ;;  %v2312_v16 = vsel %vm364_vm0, %v2290_v20, 0.0 }
 0x955   :  { %v3305_v6 = vpop.f32.mrf.mxu1 }
 0x956   :  { %v2269_v31 = vsub.f32 %v2214_v43, %v4503_v21  ;;  %v2225_v60 = vadd.f32 %v3305_v6, %v2073_v11  ;;  %v2306_v54 = vsel %vm364_vm0, %v2288_v59, 0.0  ;;  %v2293_v48 = vmul.f32 %v4780_v27, %v2271_v34 }
 0x957   :  { %v2216_v26 = vpop.f32.mrf.mxu1  ;;  %2307 = vadd.xlane.f32.xlu1 %v2306_v54  ;;  %2310 = vadd.xlane.f32.xlu0 %v2309_v58 }
 0x958   :  { %v2217_v45 = vadd.f32 %v2216_v26, %v2063_v36  ;;  %v2272_v22 = vsub.f32 %v2225_v60, %v4510_v15  ;;  %v2291_v39 = vmul.f32 %v4780_v27, %v2269_v31  ;;  %v2321_v21 = vsel %vm364_vm0, %v2293_v48, 0.0 }
 0x959   :  { %v3308_v18 = vpop.f32.mrf.mxu1 }
 0x95a   :  { %v2270_v56 = vsub.f32 %v2217_v45, %v4499_v44  ;;  %v2238_v1 = vadd.f32 %v3308_v18, %v2088_v8  ;;  %v2315_v4 = vsel %vm364_vm0, %v2291_v39, 0.0  ;;  %v2294_v14 = vmul.f32 %v4780_v27, %v2272_v22 }
 0x95b   :  { %v2229_v24 = vpop.f32.mrf.mxu1  ;;  %2322 = vadd.xlane.f32.xlu1 %v2321_v21  ;;  %2313 = vadd.xlane.f32.xlu0 %v2312_v16 }
 0x95c   :  { %v2275_v63 = vsub.f32 %v2238_v1, %v4494_v41  ;;  %v2230_v10 = vadd.f32 %v2229_v24, %v2078_v0  ;;  %v2292_v50 = vmul.f32 %v4780_v27, %v2270_v56  ;;  %v2324_v7 = vsel %vm364_vm0, %v2294_v14, 0.0 }
 0x95d   :  { %v3309_v15 = vpop.f32.mrf.mxu1 }
 0x95e   :  { %v2273_v44 = vsub.f32 %v2230_v10, %v4483_v46  ;;  %v2241_v36 = vadd.f32 %v3309_v15, %v2093_v19  ;;  %v2318_v62 = vsel %vm364_vm0, %v2292_v50, 0.0  ;;  %v2297_v3 = vmul.f32 %v4780_v27, %v2275_v63 }
 0x95f   :  { %v2232_v12 = vpop.f32.mrf.mxu1  ;;  %2316 = vadd.xlane.f32.xlu1 %v2315_v4  ;;  %2319 = vadd.xlane.f32.xlu0 %v2318_v62 }
 0x960   :  { %v2233_v41 = vadd.f32 %v2232_v12, %v2083_v30  ;;  %v2276_v25 = vsub.f32 %v2241_v36, %v4489_v28  ;;  %v2295_v47 = vmul.f32 %v4780_v27, %v2273_v44  ;;  %v2333_v46 = vsel %vm364_vm0, %v2297_v3, 0.0 }
 0x961   :  { %v3312_v11 = vpop.f32.mrf.mxu1 }
 0x962   :  { %v2274_v5 = vsub.f32 %v2233_v41, %v4478_v61  ;;  %v2254_v40 = vadd.f32 %v3312_v11, %v2108_v23  ;;  %v2327_v9 = vsel %vm364_vm0, %v2295_v47, 0.0  ;;  %v2298_v51 = vmul.f32 %v4780_v27, %v2276_v25 }
 0x963   :  { %v2245_v0 = vpop.f32.mrf.mxu1  ;;  %2334 = vadd.xlane.f32.xlu1 %v2333_v46  ;;  %2325 = vadd.xlane.f32.xlu0 %v2324_v7 }
 0x964   :  { %v2279_v35 = vsub.f32 %v2254_v40, %v4528_v33  ;;  %v2246_v37 = vadd.f32 %v2245_v0, %v2098_v57  ;;  %v2296_v17 = vmul.f32 %v4780_v27, %v2274_v5  ;;  %v2336_v29 = vsel %vm364_vm0, %v2298_v51, 0.0  ;;  %v2264_v57 = vld [vmem:[#allocation2 + $0x1] sm:$0x1] }
 0x965   :  { %v3313_v28 = vpop.f32.mrf.mxu1 }
 0x966   :  { %v2277_v61 = vsub.f32 %v2246_v37, %v4514_v13  ;;  %v2257_v32 = vadd.f32 %v3313_v28, %v2113_v42  ;;  %v2330_v38 = vsel %vm364_vm0, %v2296_v17, 0.0  ;;  %v2301_v49 = vmul.f32 %v4780_v27, %v2279_v35 }
 0x967   :  { %v2248_v30 = vpop.f32.mrf.mxu1  ;;  %2328 = vadd.xlane.f32.xlu1 %v2327_v9  ;;  %2331 = vadd.xlane.f32.xlu0 %v2330_v38 }
 0x968   :  { %v2249_v33 = vadd.f32 %v2248_v30, %v2103_v53  ;;  %v2280_v34 = vsub.f32 %v2257_v32, %v4522_v55  ;;  %v2345_v59 = vsel %vm364_vm0, %v2301_v49, 0.0  ;;  %v2299_v8 = vmul.f32 %v4780_v27, %v2277_v61 }
 0x96a   :  { %v2278_v43 = vsub.f32 %v2249_v33, %v4505_v52  ;;  %v2339_v6 = vsel %vm364_vm0, %v2299_v8, 0.0  ;;  %v2302_v20 = vmul.f32 %v4780_v27, %v2280_v34 }
 0x96b   :  { %2346 = vadd.xlane.f32.xlu1 %v2345_v59  ;;  %2337 = vadd.xlane.f32.xlu0 %v2336_v29 }
 0x96c   :  { %v2300_v13 = vmul.f32 %v4780_v27, %v2278_v43  ;;  %v2348_v55 = vsel %vm364_vm0, %v2302_v20, 0.0 }
 0x96e   :  { %v2342_v58 = vsel %vm364_vm0, %v2300_v13, 0.0 }
 0x96f   :  { %2340 = vadd.xlane.f32.xlu1 %v2339_v6  ;;  %2343 = vadd.xlane.f32.xlu0 %v2342_v58 }
 0x973   :  { %2349 = vadd.xlane.f32.xlu0 %v2348_v55 }
 0x9dc   :  { %v2305_v52 = vpop.xlane.xlu0 %2304 }
 0x9dd   :  { %2351 = vxpose.xlu1.b32.start [1/16] (narrow) %v2305_v52, 8 }
 0x9e0   :  { %v2308_v31 = vpop.xlane.xlu1 %2307  ;;  %v2311_v60 = vpop.xlane.xlu0 %2310 }
 0x9e1   :  { %2352 = vxpose.xlu1.b32.cont [2/16] (narrow) %v2308_v31, 8 }
 0x9e4   :  { %v2323_v54 = vpop.xlane.xlu1 %2322  ;;  %v2314_v48 = vpop.xlane.xlu0 %2313 }
 0x9e5   :  { %2353 = vxpose.xlu1.b32.cont [3/16] (narrow) %v2311_v60, 8 }
 0x9e8   :  { %v2317_v26 = vpop.xlane.xlu1 %2316  ;;  %v2320_v45 = vpop.xlane.xlu0 %2319 }
 0x9e9   :  { %2354 = vxpose.xlu1.b32.cont [4/16] (narrow) %v2314_v48, 8 }
 0x9ec   :  { %v2335_v27 = vpop.xlane.xlu1 %2334  ;;  %v2326_v19 = vpop.xlane.xlu0 %2325 }
 0x9ed   :  { %2355 = vxpose.xlu1.b32.cont [5/16] (narrow) %v2317_v26, 8 }
 0x9f0   :  { %v2329_v22 = vpop.xlane.xlu1 %2328  ;;  %v2332_v18 = vpop.xlane.xlu0 %2331 }
 0x9f1   :  { %2356 = vxpose.xlu1.b32.cont [6/16] (narrow) %v2320_v45, 8 }
 0x9f4   :  { %v2347_v39 = vpop.xlane.xlu1 %2346  ;;  %v2338_v56 = vpop.xlane.xlu0 %2337 }
 0x9f5   :  { %2357 = vxpose.xlu1.b32.cont [7/16] (narrow) %v2323_v54, 8 }
 0x9f8   :  { %v2341_v1 = vpop.xlane.xlu1 %2340  ;;  %v2344_v21 = vpop.xlane.xlu0 %2343 }
 0x9f9   :  { %2358 = vxpose.xlu1.b32.cont [8/16] (narrow) %v2326_v19, 8 }
 0x9fc   :  { %v2350_v16 = vpop.xlane.xlu0 %2349 }
 0x9fd   :  { %2359 = vxpose.xlu1.b32.cont [9/16] (narrow) %v2329_v22, 8 }
 0xa01   :  { %2360 = vxpose.xlu1.b32.cont [10/16] (narrow) %v2332_v18, 8 }
 0xa05   :  { %2361 = vxpose.xlu1.b32.cont [11/16] (narrow) %v2335_v27, 8 }
 0xa09   :  { %2362 = vxpose.xlu1.b32.cont [12/16] (narrow) %v2338_v56, 8 }
 0xa0d   :  { %2363 = vxpose.xlu1.b32.cont [13/16] (narrow) %v2341_v1, 8 }
 0xa11   :  { %2364 = vxpose.xlu1.b32.cont [14/16] (narrow) %v2344_v21, 8 }
 0xa15   :  { %2365 = vxpose.xlu1.b32.cont [15/16] (narrow) %v2347_v39, 8 }
 0xa19   :  { %2366 = vxpose.xlu1.b32.end [16/16] (narrow) %v2350_v16, 8 }
 0xa59   :  { %v2367_v24 = vpop.trf.xlu1 }
 0xa5a   :  { %v2383_v63 = vadd.f32 %v2367_v24, %v2264_v57 }
 0xa5c   :  { %2384 = vst [vmem:[#allocation2 + $0x1] sm:$0x1] %v2383_v63 }
 0xa5d PF:  { %v2389_v10 = vld [vmem:[%s5074_s3] sm:$0x1]  ;;  %v5138_v50 = vmov 0.0   ;;  %v3755_v4 = vmov 0   ;;  %v4837_v14 = vld [vmem:[#allocation10 + $0x70] sm:$0xff]  ;;  %v4840_v44 = vld [vmem:[#allocation10 + $0x68] sm:$0xff] }
 0xa5e   :  { %3314 = vmatprep.subr.mxu0 %v5138_v50  ;;  %v4833_v15 = vld [vmem:[#allocation10 + $0x78] sm:$0xff]  ;;  %3349 = vmatprep.subr.mxu1 %v5138_v50  ;;  %vm3756_vm0 = vmmov 0   ;;  %v4849_v62 = vld [vmem:[#allocation10 + $0x60] sm:$0xff]  ;;  %v4859_v53 = vld [vmem:[#allocation10 + $0x50] sm:$0xff] }
 0xa5f   :  { %3635 = vset.pattern.permute.xlu0 %v3755_v4  ;;  %3315 = vmatpush3.msra.mxu0 %v4833_v15  ;;  %v2876_v36 = vld [vmem:[%s5074_s3 + $0x1] sm:$0x1]  ;;  %v4863_v12 = vld [vmem:[#allocation10 + $0x48] sm:$0xff]  ;;  %v4867_v41 = vld [vmem:[#allocation10 + $0x40] sm:$0xff] }
 0xa60   :  { %2392 = vperm.xlu0 %3635, %v2389_v10   ;;  %3316 = vmatprep.subr.mxu0 %v5138_v50  ;;  %v4855_v3 = vld [vmem:[#allocation10 + $0x58] sm:$0xff]  ;;  %v4875_v25 = vld [vmem:[#allocation10 + $0x30] sm:$0xff]  ;;  %v4879_v11 = vld [vmem:[#allocation10 + $0x28] sm:$0xff] }
 0xa61   :  { %3317 = vmatpush3.msra.mxu0 %v4837_v14  ;;  %3346 = vmatprep.mubr.msk.f32.mxu0 %vm3756_vm0, %v5138_v50  ;;  %v4871_v23 = vld [vmem:[#allocation10 + $0x38] sm:$0xff]  ;;  %v4883_v47 = vld [vmem:[#allocation10 + $0x20] sm:$0xff]  ;;  %v4891_v40 = vld [vmem:[#allocation10 + $0x10] sm:$0xff] }
 0xa62   :  { %3318 = vmatprep.subr.mxu0 %v5138_v50  ;;  %3381 = vmatprep.mubr.msk.f32.mxu1 %vm3756_vm0, %v5138_v50  ;;  %v4887_v5 = vld [vmem:[#allocation10 + $0x18] sm:$0xff]  ;;  %v4895_v46 = vld [vmem:[#allocation10 + $0x8] sm:$0xff]  ;;  %v4899_v7 = vld [vmem:[#allocation10] sm:$0xff] }
 0xa63   :  { %3319 = vmatpush3.msra.mxu0 %v4840_v44  ;;  %v4908_v0 = vld [vmem:[%s5082_s11 + $0x78] sm:$0xff]  ;;  %v4913_v35 = vld [vmem:[%s5082_s11 + $0x70] sm:$0xff]  ;;  %v4920_v37 = vld [vmem:[%s5082_s11 + $0x68] sm:$0xff] }
 0xa64   :  { %2581 = vperm.xlu0 %3635, %v2876_v36   ;;  %3320 = vmatprep.subr.mxu0 %v5138_v50  ;;  %v4927_v17 = vld [vmem:[%s5082_s11 + $0x60] sm:$0xff]  ;;  %v4934_v42 = vld [vmem:[%s5082_s11 + $0x58] sm:$0xff]  ;;  %v4941_v28 = vld [vmem:[%s5082_s11 + $0x50] sm:$0xff] }
 0xa65   :  { %3321 = vmatpush3.msra.mxu0 %v4849_v62  ;;  %3350 = vmatpush3.msra.mxu1 %v4908_v0  ;;  %v4948_v9 = vld [vmem:[%s5082_s11 + $0x48] sm:$0xff]  ;;  %v4955_v51 = vld [vmem:[%s5082_s11 + $0x40] sm:$0xff]  ;;  %v2495_v43 = vld [vmem:[%s5082_s11 + $0x38] sm:$0xff] }
 0xa66   :  { %3322 = vmatprep.subr.mxu0 %v5138_v50  ;;  %3351 = vmatprep.subr.mxu1 %v5138_v50  ;;  %v2388_v32 = vld [vmem:[#allocation2] sm:$0x1]  ;;  %v2576_v29 = vld [vmem:[#allocation2 + $0x1] sm:$0x1]  ;;  %v2493_v59 = vld [vmem:[%s5082_s11 + $0x28] sm:$0xff] }
 0xa67   :  { %3323 = vmatpush3.msra.mxu0 %v4855_v3  ;;  %3352 = vmatpush3.msra.mxu1 %v4913_v35  ;;  %v2492_v8 = vld [vmem:[%s5082_s11 + $0x20] sm:$0xff]  ;;  %v2491_v13 = vld [vmem:[%s5082_s11 + $0x18] sm:$0xff]  ;;  %v2490_v6 = vld [vmem:[%s5082_s11 + $0x10] sm:$0xff] }
 0xa68   :  { %3324 = vmatprep.subr.mxu0 %v5138_v50  ;;  %3353 = vmatprep.subr.mxu1 %v5138_v50  ;;  %v2489_v58 = vld [vmem:[%s5082_s11 + $0x8] sm:$0xff]  ;;  %v2488_v20 = vld [vmem:[%s5082_s11] sm:$0xff] }
 0xa69   :  { %3325 = vmatpush3.msra.mxu0 %v4859_v53  ;;  %3354 = vmatpush3.msra.mxu1 %v4920_v37  ;;  %v2416_v55 = vld [vmem:[%s5081_s10] sm:$0x1] }
 0xa6a   :  { %3326 = vmatprep.subr.mxu0 %v5138_v50  ;;  %3355 = vmatprep.subr.mxu1 %v5138_v50  ;;  %v2605_v48 = vld [vmem:[%s5081_s10] sm:$0x1] }
 0xa6b   :  { %3327 = vmatpush3.msra.mxu0 %v4863_v12  ;;  %3356 = vmatpush3.msra.mxu1 %v4927_v17  ;;  %v2504_v22 = vld [vmem:[%s5083_s12] sm:$0x1] }
 0xa6c   :  { %3328 = vmatprep.subr.mxu0 %v5138_v50  ;;  %3357 = vmatprep.subr.mxu1 %v5138_v50  ;;  %v2693_v1 = vld [vmem:[%s5083_s12] sm:$0x1] }
 0xa6d   :  { %3329 = vmatpush3.msra.mxu0 %v4867_v41  ;;  %3358 = vmatpush3.msra.mxu1 %v4934_v42 }
 0xa6e   :  { %3330 = vmatprep.subr.mxu0 %v5138_v50  ;;  %3359 = vmatprep.subr.mxu1 %v5138_v50 }
 0xa6f   :  { %3331 = vmatpush3.msra.mxu0 %v4871_v23  ;;  %3360 = vmatpush3.msra.mxu1 %v4941_v28 }
 0xa70   :  { %3332 = vmatprep.subr.mxu0 %v5138_v50  ;;  %3361 = vmatprep.subr.mxu1 %v5138_v50 }
 0xa71   :  { %3333 = vmatpush3.msra.mxu0 %v4875_v25  ;;  %3362 = vmatpush3.msra.mxu1 %v4948_v9 }
 0xa72   :  { %3334 = vmatprep.subr.mxu0 %v5138_v50  ;;  %3363 = vmatprep.subr.mxu1 %v5138_v50 }
 0xa73   :  { %3335 = vmatpush3.msra.mxu0 %v4879_v11  ;;  %3364 = vmatpush3.msra.mxu1 %v4955_v51 }
 0xa74   :  { %3336 = vmatprep.subr.mxu0 %v5138_v50  ;;  %3365 = vmatprep.subr.mxu1 %v5138_v50 }
 0xa75   :  { %3337 = vmatpush3.msra.mxu0 %v4883_v47  ;;  %3366 = vmatpush3.msra.mxu1 %v2495_v43 }
 0xa76   :  { %3338 = vmatprep.subr.mxu0 %v5138_v50  ;;  %3367 = vmatprep.subr.mxu1 %v5138_v50 }
 0xa77   :  { %3339 = vmatpush3.msra.mxu0 %v4887_v5 }
 0xa78   :  { %3340 = vmatprep.subr.mxu0 %v5138_v50 }
 0xa79   :  { %3341 = vmatpush3.msra.mxu0 %v4891_v40 }
 0xa7a   :  { %3342 = vmatprep.subr.mxu0 %v5138_v50 }
 0xa7b   :  { %3343 = vmatpush3.msra.mxu0 %v4895_v46 }
 0xa7c   :  { %3344 = vmatprep.subr.mxu0 %v5138_v50 }
 0xa7d   :  { %3345 = vmatpush3.msra.mxu0 %v4899_v7 }
 0xa7e   :  { %3384 = vmatprep.subr.mxu0 %v5138_v50 }
 0xadb   :  { %v2393_v61 = vpop.permute.xlu0 %2392 }
 0xadc   :  { %v2398_v38 = vrot.slane %v2393_v61, %v3853_v2 }
 0xade   :  { %v2399_v49 = vmul.f32 %v2398_v38, %v2388_v32 }
 0xadf   :  { %v2582_v30 = vpop.permute.xlu0 %2581 }
 0xae0   :  { %3347 = vmatmul.mubr.f32.vlgmr.msra.gmra.mxu0 %v2399_v49  ;;  %v2587_v33 = vrot.slane %v2582_v30, %v3853_v2  ;;  %v2494_v2 = vld [vmem:[%s5082_s11 + $0x30] sm:$0xff] }
 0xae1   :  { %3385 = vmatpush3.msra.mxu0 %v4833_v15  ;;  %3416 = vmatprep.mubr.msk.f32.mxu0 %vm3756_vm0, %v5138_v50 }
 0xae2   :  { %3386 = vmatprep.subr.mxu0 %v5138_v50  ;;  %v2588_v34 = vmul.f32 %v2587_v33, %v2576_v29  ;;  %3368 = vmatpush3.msra.mxu1 %v2494_v2 }
 0xae3   :  { %3387 = vmatpush3.msra.mxu0 %v4837_v14  ;;  %3369 = vmatprep.subr.mxu1 %v5138_v50 }
 0xae4   :  { %3388 = vmatprep.subr.mxu0 %v5138_v50  ;;  %3370 = vmatpush3.msra.mxu1 %v2493_v59 }
 0xae5   :  { %3389 = vmatpush3.msra.mxu0 %v4840_v44  ;;  %3371 = vmatprep.subr.mxu1 %v5138_v50 }
 0xae6   :  { %3390 = vmatprep.subr.mxu0 %v5138_v50  ;;  %3372 = vmatpush3.msra.mxu1 %v2492_v8 }
 0xae7   :  { %3391 = vmatpush3.msra.mxu0 %v4849_v62  ;;  %3373 = vmatprep.subr.mxu1 %v5138_v50 }
 0xae8   :  { %3392 = vmatprep.subr.mxu0 %v5138_v50  ;;  %3374 = vmatpush3.msra.mxu1 %v2491_v13 }
 0xae9   :  { %3393 = vmatpush3.msra.mxu0 %v4855_v3  ;;  %3375 = vmatprep.subr.mxu1 %v5138_v50 }
 0xaea   :  { %3394 = vmatprep.subr.mxu0 %v5138_v50  ;;  %3376 = vmatpush3.msra.mxu1 %v2490_v6 }
 0xaeb   :  { %3395 = vmatpush3.msra.mxu0 %v4859_v53  ;;  %3377 = vmatprep.subr.mxu1 %v5138_v50 }
 0xaec   :  { %3396 = vmatprep.subr.mxu0 %v5138_v50  ;;  %3378 = vmatpush3.msra.mxu1 %v2489_v58 }
 0xaed   :  { %3397 = vmatpush3.msra.mxu0 %v4863_v12  ;;  %3379 = vmatprep.subr.mxu1 %v5138_v50 }
 0xaee   :  { %3398 = vmatprep.subr.mxu0 %v5138_v50  ;;  %3380 = vmatpush3.msra.mxu1 %v2488_v20 }
 0xaef   :  { %3399 = vmatpush3.msra.mxu0 %v4867_v41  ;;  %3419 = vmatprep.subr.mxu1 %v5138_v50 }
 0xaf0   :  { %3400 = vmatprep.subr.mxu0 %v5138_v50 }
 0xaf1   :  { %3401 = vmatpush3.msra.mxu0 %v4871_v23 }
 0xaf2   :  { %3402 = vmatprep.subr.mxu0 %v5138_v50 }
 0xaf3   :  { %3403 = vmatpush3.msra.mxu0 %v4875_v25 }
 0xaf4   :  { %3404 = vmatprep.subr.mxu0 %v5138_v50 }
 0xaf5   :  { %3405 = vmatpush3.msra.mxu0 %v4879_v11 }
 0xaf6   :  { %3406 = vmatprep.subr.mxu0 %v5138_v50 }
 0xaf7   :  { %3407 = vmatpush3.msra.mxu0 %v4883_v47 }
 0xaf8   :  { %3408 = vmatprep.subr.mxu0 %v5138_v50 }
 0xaf9   :  { %3409 = vmatpush3.msra.mxu0 %v4887_v5 }
 0xafa   :  { %3410 = vmatprep.subr.mxu0 %v5138_v50 }
 0xafb   :  { %3411 = vmatpush3.msra.mxu0 %v4891_v40 }
 0xafc   :  { %3412 = vmatprep.subr.mxu0 %v5138_v50 }
 0xafd   :  { %3413 = vmatpush3.msra.mxu0 %v4895_v46 }
 0xafe   :  { %3414 = vmatprep.subr.mxu0 %v5138_v50 }
 0xaff   :  { %3415 = vmatpush3.msra.mxu0 %v4899_v7 }
 0xb00   :  { %3417 = vmatmul.mubr.f32.vlgmr.msra.gmra.mxu0 %v2588_v34 }
 0xba0   :  { %v2483_v52 = vpop.f32.mrf.mxu0 }
 0xba1   :  { %v2484_v31 = vadd.f32 %v2483_v52, %v2416_v55 }
 0xba2   :  { %v3348_v60 = vpop.f32.mrf.mxu0 }
 0xba3   :  { %3636 = vtanh.f32 %v2484_v31 }
 0xbb0   :  { %v3637_v54 = vpop.eup %3636 }
 0xbb1   :  { %3382 = vmatmul.mubr.f32.vlgmr.msra.gmra.mxu1 %v3637_v54 }
 0xbb2   :  { %3420 = vmatpush3.msra.mxu1 %v4908_v0  ;;  %3451 = vmatprep.mubr.msk.f32.mxu1 %vm3756_vm0, %v5138_v50 }
 0xbb3   :  { %3421 = vmatprep.subr.mxu1 %v5138_v50 }
 0xbb4   :  { %3422 = vmatpush3.msra.mxu1 %v4913_v35 }
 0xbb5   :  { %3423 = vmatprep.subr.mxu1 %v5138_v50 }
 0xbb6   :  { %3424 = vmatpush3.msra.mxu1 %v4920_v37 }
 0xbb7   :  { %3425 = vmatprep.subr.mxu1 %v5138_v50 }
 0xbb8   :  { %3426 = vmatpush3.msra.mxu1 %v4927_v17 }
 0xbb9   :  { %3427 = vmatprep.subr.mxu1 %v5138_v50 }
 0xbba   :  { %3428 = vmatpush3.msra.mxu1 %v4934_v42 }
 0xbbb   :  { %3429 = vmatprep.subr.mxu1 %v5138_v50 }
 0xbbc   :  { %3430 = vmatpush3.msra.mxu1 %v4941_v28 }
 0xbbd   :  { %3431 = vmatprep.subr.mxu1 %v5138_v50 }
 0xbbe   :  { %3432 = vmatpush3.msra.mxu1 %v4948_v9 }
 0xbbf   :  { %3433 = vmatprep.subr.mxu1 %v5138_v50 }
 0xbc0   :  { %v2672_v26 = vpop.f32.mrf.mxu0  ;;  %3434 = vmatpush3.msra.mxu1 %v4955_v51 }
 0xbc1   :  { %v2673_v45 = vadd.f32 %v2672_v26, %v2605_v48  ;;  %3435 = vmatprep.subr.mxu1 %v5138_v50 }
 0xbc2   :  { %v3418_v27 = vpop.f32.mrf.mxu0  ;;  %3436 = vmatpush3.msra.mxu1 %v2495_v43 }
 0xbc3   :  { %3638 = vtanh.f32 %v2673_v45  ;;  %3437 = vmatprep.subr.mxu1 %v5138_v50 }
 0xbc4   :  { %3438 = vmatpush3.msra.mxu1 %v2494_v2 }
 0xbc5   :  { %3439 = vmatprep.subr.mxu1 %v5138_v50 }
 0xbc6   :  { %3440 = vmatpush3.msra.mxu1 %v2493_v59 }
 0xbc7   :  { %3441 = vmatprep.subr.mxu1 %v5138_v50 }
 0xbc8   :  { %3442 = vmatpush3.msra.mxu1 %v2492_v8 }
 0xbc9   :  { %3443 = vmatprep.subr.mxu1 %v5138_v50 }
 0xbca   :  { %3444 = vmatpush3.msra.mxu1 %v2491_v13 }
 0xbcb   :  { %3445 = vmatprep.subr.mxu1 %v5138_v50 }
 0xbcc   :  { %3446 = vmatpush3.msra.mxu1 %v2490_v6 }
 0xbcd   :  { %3447 = vmatprep.subr.mxu1 %v5138_v50 }
 0xbce   :  { %3448 = vmatpush3.msra.mxu1 %v2489_v58 }
 0xbcf   :  { %3449 = vmatprep.subr.mxu1 %v5138_v50 }
 0xbd0   :  { %v3639_v19 = vpop.eup %3638  ;;  %3450 = vmatpush3.msra.mxu1 %v2488_v20 }
 0xbd1   :  { %3452 = vmatmul.mubr.f32.vlgmr.msra.gmra.mxu1 %v3639_v19 }
 0xc71   :  { %v2571_v18 = vpop.f32.mrf.mxu1 }
 0xc72   :  { %v2572_v39 = vadd.f32 %v2571_v18, %v2504_v22 }
 0xc73   :  { %v3383_v56 = vpop.f32.mrf.mxu1 }
 0xc74   :  { %2575 = vst [vmem:[%s5084_s13] sm:$0x1] %v2572_v39 }
 0xc91   :  { %v2760_v21 = vpop.f32.mrf.mxu1 }
 0xc92   :  { %v2761_v16 = vadd.f32 %v2760_v21, %v2693_v1 }
 0xc93   :  { %v3453_v57 = vpop.f32.mrf.mxu1 }
 0xc94   :  { %2877 = vst [vmem:[%s5084_s13 + $0x1] sm:$0x1] %v2761_v16 }
 0xc95   :  { %2770 = vsyncpa [#allocation6], 1 }
 0xc96   :  { %2771 = vsyncpa [#allocation8], 1 }
 0xc97   :  { %2772 = vsyncpa [#allocation11], 1 }

</bundles_post_ra>
